<compile_context>
chip_gen: v6e
topology: v6e:2x2x1
jax: 0.10.0
libtpu: 0.0.40
codegen_flags: <defaults>
</compile_context>

<pallas_src>
import functools

import jax
import jax.numpy as jnp
import numpy as np
from jax import lax
from jax.experimental import pallas as pl
from jax.experimental.pallas import tpu as pltpu


# ----------------------------------------------------------------------------
# Fused kernel: (conv3x3x3 + bias + GroupNorm + LeakyReLU) x 2, Nb samples/step
# ----------------------------------------------------------------------------
def _double_conv_kernel(x_ref, w1_ref, w2_ref,
                        b1_ref, g1_ref, be1_ref,
                        b2_ref, g2_ref, be2_ref,
                        m_ref, o_ref,
                        xpad1_ref, xpad2_ref, col1_ref, col2_ref,
                        *, Nb, D, H, W, Cin, Cout, eps, slope):
    # x_ref:   (Nb, D, H, W*Cin)           input samples, channels-last, W*C in lanes
    # w1_ref:  (9*W*Cin,  W*Cout)  bf16    concat-K banded conv weights (tap = kd*3+kh)
    # w2_ref:  (9*W*Cout, W*Cout)  bf16
    # b*/g*/be*: (1, W*Cout)               bias / gamma / beta tiled over W
    # m_ref:   (W*Cout, W*Cout)            group-aggregation matrix (mean weights)
    # o_ref:   (Nb*D*H, W*Cout)            lane-dense output slab
    # xpad*:   (Nb, D+2, H+2, W*C)  f32    zero-halo (D,H) scratch (persistent)
    # col*:    (Nb*D*H, 9*W*C)      bf16   im2col slab, taps concatenated along K
    DH = D * H
    WCi = W * Cin
    WCo = W * Cout

    # Zero the (D,H) halos once; interiors are fully overwritten every step.
    @pl.when(pl.program_id(0) == 0)
    def _():
        xpad1_ref[...] = jnp.zeros_like(xpad1_ref)
        xpad2_ref[...] = jnp.zeros_like(xpad2_ref)

    def conv_gn_lrelu(xpad_ref, col_ref, WC, w_ref, bias_ref, gamma_ref, beta_ref):
        # im2col: concat the 9 (kd,kh) taps along K (kw + W padding live in the
        # banded weights); cast to bf16 once, fused into the stripe store.
        for s in range(Nb):                              # static unroll (Nb small)
            for t in range(9):
                kd, kh = divmod(t, 3)
                a = xpad_ref[s, kd:kd + D, kh:kh + H, :]              # (D,H,WC) f32
                col_ref[s * DH:(s + 1) * DH, t * WC:(t + 1) * WC] = (
                    a.reshape(DH, WC).astype(jnp.bfloat16))

        # ONE MXU matmul for the whole layer: (Nb*DH, 9*WC) @ (9*WC, WCo).
        acc = jnp.dot(col_ref[...], w_ref[...],
                      preferred_element_type=jnp.float32) + bias_ref[...]

        # Per-sample GroupNorm (single-pass stats) + affine + LeakyReLU.
        m = m_ref[...]
        outs = []
        for s in range(Nb):
            a_s = acc[s * DH:(s + 1) * DH, :]                         # (DH, WCo)
            ssum = jnp.sum(a_s, axis=0, keepdims=True)                # (1, WCo)
            sqsum = jnp.sum(a_s * a_s, axis=0, keepdims=True)         # (1, WCo)
            mean = jnp.dot(ssum, m, preferred_element_type=jnp.float32)
            ex2 = jnp.dot(sqsum, m, preferred_element_type=jnp.float32)
            var = jnp.maximum(ex2 - mean * mean, 0.0)                 # biased (PyTorch)
            inv = lax.rsqrt(var + eps)
            y = (a_s - mean) * (inv * gamma_ref[...]) + beta_ref[...]
            outs.append(jnp.where(y >= 0.0, y, slope * y))            # LeakyReLU(0.2)
        return outs                                                   # Nb x (DH, WCo)

    # ---- layer 1 -------------------------------------------------------------
    for s in range(Nb):
        xpad1_ref[s, 1:1 + D, 1:1 + H, :] = x_ref[s]
    y1 = conv_gn_lrelu(xpad1_ref, col1_ref, WCi, w1_ref, b1_ref, g1_ref, be1_ref)

    # ---- layer 2: intermediate never leaves VMEM -----------------------------
    for s in range(Nb):
        xpad2_ref[s, 1:1 + D, 1:1 + H, :] = y1[s].reshape(D, H, WCo)
    y2 = conv_gn_lrelu(xpad2_ref, col2_ref, WCo, w2_ref, b2_ref, g2_ref, be2_ref)

    for s in range(Nb):
        o_ref[s * DH:(s + 1) * DH, :] = y2[s]


# ----------------------------------------------------------------------------
# One-time constant preparation (hoisted out of the jitted forward)
# ----------------------------------------------------------------------------
def _banded_weights(wgt, W):
    """wgt (3,3,3,Cin,Cout) -> (9*W*Cin, W*Cout) concat-K banded conv weights.

    For tap t=(kd,kh): rows [t*W*Cin, (t+1)*W*Cin) hold
    B[p*Cin+ci, w*Cout+co] = wgt[kd,kh, p-w+1, ci, co] when 0 <= p-w+1 <= 2,
    else 0 (rows falling into the W halo are dropped == zero padding)."""
    _, _, _, Cin, Cout = wgt.shape
    Wp = W + 2
    w9 = wgt.reshape(9, 3 * Cin, Cout)                    # (kd*3+kh, kw*Cin+ci, co)

    def one(K):
        base = jnp.pad(K, ((0, (Wp - 3) * Cin), (0, 0)))  # (Wp*Cin, Cout)
        cols = jnp.stack([jnp.roll(base, w * Cin, axis=0) for w in range(W)])
        cols = cols[:, Cin:Cin + W * Cin, :]              # drop W-halo rows
        return jnp.transpose(cols, (1, 0, 2)).reshape(W * Cin, W * Cout)

    return jax.vmap(one)(w9).reshape(9 * W * Cin, W * Cout)


def _group_matrix(Cout, W, DHW):
    """(W*Cout, W*Cout) matrix s.t. row_sums @ M = per-column group mean."""
    assert Cout % 8 == 0, "GroupNorm(C//8) path assumes 8 channels per group"
    groups = Cout // 8
    Cg = Cout // groups
    co = np.arange(W * Cout) % Cout
    same = (co[:, None] // Cg) == (co[None, :] // Cg)
    return jnp.asarray(same, jnp.float32) / float(DHW * Cg)


def prepare_double_conv(params, D, H, W):
    """Precompute kernel-ready constants ONCE (not on the per-call hot path)."""
    Cout = params["w1"].shape[-1]
    assert Cout % 8 == 0, "GroupNorm(C//8) path assumes 8 channels per group"
    tile = lambda v: jnp.tile(v, (1, W))                  # (1,Cout) -> (1,W*Cout)
    return dict(
        w1=_banded_weights(params["w1"], W).astype(jnp.bfloat16),
        w2=_banded_weights(params["w2"], W).astype(jnp.bfloat16),
        b1=tile(params["b1"]), g1=tile(params["gamma1"]), be1=tile(params["beta1"]),
        b2=tile(params["b2"]), g2=tile(params["gamma2"]), be2=tile(params["beta2"]),
        m=_group_matrix(Cout, W, D * H * W),
    )


def _pick_nb(N, DH, target=128):
    """Smallest divisor of N whose M = Nb*DH fills the MXU row dim (>=128)."""
    for nb in range(1, N + 1):
        if N % nb == 0 and nb * DH >= target:
            return nb
    return N


# ----------------------------------------------------------------------------
# DoubleConv: params + forward
# ----------------------------------------------------------------------------
def init_double_conv(key, in_channels, out_channels):
    k1, k2, k3, k4 = jax.random.split(key, 4)
    fan1 = in_channels * 27
    fan2 = out_channels * 27
    w1 = jax.random.uniform(k1, (3, 3, 3, in_channels, out_channels),
                            jnp.float32, -1.0, 1.0) / np.sqrt(fan1)
    b1 = jax.random.uniform(k2, (1, out_channels), jnp.float32, -1.0, 1.0) / np.sqrt(fan1)
    w2 = jax.random.uniform(k3, (3, 3, 3, out_channels, out_channels),
                            jnp.float32, -1.0, 1.0) / np.sqrt(fan2)
    b2 = jax.random.uniform(k4, (1, out_channels), jnp.float32, -1.0, 1.0) / np.sqrt(fan2)
    return dict(
        w1=w1, b1=b1, gamma1=jnp.ones((1, out_channels), jnp.float32),
        beta1=jnp.zeros((1, out_channels), jnp.float32),
        w2=w2, b2=b2, gamma2=jnp.ones((1, out_channels), jnp.float32),
        beta2=jnp.zeros((1, out_channels), jnp.float32),
    )


@jax.jit
def double_conv_forward(prep, x_ncdhw):
    """Forward matching PyTorch DoubleConv. Input / output are NCDHW (f32)."""
    N, Cin, D, H, W = x_ncdhw.shape
    WCo = prep["b1"].shape[1]
    Cout = WCo // W
    WCi = W * Cin
    DH = D * H
    Nb = _pick_nb(N, DH)
    grid = (N // Nb,)

    # Glue: NCDHW -> lane-dense (N, D, H, W*Cin)
    x = jnp.transpose(x_ncdhw, (0, 2, 3, 4, 1)).reshape(N, D, H, WCi)

    kernel = functools.partial(_double_conv_kernel, Nb=Nb, D=D, H=H, W=W,
                               Cin=Cin, Cout=Cout, eps=1e-5, slope=0.2)

    flops = 2 * N * DH * WCo * (9 * WCi + 9 * WCo)
    bytes_acc = 4 * (x.size + N * DH * WCo) + 2 * (prep["w1"].size + prep["w2"].size)

    const2d = lambda shape: pl.BlockSpec(shape, lambda i: (0, 0))

    out = pl.pallas_call(
        kernel,
        out_shape=jax.ShapeDtypeStruct((N * DH, WCo), jnp.float32),
        grid=grid,
        in_specs=[
            pl.BlockSpec((Nb, D, H, WCi), lambda i: (i, 0, 0, 0)),   # x (Nb samples)
            const2d((9 * WCi, WCo)),                                 # w1 (invariant)
            const2d((9 * WCo, WCo)),                                 # w2 (invariant)
            const2d((1, WCo)),                                       # b1
            const2d((1, WCo)),                                       # gamma1
            const2d((1, WCo)),                                       # beta1
            const2d((1, WCo)),                                       # b2
            const2d((1, WCo)),                                       # gamma2
            const2d((1, WCo)),                                       # beta2
            const2d((WCo, WCo)),                                     # group matrix
        ],
        out_specs=pl.BlockSpec((Nb * DH, WCo), lambda i: (i, 0)),
        scratch_shapes=[
            pltpu.VMEM((Nb, D + 2, H + 2, WCi), jnp.float32),        # xpad1 (halo)
            pltpu.VMEM((Nb, D + 2, H + 2, WCo), jnp.float32),        # xpad2 (halo)
            pltpu.VMEM((Nb * DH, 9 * WCi), jnp.bfloat16),            # im2col layer 1
            pltpu.VMEM((Nb * DH, 9 * WCo), jnp.bfloat16),            # im2col layer 2
        ],
        compiler_params=pltpu.CompilerParams(
            dimension_semantics=("parallel",),
            vmem_limit_bytes=32 * 1024 * 1024),
        cost_estimate=pl.CostEstimate(flops=int(flops), transcendentals=0,
                                      bytes_accessed=int(bytes_acc)),
    )(x, prep["w1"], prep["w2"], prep["b1"], prep["g1"], prep["be1"],
      prep["b2"], prep["g2"], prep["be2"], prep["m"])

    # Glue: (N*D*H, W*Cout) -> NCDHW
    out = out.reshape(N, D, H, W, Cout)
    return jnp.transpose(out, (0, 4, 1, 2, 3))


# ----------------------------------------------------------------------------
# Plain-JAX reference (numerical verification only)
# ----------------------------------------------------------------------------
def _ref_forward(params, x):
    Cout = params["w1"].shape[-1]
    groups = Cout // 8

    def conv(x, w, b):
        w_oidhw = jnp.transpose(w, (4, 3, 0, 1, 2))
        y = lax.conv_general_dilated(
            x, w_oidhw, window_strides=(1, 1, 1), padding=[(1, 1)] * 3,
            dimension_numbers=("NCDHW", "OIDHW", "NCDHW"))
        return y + b[0][None, :, None, None, None]

    def gn(x, gamma, beta, eps=1e-5):
        N, C, D, H, W = x.shape
        xg = x.reshape(N, groups, C // groups, D, H, W)
        mu = xg.mean(axis=(2, 3, 4, 5), keepdims=True)
        var = xg.var(axis=(2, 3, 4, 5), keepdims=True)
        xn = ((xg - mu) / jnp.sqrt(var + eps)).reshape(N, C, D, H, W)
        return xn * gamma[0][None, :, None, None, None] + beta[0][None, :, None, None, None]

    lrelu = lambda v: jnp.where(v >= 0, v, 0.2 * v)
    y = lrelu(gn(conv(x, params["w1"], params["b1"]), params["gamma1"], params["beta1"]))
    y = lrelu(gn(conv(y, params["w2"], params["b2"]), params["gamma2"], params["beta2"]))
    return y


if __name__ == "__main__":
    key = jax.random.PRNGKey(0)
    kx, kp = jax.random.split(key)

    N, Cin, Cout, D, H, W = 2, 4, 16, 8, 8, 8      # DoubleConv(4, 16), GN groups = 2
    x = jax.random.normal(kx, (N, Cin, D, H, W), jnp.float32)   # PyTorch NCDHW

    params = init_double_conv(kp, Cin, Cout)
    prep = prepare_double_conv(params, D, H, W)    # one-time, off the hot path

    out = jax.block_until_ready(double_conv_forward(prep, x))
    assert out.shape == (N, Cout, D, H, W), out.shape

    ref = jax.block_until_ready(_ref_forward(params, x))
    np.testing.assert_allclose(np.asarray(out), np.asarray(ref), atol=5e-2, rtol=5e-2)

    print("KERNEL_OK")
</pallas_src>

<mosaic_0001>
module attributes {stable_mosaic.version = 11 : i64} {
  func.func @_double_conv_kernel(%arg0: i32, %arg1: memref<2x8x8x32xf32, #tpu.memory_space<vmem>>, %arg2: memref<288x128xbf16, #tpu.memory_space<vmem>>, %arg3: memref<1152x128xbf16, #tpu.memory_space<vmem>>, %arg4: memref<1x128xf32, #tpu.memory_space<vmem>>, %arg5: memref<1x128xf32, #tpu.memory_space<vmem>>, %arg6: memref<1x128xf32, #tpu.memory_space<vmem>>, %arg7: memref<1x128xf32, #tpu.memory_space<vmem>>, %arg8: memref<1x128xf32, #tpu.memory_space<vmem>>, %arg9: memref<1x128xf32, #tpu.memory_space<vmem>>, %arg10: memref<128x128xf32, #tpu.memory_space<vmem>>, %arg11: memref<128x128xf32, #tpu.memory_space<vmem>>, %arg12: memref<2x10x10x32xf32, #tpu.memory_space<vmem>>, %arg13: memref<2x10x10x128xf32, #tpu.memory_space<vmem>>, %arg14: memref<128x288xbf16, #tpu.memory_space<vmem>>, %arg15: memref<128x1152xbf16, #tpu.memory_space<vmem>>) attributes {dimension_semantics = [#tpu.dimension_semantics<parallel>], iteration_bounds = array<i64: 1>, scalar_prefetch = 0 : i64, scratch_operands = 4 : i64, tpu.core_type = #tpu.core_type<tc>, window_params = [{transform_indices = @transform_0, window_bounds = array<i64: 2, 8, 8, 32>}, {pipeline_mode = #tpu.pipeline_mode<synchronous>, transform_indices = @transform_1, window_bounds = array<i64: 288, 128>}, {pipeline_mode = #tpu.pipeline_mode<synchronous>, transform_indices = @transform_2, window_bounds = array<i64: 1152, 128>}, {pipeline_mode = #tpu.pipeline_mode<synchronous>, transform_indices = @transform_3, window_bounds = array<i64: 1, 128>}, {pipeline_mode = #tpu.pipeline_mode<synchronous>, transform_indices = @transform_4, window_bounds = array<i64: 1, 128>}, {pipeline_mode = #tpu.pipeline_mode<synchronous>, transform_indices = @transform_5, window_bounds = array<i64: 1, 128>}, {pipeline_mode = #tpu.pipeline_mode<synchronous>, transform_indices = @transform_6, window_bounds = array<i64: 1, 128>}, {pipeline_mode = #tpu.pipeline_mode<synchronous>, transform_indices = @transform_7, window_bounds = array<i64: 1, 128>}, {pipeline_mode = #tpu.pipeline_mode<synchronous>, transform_indices = @transform_8, window_bounds = array<i64: 1, 128>}, {pipeline_mode = #tpu.pipeline_mode<synchronous>, transform_indices = @transform_9, window_bounds = array<i64: 128, 128>}, {transform_indices = @transform_10, window_bounds = array<i64: 128, 128>}]} {
    %c0_i32 = arith.constant 0 : i32
    %0 = arith.cmpi eq, %arg0, %c0_i32 : i32
    %1 = arith.extui %0 : i1 to i32
    %c0_i32_0 = arith.constant 0 : i32
    %2 = arith.cmpi ne, %1, %c0_i32_0 : i32
    scf.if %2 {
      %cst_293 = arith.constant 0.000000e+00 : f32
      %333 = vector.broadcast %cst_293 : f32 to vector<2x10x10x32xf32>
      %c0_294 = arith.constant 0 : index
      %c0_295 = arith.constant 0 : index
      %c0_296 = arith.constant 0 : index
      %c0_297 = arith.constant 0 : index
      %334 = vector.load %arg12[%c0_294, %c0_295, %c0_296, %c0_297] : memref<2x10x10x32xf32, #tpu.memory_space<vmem>>, vector<2x10x10x32xf32>
      tpu.vector_store %arg12[%c0_294, %c0_295, %c0_296, %c0_297], %333 {strides = array<i32>} : memref<2x10x10x32xf32, #tpu.memory_space<vmem>>, vector<2x10x10x32xf32>,
      %cst_298 = arith.constant 0.000000e+00 : f32
      %335 = vector.broadcast %cst_298 : f32 to vector<2x10x10x128xf32>
      %c0_299 = arith.constant 0 : index
      %c0_300 = arith.constant 0 : index
      %c0_301 = arith.constant 0 : index
      %c0_302 = arith.constant 0 : index
      %336 = vector.load %arg13[%c0_299, %c0_300, %c0_301, %c0_302] : memref<2x10x10x128xf32, #tpu.memory_space<vmem>>, vector<2x10x10x128xf32>
      tpu.vector_store %arg13[%c0_299, %c0_300, %c0_301, %c0_302], %335 {strides = array<i32>} : memref<2x10x10x128xf32, #tpu.memory_space<vmem>>, vector<2x10x10x128xf32>,
    } else {
    }
    %c0 = arith.constant 0 : index
    %c0_1 = arith.constant 0 : index
    %c0_2 = arith.constant 0 : index
    %c0_3 = arith.constant 0 : index
    %3 = vector.load %arg1[%c0, %c0_1, %c0_2, %c0_3] : memref<2x8x8x32xf32, #tpu.memory_space<vmem>>, vector<1x8x8x32xf32>
    %4 = vector.shape_cast %3 : vector<1x8x8x32xf32> to vector<8x8x32xf32>
    %c0_4 = arith.constant 0 : index
    %c1 = arith.constant 1 : index
    %c1_5 = arith.constant 1 : index
    %c0_6 = arith.constant 0 : index
    %5 = vector.load %arg12[%c0_4, %c1, %c1_5, %c0_6] : memref<2x10x10x32xf32, #tpu.memory_space<vmem>>, vector<1x8x8x32xf32>
    %6 = vector.shape_cast %5 : vector<1x8x8x32xf32> to vector<8x8x32xf32>
    %7 = vector.shape_cast %4 : vector<8x8x32xf32> to vector<1x8x8x32xf32>
    tpu.vector_store %arg12[%c0_4, %c1, %c1_5, %c0_6], %7 {strides = array<i32>} : memref<2x10x10x32xf32, #tpu.memory_space<vmem>>, vector<1x8x8x32xf32>,
    %c1_7 = arith.constant 1 : index
    %c0_8 = arith.constant 0 : index
    %c0_9 = arith.constant 0 : index
    %c0_10 = arith.constant 0 : index
    %8 = vector.load %arg1[%c1_7, %c0_8, %c0_9, %c0_10] : memref<2x8x8x32xf32, #tpu.memory_space<vmem>>, vector<1x8x8x32xf32>
    %9 = vector.shape_cast %8 : vector<1x8x8x32xf32> to vector<8x8x32xf32>
    %c1_11 = arith.constant 1 : index
    %c1_12 = arith.constant 1 : index
    %c1_13 = arith.constant 1 : index
    %c0_14 = arith.constant 0 : index
    %10 = vector.load %arg12[%c1_11, %c1_12, %c1_13, %c0_14] : memref<2x10x10x32xf32, #tpu.memory_space<vmem>>, vector<1x8x8x32xf32>
    %11 = vector.shape_cast %10 : vector<1x8x8x32xf32> to vector<8x8x32xf32>
    %12 = vector.shape_cast %9 : vector<8x8x32xf32> to vector<1x8x8x32xf32>
    tpu.vector_store %arg12[%c1_11, %c1_12, %c1_13, %c0_14], %12 {strides = array<i32>} : memref<2x10x10x32xf32, #tpu.memory_space<vmem>>, vector<1x8x8x32xf32>,
    %c0_15 = arith.constant 0 : index
    %c0_16 = arith.constant 0 : index
    %c0_17 = arith.constant 0 : index
    %c0_18 = arith.constant 0 : index
    %13 = vector.load %arg12[%c0_15, %c0_16, %c0_17, %c0_18] : memref<2x10x10x32xf32, #tpu.memory_space<vmem>>, vector<1x8x8x32xf32>
    %14 = vector.shape_cast %13 : vector<1x8x8x32xf32> to vector<8x8x32xf32>
    %15 = vector.shape_cast %14 : vector<8x8x32xf32> to vector<64x32xf32>
    %16 = arith.truncf %15 : vector<64x32xf32> to vector<64x32xbf16>
    %c0_19 = arith.constant 0 : index
    %c0_20 = arith.constant 0 : index
    %17 = vector.load %arg14[%c0_19, %c0_20] : memref<128x288xbf16, #tpu.memory_space<vmem>>, vector<64x32xbf16>
    tpu.vector_store %arg14[%c0_19, %c0_20], %16 {strides = array<i32>} : memref<128x288xbf16, #tpu.memory_space<vmem>>, vector<64x32xbf16>,
    %c0_21 = arith.constant 0 : index
    %c0_22 = arith.constant 0 : index
    %c1_23 = arith.constant 1 : index
    %c0_24 = arith.constant 0 : index
    %18 = vector.load %arg12[%c0_21, %c0_22, %c1_23, %c0_24] : memref<2x10x10x32xf32, #tpu.memory_space<vmem>>, vector<1x8x8x32xf32>
    %19 = vector.shape_cast %18 : vector<1x8x8x32xf32> to vector<8x8x32xf32>
    %20 = vector.shape_cast %19 : vector<8x8x32xf32> to vector<64x32xf32>
    %21 = arith.truncf %20 : vector<64x32xf32> to vector<64x32xbf16>
    %c0_25 = arith.constant 0 : index
    %c32 = arith.constant 32 : index
    %22 = vector.load %arg14[%c0_25, %c32] : memref<128x288xbf16, #tpu.memory_space<vmem>>, vector<64x32xbf16>
    tpu.vector_store %arg14[%c0_25, %c32], %21 {strides = array<i32>} : memref<128x288xbf16, #tpu.memory_space<vmem>>, vector<64x32xbf16>,
    %c0_26 = arith.constant 0 : index
    %c0_27 = arith.constant 0 : index
    %c2 = arith.constant 2 : index
    %c0_28 = arith.constant 0 : index
    %23 = vector.load %arg12[%c0_26, %c0_27, %c2, %c0_28] : memref<2x10x10x32xf32, #tpu.memory_space<vmem>>, vector<1x8x8x32xf32>
    %24 = vector.shape_cast %23 : vector<1x8x8x32xf32> to vector<8x8x32xf32>
    %25 = vector.shape_cast %24 : vector<8x8x32xf32> to vector<64x32xf32>
    %26 = arith.truncf %25 : vector<64x32xf32> to vector<64x32xbf16>
    %c0_29 = arith.constant 0 : index
    %c64 = arith.constant 64 : index
    %27 = vector.load %arg14[%c0_29, %c64] : memref<128x288xbf16, #tpu.memory_space<vmem>>, vector<64x32xbf16>
    tpu.vector_store %arg14[%c0_29, %c64], %26 {strides = array<i32>} : memref<128x288xbf16, #tpu.memory_space<vmem>>, vector<64x32xbf16>,
    %c0_30 = arith.constant 0 : index
    %c1_31 = arith.constant 1 : index
    %c0_32 = arith.constant 0 : index
    %c0_33 = arith.constant 0 : index
    %28 = vector.load %arg12[%c0_30, %c1_31, %c0_32, %c0_33] : memref<2x10x10x32xf32, #tpu.memory_space<vmem>>, vector<1x8x8x32xf32>
    %29 = vector.shape_cast %28 : vector<1x8x8x32xf32> to vector<8x8x32xf32>
    %30 = vector.shape_cast %29 : vector<8x8x32xf32> to vector<64x32xf32>
    %31 = arith.truncf %30 : vector<64x32xf32> to vector<64x32xbf16>
    %c0_34 = arith.constant 0 : index
    %c96 = arith.constant 96 : index
    %32 = vector.load %arg14[%c0_34, %c96] : memref<128x288xbf16, #tpu.memory_space<vmem>>, vector<64x32xbf16>
    tpu.vector_store %arg14[%c0_34, %c96], %31 {strides = array<i32>} : memref<128x288xbf16, #tpu.memory_space<vmem>>, vector<64x32xbf16>,
    %c0_35 = arith.constant 0 : index
    %c1_36 = arith.constant 1 : index
    %c1_37 = arith.constant 1 : index
    %c0_38 = arith.constant 0 : index
    %33 = vector.load %arg12[%c0_35, %c1_36, %c1_37, %c0_38] : memref<2x10x10x32xf32, #tpu.memory_space<vmem>>, vector<1x8x8x32xf32>
    %34 = vector.shape_cast %33 : vector<1x8x8x32xf32> to vector<8x8x32xf32>
    %35 = vector.shape_cast %34 : vector<8x8x32xf32> to vector<64x32xf32>
    %36 = arith.truncf %35 : vector<64x32xf32> to vector<64x32xbf16>
    %c0_39 = arith.constant 0 : index
    %c128 = arith.constant 128 : index
    %37 = vector.load %arg14[%c0_39, %c128] : memref<128x288xbf16, #tpu.memory_space<vmem>>, vector<64x32xbf16>
    tpu.vector_store %arg14[%c0_39, %c128], %36 {strides = array<i32>} : memref<128x288xbf16, #tpu.memory_space<vmem>>, vector<64x32xbf16>,
    %c0_40 = arith.constant 0 : index
    %c1_41 = arith.constant 1 : index
    %c2_42 = arith.constant 2 : index
    %c0_43 = arith.constant 0 : index
    %38 = vector.load %arg12[%c0_40, %c1_41, %c2_42, %c0_43] : memref<2x10x10x32xf32, #tpu.memory_space<vmem>>, vector<1x8x8x32xf32>
    %39 = vector.shape_cast %38 : vector<1x8x8x32xf32> to vector<8x8x32xf32>
    %40 = vector.shape_cast %39 : vector<8x8x32xf32> to vector<64x32xf32>
    %41 = arith.truncf %40 : vector<64x32xf32> to vector<64x32xbf16>
    %c0_44 = arith.constant 0 : index
    %c160 = arith.constant 160 : index
    %42 = vector.load %arg14[%c0_44, %c160] : memref<128x288xbf16, #tpu.memory_space<vmem>>, vector<64x32xbf16>
    tpu.vector_store %arg14[%c0_44, %c160], %41 {strides = array<i32>} : memref<128x288xbf16, #tpu.memory_space<vmem>>, vector<64x32xbf16>,
    %c0_45 = arith.constant 0 : index
    %c2_46 = arith.constant 2 : index
    %c0_47 = arith.constant 0 : index
    %c0_48 = arith.constant 0 : index
    %43 = vector.load %arg12[%c0_45, %c2_46, %c0_47, %c0_48] : memref<2x10x10x32xf32, #tpu.memory_space<vmem>>, vector<1x8x8x32xf32>
    %44 = vector.shape_cast %43 : vector<1x8x8x32xf32> to vector<8x8x32xf32>
    %45 = vector.shape_cast %44 : vector<8x8x32xf32> to vector<64x32xf32>
    %46 = arith.truncf %45 : vector<64x32xf32> to vector<64x32xbf16>
    %c0_49 = arith.constant 0 : index
    %c192 = arith.constant 192 : index
    %47 = vector.load %arg14[%c0_49, %c192] : memref<128x288xbf16, #tpu.memory_space<vmem>>, vector<64x32xbf16>
    tpu.vector_store %arg14[%c0_49, %c192], %46 {strides = array<i32>} : memref<128x288xbf16, #tpu.memory_space<vmem>>, vector<64x32xbf16>,
    %c0_50 = arith.constant 0 : index
    %c2_51 = arith.constant 2 : index
    %c1_52 = arith.constant 1 : index
    %c0_53 = arith.constant 0 : index
    %48 = vector.load %arg12[%c0_50, %c2_51, %c1_52, %c0_53] : memref<2x10x10x32xf32, #tpu.memory_space<vmem>>, vector<1x8x8x32xf32>
    %49 = vector.shape_cast %48 : vector<1x8x8x32xf32> to vector<8x8x32xf32>
    %50 = vector.shape_cast %49 : vector<8x8x32xf32> to vector<64x32xf32>
    %51 = arith.truncf %50 : vector<64x32xf32> to vector<64x32xbf16>
    %c0_54 = arith.constant 0 : index
    %c224 = arith.constant 224 : index
    %52 = vector.load %arg14[%c0_54, %c224] : memref<128x288xbf16, #tpu.memory_space<vmem>>, vector<64x32xbf16>
    tpu.vector_store %arg14[%c0_54, %c224], %51 {strides = array<i32>} : memref<128x288xbf16, #tpu.memory_space<vmem>>, vector<64x32xbf16>,
    %c0_55 = arith.constant 0 : index
    %c2_56 = arith.constant 2 : index
    %c2_57 = arith.constant 2 : index
    %c0_58 = arith.constant 0 : index
    %53 = vector.load %arg12[%c0_55, %c2_56, %c2_57, %c0_58] : memref<2x10x10x32xf32, #tpu.memory_space<vmem>>, vector<1x8x8x32xf32>
    %54 = vector.shape_cast %53 : vector<1x8x8x32xf32> to vector<8x8x32xf32>
    %55 = vector.shape_cast %54 : vector<8x8x32xf32> to vector<64x32xf32>
    %56 = arith.truncf %55 : vector<64x32xf32> to vector<64x32xbf16>
    %c0_59 = arith.constant 0 : index
    %c256 = arith.constant 256 : index
    %57 = vector.load %arg14[%c0_59, %c256] : memref<128x288xbf16, #tpu.memory_space<vmem>>, vector<64x32xbf16>
    tpu.vector_store %arg14[%c0_59, %c256], %56 {strides = array<i32>} : memref<128x288xbf16, #tpu.memory_space<vmem>>, vector<64x32xbf16>,
    %c1_60 = arith.constant 1 : index
    %c0_61 = arith.constant 0 : index
    %c0_62 = arith.constant 0 : index
    %c0_63 = arith.constant 0 : index
    %58 = vector.load %arg12[%c1_60, %c0_61, %c0_62, %c0_63] : memref<2x10x10x32xf32, #tpu.memory_space<vmem>>, vector<1x8x8x32xf32>
    %59 = vector.shape_cast %58 : vector<1x8x8x32xf32> to vector<8x8x32xf32>
    %60 = vector.shape_cast %59 : vector<8x8x32xf32> to vector<64x32xf32>
    %61 = arith.truncf %60 : vector<64x32xf32> to vector<64x32xbf16>
    %c64_64 = arith.constant 64 : index
    %c0_65 = arith.constant 0 : index
    %62 = vector.load %arg14[%c64_64, %c0_65] : memref<128x288xbf16, #tpu.memory_space<vmem>>, vector<64x32xbf16>
    tpu.vector_store %arg14[%c64_64, %c0_65], %61 {strides = array<i32>} : memref<128x288xbf16, #tpu.memory_space<vmem>>, vector<64x32xbf16>,
    %c1_66 = arith.constant 1 : index
    %c0_67 = arith.constant 0 : index
    %c1_68 = arith.constant 1 : index
    %c0_69 = arith.constant 0 : index
    %63 = vector.load %arg12[%c1_66, %c0_67, %c1_68, %c0_69] : memref<2x10x10x32xf32, #tpu.memory_space<vmem>>, vector<1x8x8x32xf32>
    %64 = vector.shape_cast %63 : vector<1x8x8x32xf32> to vector<8x8x32xf32>
    %65 = vector.shape_cast %64 : vector<8x8x32xf32> to vector<64x32xf32>
    %66 = arith.truncf %65 : vector<64x32xf32> to vector<64x32xbf16>
    %c64_70 = arith.constant 64 : index
    %c32_71 = arith.constant 32 : index
    %67 = vector.load %arg14[%c64_70, %c32_71] : memref<128x288xbf16, #tpu.memory_space<vmem>>, vector<64x32xbf16>
    tpu.vector_store %arg14[%c64_70, %c32_71], %66 {strides = array<i32>} : memref<128x288xbf16, #tpu.memory_space<vmem>>, vector<64x32xbf16>,
    %c1_72 = arith.constant 1 : index
    %c0_73 = arith.constant 0 : index
    %c2_74 = arith.constant 2 : index
    %c0_75 = arith.constant 0 : index
    %68 = vector.load %arg12[%c1_72, %c0_73, %c2_74, %c0_75] : memref<2x10x10x32xf32, #tpu.memory_space<vmem>>, vector<1x8x8x32xf32>
    %69 = vector.shape_cast %68 : vector<1x8x8x32xf32> to vector<8x8x32xf32>
    %70 = vector.shape_cast %69 : vector<8x8x32xf32> to vector<64x32xf32>
    %71 = arith.truncf %70 : vector<64x32xf32> to vector<64x32xbf16>
    %c64_76 = arith.constant 64 : index
    %c64_77 = arith.constant 64 : index
    %72 = vector.load %arg14[%c64_76, %c64_77] : memref<128x288xbf16, #tpu.memory_space<vmem>>, vector<64x32xbf16>
    tpu.vector_store %arg14[%c64_76, %c64_77], %71 {strides = array<i32>} : memref<128x288xbf16, #tpu.memory_space<vmem>>, vector<64x32xbf16>,
    %c1_78 = arith.constant 1 : index
    %c1_79 = arith.constant 1 : index
    %c0_80 = arith.constant 0 : index
    %c0_81 = arith.constant 0 : index
    %73 = vector.load %arg12[%c1_78, %c1_79, %c0_80, %c0_81] : memref<2x10x10x32xf32, #tpu.memory_space<vmem>>, vector<1x8x8x32xf32>
    %74 = vector.shape_cast %73 : vector<1x8x8x32xf32> to vector<8x8x32xf32>
    %75 = vector.shape_cast %74 : vector<8x8x32xf32> to vector<64x32xf32>
    %76 = arith.truncf %75 : vector<64x32xf32> to vector<64x32xbf16>
    %c64_82 = arith.constant 64 : index
    %c96_83 = arith.constant 96 : index
    %77 = vector.load %arg14[%c64_82, %c96_83] : memref<128x288xbf16, #tpu.memory_space<vmem>>, vector<64x32xbf16>
    tpu.vector_store %arg14[%c64_82, %c96_83], %76 {strides = array<i32>} : memref<128x288xbf16, #tpu.memory_space<vmem>>, vector<64x32xbf16>,
    %c1_84 = arith.constant 1 : index
    %c1_85 = arith.constant 1 : index
    %c1_86 = arith.constant 1 : index
    %c0_87 = arith.constant 0 : index
    %78 = vector.load %arg12[%c1_84, %c1_85, %c1_86, %c0_87] : memref<2x10x10x32xf32, #tpu.memory_space<vmem>>, vector<1x8x8x32xf32>
    %79 = vector.shape_cast %78 : vector<1x8x8x32xf32> to vector<8x8x32xf32>
    %80 = vector.shape_cast %79 : vector<8x8x32xf32> to vector<64x32xf32>
    %81 = arith.truncf %80 : vector<64x32xf32> to vector<64x32xbf16>
    %c64_88 = arith.constant 64 : index
    %c128_89 = arith.constant 128 : index
    %82 = vector.load %arg14[%c64_88, %c128_89] : memref<128x288xbf16, #tpu.memory_space<vmem>>, vector<64x32xbf16>
    tpu.vector_store %arg14[%c64_88, %c128_89], %81 {strides = array<i32>} : memref<128x288xbf16, #tpu.memory_space<vmem>>, vector<64x32xbf16>,
    %c1_90 = arith.constant 1 : index
    %c1_91 = arith.constant 1 : index
    %c2_92 = arith.constant 2 : index
    %c0_93 = arith.constant 0 : index
    %83 = vector.load %arg12[%c1_90, %c1_91, %c2_92, %c0_93] : memref<2x10x10x32xf32, #tpu.memory_space<vmem>>, vector<1x8x8x32xf32>
    %84 = vector.shape_cast %83 : vector<1x8x8x32xf32> to vector<8x8x32xf32>
    %85 = vector.shape_cast %84 : vector<8x8x32xf32> to vector<64x32xf32>
    %86 = arith.truncf %85 : vector<64x32xf32> to vector<64x32xbf16>
    %c64_94 = arith.constant 64 : index
    %c160_95 = arith.constant 160 : index
    %87 = vector.load %arg14[%c64_94, %c160_95] : memref<128x288xbf16, #tpu.memory_space<vmem>>, vector<64x32xbf16>
    tpu.vector_store %arg14[%c64_94, %c160_95], %86 {strides = array<i32>} : memref<128x288xbf16, #tpu.memory_space<vmem>>, vector<64x32xbf16>,
    %c1_96 = arith.constant 1 : index
    %c2_97 = arith.constant 2 : index
    %c0_98 = arith.constant 0 : index
    %c0_99 = arith.constant 0 : index
    %88 = vector.load %arg12[%c1_96, %c2_97, %c0_98, %c0_99] : memref<2x10x10x32xf32, #tpu.memory_space<vmem>>, vector<1x8x8x32xf32>
    %89 = vector.shape_cast %88 : vector<1x8x8x32xf32> to vector<8x8x32xf32>
    %90 = vector.shape_cast %89 : vector<8x8x32xf32> to vector<64x32xf32>
    %91 = arith.truncf %90 : vector<64x32xf32> to vector<64x32xbf16>
    %c64_100 = arith.constant 64 : index
    %c192_101 = arith.constant 192 : index
    %92 = vector.load %arg14[%c64_100, %c192_101] : memref<128x288xbf16, #tpu.memory_space<vmem>>, vector<64x32xbf16>
    tpu.vector_store %arg14[%c64_100, %c192_101], %91 {strides = array<i32>} : memref<128x288xbf16, #tpu.memory_space<vmem>>, vector<64x32xbf16>,
    %c1_102 = arith.constant 1 : index
    %c2_103 = arith.constant 2 : index
    %c1_104 = arith.constant 1 : index
    %c0_105 = arith.constant 0 : index
    %93 = vector.load %arg12[%c1_102, %c2_103, %c1_104, %c0_105] : memref<2x10x10x32xf32, #tpu.memory_space<vmem>>, vector<1x8x8x32xf32>
    %94 = vector.shape_cast %93 : vector<1x8x8x32xf32> to vector<8x8x32xf32>
    %95 = vector.shape_cast %94 : vector<8x8x32xf32> to vector<64x32xf32>
    %96 = arith.truncf %95 : vector<64x32xf32> to vector<64x32xbf16>
    %c64_106 = arith.constant 64 : index
    %c224_107 = arith.constant 224 : index
    %97 = vector.load %arg14[%c64_106, %c224_107] : memref<128x288xbf16, #tpu.memory_space<vmem>>, vector<64x32xbf16>
    tpu.vector_store %arg14[%c64_106, %c224_107], %96 {strides = array<i32>} : memref<128x288xbf16, #tpu.memory_space<vmem>>, vector<64x32xbf16>,
    %c1_108 = arith.constant 1 : index
    %c2_109 = arith.constant 2 : index
    %c2_110 = arith.constant 2 : index
    %c0_111 = arith.constant 0 : index
    %98 = vector.load %arg12[%c1_108, %c2_109, %c2_110, %c0_111] : memref<2x10x10x32xf32, #tpu.memory_space<vmem>>, vector<1x8x8x32xf32>
    %99 = vector.shape_cast %98 : vector<1x8x8x32xf32> to vector<8x8x32xf32>
    %100 = vector.shape_cast %99 : vector<8x8x32xf32> to vector<64x32xf32>
    %101 = arith.truncf %100 : vector<64x32xf32> to vector<64x32xbf16>
    %c64_112 = arith.constant 64 : index
    %c256_113 = arith.constant 256 : index
    %102 = vector.load %arg14[%c64_112, %c256_113] : memref<128x288xbf16, #tpu.memory_space<vmem>>, vector<64x32xbf16>
    tpu.vector_store %arg14[%c64_112, %c256_113], %101 {strides = array<i32>} : memref<128x288xbf16, #tpu.memory_space<vmem>>, vector<64x32xbf16>,
    %c0_114 = arith.constant 0 : index
    %c0_115 = arith.constant 0 : index
    %103 = vector.load %arg14[%c0_114, %c0_115] : memref<128x288xbf16, #tpu.memory_space<vmem>>, vector<128x288xbf16>
    %c0_116 = arith.constant 0 : index
    %c0_117 = arith.constant 0 : index
    %104 = vector.load %arg2[%c0_116, %c0_117] : memref<288x128xbf16, #tpu.memory_space<vmem>>, vector<288x128xbf16>
    %cst = arith.constant dense<0.000000e+00> : vector<128x128xf32>
    %105 = tpu.matmul %103, %104, %cst {dimension_numbers = #tpu.dot_dimension_numbers<[1], [0], [0], [1], [0, 0, 1, 1], [], []>} : vector<128x288xbf16>, vector<288x128xbf16>, vector<128x128xf32> -> vector<128x128xf32>
    %c0_118 = arith.constant 0 : index
    %c0_119 = arith.constant 0 : index
    %106 = vector.load %arg4[%c0_118, %c0_119] : memref<1x128xf32, #tpu.memory_space<vmem>>, vector<1x128xf32>
    %107 = vector.broadcast %106 : vector<1x128xf32> to vector<128x128xf32>
    %108 = arith.addf %105, %107 : vector<128x128xf32>
    %c0_120 = arith.constant 0 : index
    %c0_121 = arith.constant 0 : index
    %109 = vector.load %arg10[%c0_120, %c0_121] : memref<128x128xf32, #tpu.memory_space<vmem>>, vector<128x128xf32>
    %110 = vector.extract_strided_slice %108 {offsets = [0, 0], sizes = [64, 128], strides = [1, 1]} : vector<128x128xf32> to vector<64x128xf32>
    %cst_122 = arith.constant dense<0.000000e+00> : vector<128xf32>
    %111 = vector.multi_reduction <add>, %110, %cst_122 [0] : vector<64x128xf32> to vector<128xf32>
    %112 = vector.shape_cast %111 : vector<128xf32> to vector<1x128xf32>
    %113 = arith.mulf %110, %110 : vector<64x128xf32>
    %cst_123 = arith.constant dense<0.000000e+00> : vector<128xf32>
    %114 = vector.multi_reduction <add>, %113, %cst_123 [0] : vector<64x128xf32> to vector<128xf32>
    %115 = vector.shape_cast %114 : vector<128xf32> to vector<1x128xf32>
    %cst_124 = arith.constant dense<0.000000e+00> : vector<1x128xf32>
    %116 = tpu.matmul %112, %109, %cst_124 {dimension_numbers = #tpu.dot_dimension_numbers<[1], [0], [0], [1], [0, 0, 1, 1], [], []>} : vector<1x128xf32>, vector<128x128xf32>, vector<1x128xf32> -> vector<1x128xf32>
    %cst_125 = arith.constant dense<0.000000e+00> : vector<1x128xf32>
    %117 = tpu.matmul %115, %109, %cst_125 {dimension_numbers = #tpu.dot_dimension_numbers<[1], [0], [0], [1], [0, 0, 1, 1], [], []>} : vector<1x128xf32>, vector<128x128xf32>, vector<1x128xf32> -> vector<1x128xf32>
    %118 = arith.mulf %116, %116 : vector<1x128xf32>
    %119 = arith.subf %117, %118 : vector<1x128xf32>
    %cst_126 = arith.constant 0.000000e+00 : f32
    %120 = vector.broadcast %cst_126 : f32 to vector<1x128xf32>
    %121 = arith.maximumf %119, %120 : vector<1x128xf32>
    %cst_127 = arith.constant 9.99999974E-6 : f32
    %122 = vector.broadcast %cst_127 : f32 to vector<1x128xf32>
    %123 = arith.addf %121, %122 : vector<1x128xf32>
    %124 = math.rsqrt %123 : vector<1x128xf32>
    %125 = vector.broadcast %116 : vector<1x128xf32> to vector<64x128xf32>
    %126 = arith.subf %110, %125 : vector<64x128xf32>
    %c0_128 = arith.constant 0 : index
    %c0_129 = arith.constant 0 : index
    %127 = vector.load %arg5[%c0_128, %c0_129] : memref<1x128xf32, #tpu.memory_space<vmem>>, vector<1x128xf32>
    %128 = arith.mulf %124, %127 : vector<1x128xf32>
    %129 = vector.broadcast %128 : vector<1x128xf32> to vector<64x128xf32>
    %130 = arith.mulf %126, %129 : vector<64x128xf32>
    %c0_130 = arith.constant 0 : index
    %c0_131 = arith.constant 0 : index
    %131 = vector.load %arg6[%c0_130, %c0_131] : memref<1x128xf32, #tpu.memory_space<vmem>>, vector<1x128xf32>
    %132 = vector.broadcast %131 : vector<1x128xf32> to vector<64x128xf32>
    %133 = arith.addf %130, %132 : vector<64x128xf32>
    %cst_132 = arith.constant 0.000000e+00 : f32
    %134 = vector.broadcast %cst_132 : f32 to vector<64x128xf32>
    %135 = arith.cmpf oge, %133, %134 : vector<64x128xf32>
    %cst_133 = arith.constant 2.000000e-01 : f32
    %136 = vector.broadcast %cst_133 : f32 to vector<64x128xf32>
    %137 = arith.mulf %136, %133 : vector<64x128xf32>
    %138 = arith.select %135, %133, %137 : vector<64x128xi1>, vector<64x128xf32>
    %139 = vector.extract_strided_slice %108 {offsets = [64, 0], sizes = [64, 128], strides = [1, 1]} : vector<128x128xf32> to vector<64x128xf32>
    %cst_134 = arith.constant dense<0.000000e+00> : vector<128xf32>
    %140 = vector.multi_reduction <add>, %139, %cst_134 [0] : vector<64x128xf32> to vector<128xf32>
    %141 = vector.shape_cast %140 : vector<128xf32> to vector<1x128xf32>
    %142 = arith.mulf %139, %139 : vector<64x128xf32>
    %cst_135 = arith.constant dense<0.000000e+00> : vector<128xf32>
    %143 = vector.multi_reduction <add>, %142, %cst_135 [0] : vector<64x128xf32> to vector<128xf32>
    %144 = vector.shape_cast %143 : vector<128xf32> to vector<1x128xf32>
    %cst_136 = arith.constant dense<0.000000e+00> : vector<1x128xf32>
    %145 = tpu.matmul %141, %109, %cst_136 {dimension_numbers = #tpu.dot_dimension_numbers<[1], [0], [0], [1], [0, 0, 1, 1], [], []>} : vector<1x128xf32>, vector<128x128xf32>, vector<1x128xf32> -> vector<1x128xf32>
    %cst_137 = arith.constant dense<0.000000e+00> : vector<1x128xf32>
    %146 = tpu.matmul %144, %109, %cst_137 {dimension_numbers = #tpu.dot_dimension_numbers<[1], [0], [0], [1], [0, 0, 1, 1], [], []>} : vector<1x128xf32>, vector<128x128xf32>, vector<1x128xf32> -> vector<1x128xf32>
    %147 = arith.mulf %145, %145 : vector<1x128xf32>
    %148 = arith.subf %146, %147 : vector<1x128xf32>
    %cst_138 = arith.constant 0.000000e+00 : f32
    %149 = vector.broadcast %cst_138 : f32 to vector<1x128xf32>
    %150 = arith.maximumf %148, %149 : vector<1x128xf32>
    %cst_139 = arith.constant 9.99999974E-6 : f32
    %151 = vector.broadcast %cst_139 : f32 to vector<1x128xf32>
    %152 = arith.addf %150, %151 : vector<1x128xf32>
    %153 = math.rsqrt %152 : vector<1x128xf32>
    %154 = vector.broadcast %145 : vector<1x128xf32> to vector<64x128xf32>
    %155 = arith.subf %139, %154 : vector<64x128xf32>
    %c0_140 = arith.constant 0 : index
    %c0_141 = arith.constant 0 : index
    %156 = vector.load %arg5[%c0_140, %c0_141] : memref<1x128xf32, #tpu.memory_space<vmem>>, vector<1x128xf32>
    %157 = arith.mulf %153, %156 : vector<1x128xf32>
    %158 = vector.broadcast %157 : vector<1x128xf32> to vector<64x128xf32>
    %159 = arith.mulf %155, %158 : vector<64x128xf32>
    %c0_142 = arith.constant 0 : index
    %c0_143 = arith.constant 0 : index
    %160 = vector.load %arg6[%c0_142, %c0_143] : memref<1x128xf32, #tpu.memory_space<vmem>>, vector<1x128xf32>
    %161 = vector.broadcast %160 : vector<1x128xf32> to vector<64x128xf32>
    %162 = arith.addf %159, %161 : vector<64x128xf32>
    %cst_144 = arith.constant 0.000000e+00 : f32
    %163 = vector.broadcast %cst_144 : f32 to vector<64x128xf32>
    %164 = arith.cmpf oge, %162, %163 : vector<64x128xf32>
    %cst_145 = arith.constant 2.000000e-01 : f32
    %165 = vector.broadcast %cst_145 : f32 to vector<64x128xf32>
    %166 = arith.mulf %165, %162 : vector<64x128xf32>
    %167 = arith.select %164, %162, %166 : vector<64x128xi1>, vector<64x128xf32>
    %168 = vector.shape_cast %138 : vector<64x128xf32> to vector<8x8x128xf32>
    %c0_146 = arith.constant 0 : index
    %c1_147 = arith.constant 1 : index
    %c1_148 = arith.constant 1 : index
    %c0_149 = arith.constant 0 : index
    %169 = vector.load %arg13[%c0_146, %c1_147, %c1_148, %c0_149] : memref<2x10x10x128xf32, #tpu.memory_space<vmem>>, vector<1x8x8x128xf32>
    %170 = vector.shape_cast %169 : vector<1x8x8x128xf32> to vector<8x8x128xf32>
    %171 = vector.shape_cast %168 : vector<8x8x128xf32> to vector<1x8x8x128xf32>
    tpu.vector_store %arg13[%c0_146, %c1_147, %c1_148, %c0_149], %171 {strides = array<i32>} : memref<2x10x10x128xf32, #tpu.memory_space<vmem>>, vector<1x8x8x128xf32>,
    %172 = vector.shape_cast %167 : vector<64x128xf32> to vector<8x8x128xf32>
    %c1_150 = arith.constant 1 : index
    %c1_151 = arith.constant 1 : index
    %c1_152 = arith.constant 1 : index
    %c0_153 = arith.constant 0 : index
    %173 = vector.load %arg13[%c1_150, %c1_151, %c1_152, %c0_153] : memref<2x10x10x128xf32, #tpu.memory_space<vmem>>, vector<1x8x8x128xf32>
    %174 = vector.shape_cast %173 : vector<1x8x8x128xf32> to vector<8x8x128xf32>
    %175 = vector.shape_cast %172 : vector<8x8x128xf32> to vector<1x8x8x128xf32>
    tpu.vector_store %arg13[%c1_150, %c1_151, %c1_152, %c0_153], %175 {strides = array<i32>} : memref<2x10x10x128xf32, #tpu.memory_space<vmem>>, vector<1x8x8x128xf32>,
    %c0_154 = arith.constant 0 : index
    %c0_155 = arith.constant 0 : index
    %c0_156 = arith.constant 0 : index
    %c0_157 = arith.constant 0 : index
    %176 = vector.load %arg13[%c0_154, %c0_155, %c0_156, %c0_157] : memref<2x10x10x128xf32, #tpu.memory_space<vmem>>, vector<1x8x8x128xf32>
    %177 = vector.shape_cast %176 : vector<1x8x8x128xf32> to vector<8x8x128xf32>
    %178 = vector.shape_cast %177 : vector<8x8x128xf32> to vector<64x128xf32>
    %179 = arith.truncf %178 : vector<64x128xf32> to vector<64x128xbf16>
    %c0_158 = arith.constant 0 : index
    %c0_159 = arith.constant 0 : index
    %180 = vector.load %arg15[%c0_158, %c0_159] : memref<128x1152xbf16, #tpu.memory_space<vmem>>, vector<64x128xbf16>
    tpu.vector_store %arg15[%c0_158, %c0_159], %179 {strides = array<i32>} : memref<128x1152xbf16, #tpu.memory_space<vmem>>, vector<64x128xbf16>,
    %c0_160 = arith.constant 0 : index
    %c0_161 = arith.constant 0 : index
    %c1_162 = arith.constant 1 : index
    %c0_163 = arith.constant 0 : index
    %181 = vector.load %arg13[%c0_160, %c0_161, %c1_162, %c0_163] : memref<2x10x10x128xf32, #tpu.memory_space<vmem>>, vector<1x8x8x128xf32>
    %182 = vector.shape_cast %181 : vector<1x8x8x128xf32> to vector<8x8x128xf32>
    %183 = vector.shape_cast %182 : vector<8x8x128xf32> to vector<64x128xf32>
    %184 = arith.truncf %183 : vector<64x128xf32> to vector<64x128xbf16>
    %c0_164 = arith.constant 0 : index
    %c128_165 = arith.constant 128 : index
    %185 = vector.load %arg15[%c0_164, %c128_165] : memref<128x1152xbf16, #tpu.memory_space<vmem>>, vector<64x128xbf16>
    tpu.vector_store %arg15[%c0_164, %c128_165], %184 {strides = array<i32>} : memref<128x1152xbf16, #tpu.memory_space<vmem>>, vector<64x128xbf16>,
    %c0_166 = arith.constant 0 : index
    %c0_167 = arith.constant 0 : index
    %c2_168 = arith.constant 2 : index
    %c0_169 = arith.constant 0 : index
    %186 = vector.load %arg13[%c0_166, %c0_167, %c2_168, %c0_169] : memref<2x10x10x128xf32, #tpu.memory_space<vmem>>, vector<1x8x8x128xf32>
    %187 = vector.shape_cast %186 : vector<1x8x8x128xf32> to vector<8x8x128xf32>
    %188 = vector.shape_cast %187 : vector<8x8x128xf32> to vector<64x128xf32>
    %189 = arith.truncf %188 : vector<64x128xf32> to vector<64x128xbf16>
    %c0_170 = arith.constant 0 : index
    %c256_171 = arith.constant 256 : index
    %190 = vector.load %arg15[%c0_170, %c256_171] : memref<128x1152xbf16, #tpu.memory_space<vmem>>, vector<64x128xbf16>
    tpu.vector_store %arg15[%c0_170, %c256_171], %189 {strides = array<i32>} : memref<128x1152xbf16, #tpu.memory_space<vmem>>, vector<64x128xbf16>,
    %c0_172 = arith.constant 0 : index
    %c1_173 = arith.constant 1 : index
    %c0_174 = arith.constant 0 : index
    %c0_175 = arith.constant 0 : index
    %191 = vector.load %arg13[%c0_172, %c1_173, %c0_174, %c0_175] : memref<2x10x10x128xf32, #tpu.memory_space<vmem>>, vector<1x8x8x128xf32>
    %192 = vector.shape_cast %191 : vector<1x8x8x128xf32> to vector<8x8x128xf32>
    %193 = vector.shape_cast %192 : vector<8x8x128xf32> to vector<64x128xf32>
    %194 = arith.truncf %193 : vector<64x128xf32> to vector<64x128xbf16>
    %c0_176 = arith.constant 0 : index
    %c384 = arith.constant 384 : index
    %195 = vector.load %arg15[%c0_176, %c384] : memref<128x1152xbf16, #tpu.memory_space<vmem>>, vector<64x128xbf16>
    tpu.vector_store %arg15[%c0_176, %c384], %194 {strides = array<i32>} : memref<128x1152xbf16, #tpu.memory_space<vmem>>, vector<64x128xbf16>,
    %c0_177 = arith.constant 0 : index
    %c1_178 = arith.constant 1 : index
    %c1_179 = arith.constant 1 : index
    %c0_180 = arith.constant 0 : index
    %196 = vector.load %arg13[%c0_177, %c1_178, %c1_179, %c0_180] : memref<2x10x10x128xf32, #tpu.memory_space<vmem>>, vector<1x8x8x128xf32>
    %197 = vector.shape_cast %196 : vector<1x8x8x128xf32> to vector<8x8x128xf32>
    %198 = vector.shape_cast %197 : vector<8x8x128xf32> to vector<64x128xf32>
    %199 = arith.truncf %198 : vector<64x128xf32> to vector<64x128xbf16>
    %c0_181 = arith.constant 0 : index
    %c512 = arith.constant 512 : index
    %200 = vector.load %arg15[%c0_181, %c512] : memref<128x1152xbf16, #tpu.memory_space<vmem>>, vector<64x128xbf16>
    tpu.vector_store %arg15[%c0_181, %c512], %199 {strides = array<i32>} : memref<128x1152xbf16, #tpu.memory_space<vmem>>, vector<64x128xbf16>,
    %c0_182 = arith.constant 0 : index
    %c1_183 = arith.constant 1 : index
    %c2_184 = arith.constant 2 : index
    %c0_185 = arith.constant 0 : index
    %201 = vector.load %arg13[%c0_182, %c1_183, %c2_184, %c0_185] : memref<2x10x10x128xf32, #tpu.memory_space<vmem>>, vector<1x8x8x128xf32>
    %202 = vector.shape_cast %201 : vector<1x8x8x128xf32> to vector<8x8x128xf32>
    %203 = vector.shape_cast %202 : vector<8x8x128xf32> to vector<64x128xf32>
    %204 = arith.truncf %203 : vector<64x128xf32> to vector<64x128xbf16>
    %c0_186 = arith.constant 0 : index
    %c640 = arith.constant 640 : index
    %205 = vector.load %arg15[%c0_186, %c640] : memref<128x1152xbf16, #tpu.memory_space<vmem>>, vector<64x128xbf16>
    tpu.vector_store %arg15[%c0_186, %c640], %204 {strides = array<i32>} : memref<128x1152xbf16, #tpu.memory_space<vmem>>, vector<64x128xbf16>,
    %c0_187 = arith.constant 0 : index
    %c2_188 = arith.constant 2 : index
    %c0_189 = arith.constant 0 : index
    %c0_190 = arith.constant 0 : index
    %206 = vector.load %arg13[%c0_187, %c2_188, %c0_189, %c0_190] : memref<2x10x10x128xf32, #tpu.memory_space<vmem>>, vector<1x8x8x128xf32>
    %207 = vector.shape_cast %206 : vector<1x8x8x128xf32> to vector<8x8x128xf32>
    %208 = vector.shape_cast %207 : vector<8x8x128xf32> to vector<64x128xf32>
    %209 = arith.truncf %208 : vector<64x128xf32> to vector<64x128xbf16>
    %c0_191 = arith.constant 0 : index
    %c768 = arith.constant 768 : index
    %210 = vector.load %arg15[%c0_191, %c768] : memref<128x1152xbf16, #tpu.memory_space<vmem>>, vector<64x128xbf16>
    tpu.vector_store %arg15[%c0_191, %c768], %209 {strides = array<i32>} : memref<128x1152xbf16, #tpu.memory_space<vmem>>, vector<64x128xbf16>,
    %c0_192 = arith.constant 0 : index
    %c2_193 = arith.constant 2 : index
    %c1_194 = arith.constant 1 : index
    %c0_195 = arith.constant 0 : index
    %211 = vector.load %arg13[%c0_192, %c2_193, %c1_194, %c0_195] : memref<2x10x10x128xf32, #tpu.memory_space<vmem>>, vector<1x8x8x128xf32>
    %212 = vector.shape_cast %211 : vector<1x8x8x128xf32> to vector<8x8x128xf32>
    %213 = vector.shape_cast %212 : vector<8x8x128xf32> to vector<64x128xf32>
    %214 = arith.truncf %213 : vector<64x128xf32> to vector<64x128xbf16>
    %c0_196 = arith.constant 0 : index
    %c896 = arith.constant 896 : index
    %215 = vector.load %arg15[%c0_196, %c896] : memref<128x1152xbf16, #tpu.memory_space<vmem>>, vector<64x128xbf16>
    tpu.vector_store %arg15[%c0_196, %c896], %214 {strides = array<i32>} : memref<128x1152xbf16, #tpu.memory_space<vmem>>, vector<64x128xbf16>,
    %c0_197 = arith.constant 0 : index
    %c2_198 = arith.constant 2 : index
    %c2_199 = arith.constant 2 : index
    %c0_200 = arith.constant 0 : index
    %216 = vector.load %arg13[%c0_197, %c2_198, %c2_199, %c0_200] : memref<2x10x10x128xf32, #tpu.memory_space<vmem>>, vector<1x8x8x128xf32>
    %217 = vector.shape_cast %216 : vector<1x8x8x128xf32> to vector<8x8x128xf32>
    %218 = vector.shape_cast %217 : vector<8x8x128xf32> to vector<64x128xf32>
    %219 = arith.truncf %218 : vector<64x128xf32> to vector<64x128xbf16>
    %c0_201 = arith.constant 0 : index
    %c1024 = arith.constant 1024 : index
    %220 = vector.load %arg15[%c0_201, %c1024] : memref<128x1152xbf16, #tpu.memory_space<vmem>>, vector<64x128xbf16>
    tpu.vector_store %arg15[%c0_201, %c1024], %219 {strides = array<i32>} : memref<128x1152xbf16, #tpu.memory_space<vmem>>, vector<64x128xbf16>,
    %c1_202 = arith.constant 1 : index
    %c0_203 = arith.constant 0 : index
    %c0_204 = arith.constant 0 : index
    %c0_205 = arith.constant 0 : index
    %221 = vector.load %arg13[%c1_202, %c0_203, %c0_204, %c0_205] : memref<2x10x10x128xf32, #tpu.memory_space<vmem>>, vector<1x8x8x128xf32>
    %222 = vector.shape_cast %221 : vector<1x8x8x128xf32> to vector<8x8x128xf32>
    %223 = vector.shape_cast %222 : vector<8x8x128xf32> to vector<64x128xf32>
    %224 = arith.truncf %223 : vector<64x128xf32> to vector<64x128xbf16>
    %c64_206 = arith.constant 64 : index
    %c0_207 = arith.constant 0 : index
    %225 = vector.load %arg15[%c64_206, %c0_207] : memref<128x1152xbf16, #tpu.memory_space<vmem>>, vector<64x128xbf16>
    tpu.vector_store %arg15[%c64_206, %c0_207], %224 {strides = array<i32>} : memref<128x1152xbf16, #tpu.memory_space<vmem>>, vector<64x128xbf16>,
    %c1_208 = arith.constant 1 : index
    %c0_209 = arith.constant 0 : index
    %c1_210 = arith.constant 1 : index
    %c0_211 = arith.constant 0 : index
    %226 = vector.load %arg13[%c1_208, %c0_209, %c1_210, %c0_211] : memref<2x10x10x128xf32, #tpu.memory_space<vmem>>, vector<1x8x8x128xf32>
    %227 = vector.shape_cast %226 : vector<1x8x8x128xf32> to vector<8x8x128xf32>
    %228 = vector.shape_cast %227 : vector<8x8x128xf32> to vector<64x128xf32>
    %229 = arith.truncf %228 : vector<64x128xf32> to vector<64x128xbf16>
    %c64_212 = arith.constant 64 : index
    %c128_213 = arith.constant 128 : index
    %230 = vector.load %arg15[%c64_212, %c128_213] : memref<128x1152xbf16, #tpu.memory_space<vmem>>, vector<64x128xbf16>
    tpu.vector_store %arg15[%c64_212, %c128_213], %229 {strides = array<i32>} : memref<128x1152xbf16, #tpu.memory_space<vmem>>, vector<64x128xbf16>,
    %c1_214 = arith.constant 1 : index
    %c0_215 = arith.constant 0 : index
    %c2_216 = arith.constant 2 : index
    %c0_217 = arith.constant 0 : index
    %231 = vector.load %arg13[%c1_214, %c0_215, %c2_216, %c0_217] : memref<2x10x10x128xf32, #tpu.memory_space<vmem>>, vector<1x8x8x128xf32>
    %232 = vector.shape_cast %231 : vector<1x8x8x128xf32> to vector<8x8x128xf32>
    %233 = vector.shape_cast %232 : vector<8x8x128xf32> to vector<64x128xf32>
    %234 = arith.truncf %233 : vector<64x128xf32> to vector<64x128xbf16>
    %c64_218 = arith.constant 64 : index
    %c256_219 = arith.constant 256 : index
    %235 = vector.load %arg15[%c64_218, %c256_219] : memref<128x1152xbf16, #tpu.memory_space<vmem>>, vector<64x128xbf16>
    tpu.vector_store %arg15[%c64_218, %c256_219], %234 {strides = array<i32>} : memref<128x1152xbf16, #tpu.memory_space<vmem>>, vector<64x128xbf16>,
    %c1_220 = arith.constant 1 : index
    %c1_221 = arith.constant 1 : index
    %c0_222 = arith.constant 0 : index
    %c0_223 = arith.constant 0 : index
    %236 = vector.load %arg13[%c1_220, %c1_221, %c0_222, %c0_223] : memref<2x10x10x128xf32, #tpu.memory_space<vmem>>, vector<1x8x8x128xf32>
    %237 = vector.shape_cast %236 : vector<1x8x8x128xf32> to vector<8x8x128xf32>
    %238 = vector.shape_cast %237 : vector<8x8x128xf32> to vector<64x128xf32>
    %239 = arith.truncf %238 : vector<64x128xf32> to vector<64x128xbf16>
    %c64_224 = arith.constant 64 : index
    %c384_225 = arith.constant 384 : index
    %240 = vector.load %arg15[%c64_224, %c384_225] : memref<128x1152xbf16, #tpu.memory_space<vmem>>, vector<64x128xbf16>
    tpu.vector_store %arg15[%c64_224, %c384_225], %239 {strides = array<i32>} : memref<128x1152xbf16, #tpu.memory_space<vmem>>, vector<64x128xbf16>,
    %c1_226 = arith.constant 1 : index
    %c1_227 = arith.constant 1 : index
    %c1_228 = arith.constant 1 : index
    %c0_229 = arith.constant 0 : index
    %241 = vector.load %arg13[%c1_226, %c1_227, %c1_228, %c0_229] : memref<2x10x10x128xf32, #tpu.memory_space<vmem>>, vector<1x8x8x128xf32>
    %242 = vector.shape_cast %241 : vector<1x8x8x128xf32> to vector<8x8x128xf32>
    %243 = vector.shape_cast %242 : vector<8x8x128xf32> to vector<64x128xf32>
    %244 = arith.truncf %243 : vector<64x128xf32> to vector<64x128xbf16>
    %c64_230 = arith.constant 64 : index
    %c512_231 = arith.constant 512 : index
    %245 = vector.load %arg15[%c64_230, %c512_231] : memref<128x1152xbf16, #tpu.memory_space<vmem>>, vector<64x128xbf16>
    tpu.vector_store %arg15[%c64_230, %c512_231], %244 {strides = array<i32>} : memref<128x1152xbf16, #tpu.memory_space<vmem>>, vector<64x128xbf16>,
    %c1_232 = arith.constant 1 : index
    %c1_233 = arith.constant 1 : index
    %c2_234 = arith.constant 2 : index
    %c0_235 = arith.constant 0 : index
    %246 = vector.load %arg13[%c1_232, %c1_233, %c2_234, %c0_235] : memref<2x10x10x128xf32, #tpu.memory_space<vmem>>, vector<1x8x8x128xf32>
    %247 = vector.shape_cast %246 : vector<1x8x8x128xf32> to vector<8x8x128xf32>
    %248 = vector.shape_cast %247 : vector<8x8x128xf32> to vector<64x128xf32>
    %249 = arith.truncf %248 : vector<64x128xf32> to vector<64x128xbf16>
    %c64_236 = arith.constant 64 : index
    %c640_237 = arith.constant 640 : index
    %250 = vector.load %arg15[%c64_236, %c640_237] : memref<128x1152xbf16, #tpu.memory_space<vmem>>, vector<64x128xbf16>
    tpu.vector_store %arg15[%c64_236, %c640_237], %249 {strides = array<i32>} : memref<128x1152xbf16, #tpu.memory_space<vmem>>, vector<64x128xbf16>,
    %c1_238 = arith.constant 1 : index
    %c2_239 = arith.constant 2 : index
    %c0_240 = arith.constant 0 : index
    %c0_241 = arith.constant 0 : index
    %251 = vector.load %arg13[%c1_238, %c2_239, %c0_240, %c0_241] : memref<2x10x10x128xf32, #tpu.memory_space<vmem>>, vector<1x8x8x128xf32>
    %252 = vector.shape_cast %251 : vector<1x8x8x128xf32> to vector<8x8x128xf32>
    %253 = vector.shape_cast %252 : vector<8x8x128xf32> to vector<64x128xf32>
    %254 = arith.truncf %253 : vector<64x128xf32> to vector<64x128xbf16>
    %c64_242 = arith.constant 64 : index
    %c768_243 = arith.constant 768 : index
    %255 = vector.load %arg15[%c64_242, %c768_243] : memref<128x1152xbf16, #tpu.memory_space<vmem>>, vector<64x128xbf16>
    tpu.vector_store %arg15[%c64_242, %c768_243], %254 {strides = array<i32>} : memref<128x1152xbf16, #tpu.memory_space<vmem>>, vector<64x128xbf16>,
    %c1_244 = arith.constant 1 : index
    %c2_245 = arith.constant 2 : index
    %c1_246 = arith.constant 1 : index
    %c0_247 = arith.constant 0 : index
    %256 = vector.load %arg13[%c1_244, %c2_245, %c1_246, %c0_247] : memref<2x10x10x128xf32, #tpu.memory_space<vmem>>, vector<1x8x8x128xf32>
    %257 = vector.shape_cast %256 : vector<1x8x8x128xf32> to vector<8x8x128xf32>
    %258 = vector.shape_cast %257 : vector<8x8x128xf32> to vector<64x128xf32>
    %259 = arith.truncf %258 : vector<64x128xf32> to vector<64x128xbf16>
    %c64_248 = arith.constant 64 : index
    %c896_249 = arith.constant 896 : index
    %260 = vector.load %arg15[%c64_248, %c896_249] : memref<128x1152xbf16, #tpu.memory_space<vmem>>, vector<64x128xbf16>
    tpu.vector_store %arg15[%c64_248, %c896_249], %259 {strides = array<i32>} : memref<128x1152xbf16, #tpu.memory_space<vmem>>, vector<64x128xbf16>,
    %c1_250 = arith.constant 1 : index
    %c2_251 = arith.constant 2 : index
    %c2_252 = arith.constant 2 : index
    %c0_253 = arith.constant 0 : index
    %261 = vector.load %arg13[%c1_250, %c2_251, %c2_252, %c0_253] : memref<2x10x10x128xf32, #tpu.memory_space<vmem>>, vector<1x8x8x128xf32>
    %262 = vector.shape_cast %261 : vector<1x8x8x128xf32> to vector<8x8x128xf32>
    %263 = vector.shape_cast %262 : vector<8x8x128xf32> to vector<64x128xf32>
    %264 = arith.truncf %263 : vector<64x128xf32> to vector<64x128xbf16>
    %c64_254 = arith.constant 64 : index
    %c1024_255 = arith.constant 1024 : index
    %265 = vector.load %arg15[%c64_254, %c1024_255] : memref<128x1152xbf16, #tpu.memory_space<vmem>>, vector<64x128xbf16>
    tpu.vector_store %arg15[%c64_254, %c1024_255], %264 {strides = array<i32>} : memref<128x1152xbf16, #tpu.memory_space<vmem>>, vector<64x128xbf16>,
    %c0_256 = arith.constant 0 : index
    %c0_257 = arith.constant 0 : index
    %266 = vector.load %arg15[%c0_256, %c0_257] : memref<128x1152xbf16, #tpu.memory_space<vmem>>, vector<128x1152xbf16>
    %c0_258 = arith.constant 0 : index
    %c0_259 = arith.constant 0 : index
    %267 = vector.load %arg3[%c0_258, %c0_259] : memref<1152x128xbf16, #tpu.memory_space<vmem>>, vector<1152x128xbf16>
    %cst_260 = arith.constant dense<0.000000e+00> : vector<128x128xf32>
    %268 = tpu.matmul %266, %267, %cst_260 {dimension_numbers = #tpu.dot_dimension_numbers<[1], [0], [0], [1], [0, 0, 1, 1], [], []>} : vector<128x1152xbf16>, vector<1152x128xbf16>, vector<128x128xf32> -> vector<128x128xf32>
    %c0_261 = arith.constant 0 : index
    %c0_262 = arith.constant 0 : index
    %269 = vector.load %arg7[%c0_261, %c0_262] : memref<1x128xf32, #tpu.memory_space<vmem>>, vector<1x128xf32>
    %270 = vector.broadcast %269 : vector<1x128xf32> to vector<128x128xf32>
    %271 = arith.addf %268, %270 : vector<128x128xf32>
    %c0_263 = arith.constant 0 : index
    %c0_264 = arith.constant 0 : index
    %272 = vector.load %arg10[%c0_263, %c0_264] : memref<128x128xf32, #tpu.memory_space<vmem>>, vector<128x128xf32>
    %273 = vector.extract_strided_slice %271 {offsets = [0, 0], sizes = [64, 128], strides = [1, 1]} : vector<128x128xf32> to vector<64x128xf32>
    %cst_265 = arith.constant dense<0.000000e+00> : vector<128xf32>
    %274 = vector.multi_reduction <add>, %273, %cst_265 [0] : vector<64x128xf32> to vector<128xf32>
    %275 = vector.shape_cast %274 : vector<128xf32> to vector<1x128xf32>
    %276 = arith.mulf %273, %273 : vector<64x128xf32>
    %cst_266 = arith.constant dense<0.000000e+00> : vector<128xf32>
    %277 = vector.multi_reduction <add>, %276, %cst_266 [0] : vector<64x128xf32> to vector<128xf32>
    %278 = vector.shape_cast %277 : vector<128xf32> to vector<1x128xf32>
    %cst_267 = arith.constant dense<0.000000e+00> : vector<1x128xf32>
    %279 = tpu.matmul %275, %272, %cst_267 {dimension_numbers = #tpu.dot_dimension_numbers<[1], [0], [0], [1], [0, 0, 1, 1], [], []>} : vector<1x128xf32>, vector<128x128xf32>, vector<1x128xf32> -> vector<1x128xf32>
    %cst_268 = arith.constant dense<0.000000e+00> : vector<1x128xf32>
    %280 = tpu.matmul %278, %272, %cst_268 {dimension_numbers = #tpu.dot_dimension_numbers<[1], [0], [0], [1], [0, 0, 1, 1], [], []>} : vector<1x128xf32>, vector<128x128xf32>, vector<1x128xf32> -> vector<1x128xf32>
    %281 = arith.mulf %279, %279 : vector<1x128xf32>
    %282 = arith.subf %280, %281 : vector<1x128xf32>
    %cst_269 = arith.constant 0.000000e+00 : f32
    %283 = vector.broadcast %cst_269 : f32 to vector<1x128xf32>
    %284 = arith.maximumf %282, %283 : vector<1x128xf32>
    %cst_270 = arith.constant 9.99999974E-6 : f32
    %285 = vector.broadcast %cst_270 : f32 to vector<1x128xf32>
    %286 = arith.addf %284, %285 : vector<1x128xf32>
    %287 = math.rsqrt %286 : vector<1x128xf32>
    %288 = vector.broadcast %279 : vector<1x128xf32> to vector<64x128xf32>
    %289 = arith.subf %273, %288 : vector<64x128xf32>
    %c0_271 = arith.constant 0 : index
    %c0_272 = arith.constant 0 : index
    %290 = vector.load %arg8[%c0_271, %c0_272] : memref<1x128xf32, #tpu.memory_space<vmem>>, vector<1x128xf32>
    %291 = arith.mulf %287, %290 : vector<1x128xf32>
    %292 = vector.broadcast %291 : vector<1x128xf32> to vector<64x128xf32>
    %293 = arith.mulf %289, %292 : vector<64x128xf32>
    %c0_273 = arith.constant 0 : index
    %c0_274 = arith.constant 0 : index
    %294 = vector.load %arg9[%c0_273, %c0_274] : memref<1x128xf32, #tpu.memory_space<vmem>>, vector<1x128xf32>
    %295 = vector.broadcast %294 : vector<1x128xf32> to vector<64x128xf32>
    %296 = arith.addf %293, %295 : vector<64x128xf32>
    %cst_275 = arith.constant 0.000000e+00 : f32
    %297 = vector.broadcast %cst_275 : f32 to vector<64x128xf32>
    %298 = arith.cmpf oge, %296, %297 : vector<64x128xf32>
    %cst_276 = arith.constant 2.000000e-01 : f32
    %299 = vector.broadcast %cst_276 : f32 to vector<64x128xf32>
    %300 = arith.mulf %299, %296 : vector<64x128xf32>
    %301 = arith.select %298, %296, %300 : vector<64x128xi1>, vector<64x128xf32>
    %302 = vector.extract_strided_slice %271 {offsets = [64, 0], sizes = [64, 128], strides = [1, 1]} : vector<128x128xf32> to vector<64x128xf32>
    %cst_277 = arith.constant dense<0.000000e+00> : vector<128xf32>
    %303 = vector.multi_reduction <add>, %302, %cst_277 [0] : vector<64x128xf32> to vector<128xf32>
    %304 = vector.shape_cast %303 : vector<128xf32> to vector<1x128xf32>
    %305 = arith.mulf %302, %302 : vector<64x128xf32>
    %cst_278 = arith.constant dense<0.000000e+00> : vector<128xf32>
    %306 = vector.multi_reduction <add>, %305, %cst_278 [0] : vector<64x128xf32> to vector<128xf32>
    %307 = vector.shape_cast %306 : vector<128xf32> to vector<1x128xf32>
    %cst_279 = arith.constant dense<0.000000e+00> : vector<1x128xf32>
    %308 = tpu.matmul %304, %272, %cst_279 {dimension_numbers = #tpu.dot_dimension_numbers<[1], [0], [0], [1], [0, 0, 1, 1], [], []>} : vector<1x128xf32>, vector<128x128xf32>, vector<1x128xf32> -> vector<1x128xf32>
    %cst_280 = arith.constant dense<0.000000e+00> : vector<1x128xf32>
    %309 = tpu.matmul %307, %272, %cst_280 {dimension_numbers = #tpu.dot_dimension_numbers<[1], [0], [0], [1], [0, 0, 1, 1], [], []>} : vector<1x128xf32>, vector<128x128xf32>, vector<1x128xf32> -> vector<1x128xf32>
    %310 = arith.mulf %308, %308 : vector<1x128xf32>
    %311 = arith.subf %309, %310 : vector<1x128xf32>
    %cst_281 = arith.constant 0.000000e+00 : f32
    %312 = vector.broadcast %cst_281 : f32 to vector<1x128xf32>
    %313 = arith.maximumf %311, %312 : vector<1x128xf32>
    %cst_282 = arith.constant 9.99999974E-6 : f32
    %314 = vector.broadcast %cst_282 : f32 to vector<1x128xf32>
    %315 = arith.addf %313, %314 : vector<1x128xf32>
    %316 = math.rsqrt %315 : vector<1x128xf32>
    %317 = vector.broadcast %308 : vector<1x128xf32> to vector<64x128xf32>
    %318 = arith.subf %302, %317 : vector<64x128xf32>
    %c0_283 = arith.constant 0 : index
    %c0_284 = arith.constant 0 : index
    %319 = vector.load %arg8[%c0_283, %c0_284] : memref<1x128xf32, #tpu.memory_space<vmem>>, vector<1x128xf32>
    %320 = arith.mulf %316, %319 : vector<1x128xf32>
    %321 = vector.broadcast %320 : vector<1x128xf32> to vector<64x128xf32>
    %322 = arith.mulf %318, %321 : vector<64x128xf32>
    %c0_285 = arith.constant 0 : index
    %c0_286 = arith.constant 0 : index
    %323 = vector.load %arg9[%c0_285, %c0_286] : memref<1x128xf32, #tpu.memory_space<vmem>>, vector<1x128xf32>
    %324 = vector.broadcast %323 : vector<1x128xf32> to vector<64x128xf32>
    %325 = arith.addf %322, %324 : vector<64x128xf32>
    %cst_287 = arith.constant 0.000000e+00 : f32
    %326 = vector.broadcast %cst_287 : f32 to vector<64x128xf32>
    %327 = arith.cmpf oge, %325, %326 : vector<64x128xf32>
    %cst_288 = arith.constant 2.000000e-01 : f32
    %328 = vector.broadcast %cst_288 : f32 to vector<64x128xf32>
    %329 = arith.mulf %328, %325 : vector<64x128xf32>
    %330 = arith.select %327, %325, %329 : vector<64x128xi1>, vector<64x128xf32>
    %c0_289 = arith.constant 0 : index
    %c0_290 = arith.constant 0 : index
    %331 = vector.load %arg11[%c0_289, %c0_290] : memref<128x128xf32, #tpu.memory_space<vmem>>, vector<64x128xf32>
    tpu.vector_store %arg11[%c0_289, %c0_290], %301 {strides = array<i32>} : memref<128x128xf32, #tpu.memory_space<vmem>>, vector<64x128xf32>,
    %c64_291 = arith.constant 64 : index
    %c0_292 = arith.constant 0 : index
    %332 = vector.load %arg11[%c64_291, %c0_292] : memref<128x128xf32, #tpu.memory_space<vmem>>, vector<64x128xf32>
    tpu.vector_store %arg11[%c64_291, %c0_292], %330 {strides = array<i32>} : memref<128x128xf32, #tpu.memory_space<vmem>>, vector<64x128xf32>,
    return
  }
  func.func @transform_0(%arg0: i32) -> (i32, i32, i32, i32) {
    %c0_i32 = arith.constant 0 : i32
    %c0_i32_0 = arith.constant 0 : i32
    %c0_i32_1 = arith.constant 0 : i32
    %c0_i32_2 = arith.constant 0 : i32
    return %arg0, %c0_i32, %c0_i32_0, %c0_i32_1 : i32, i32, i32, i32
  }
  func.func @transform_1(%arg0: i32) -> (i32, i32) {
    %c0_i32 = arith.constant 0 : i32
    %c0_i32_0 = arith.constant 0 : i32
    %c0_i32_1 = arith.constant 0 : i32
    return %c0_i32, %c0_i32_0 : i32, i32
  }
  func.func @transform_2(%arg0: i32) -> (i32, i32) {
    %c0_i32 = arith.constant 0 : i32
    %c0_i32_0 = arith.constant 0 : i32
    %c0_i32_1 = arith.constant 0 : i32
    return %c0_i32, %c0_i32_0 : i32, i32
  }
  func.func @transform_3(%arg0: i32) -> (i32, i32) {
    %c0_i32 = arith.constant 0 : i32
    %c0_i32_0 = arith.constant 0 : i32
    %c0_i32_1 = arith.constant 0 : i32
    return %c0_i32, %c0_i32_0 : i32, i32
  }
  func.func @transform_4(%arg0: i32) -> (i32, i32) {
    %c0_i32 = arith.constant 0 : i32
    %c0_i32_0 = arith.constant 0 : i32
    %c0_i32_1 = arith.constant 0 : i32
    return %c0_i32, %c0_i32_0 : i32, i32
  }
  func.func @transform_5(%arg0: i32) -> (i32, i32) {
    %c0_i32 = arith.constant 0 : i32
    %c0_i32_0 = arith.constant 0 : i32
    %c0_i32_1 = arith.constant 0 : i32
    return %c0_i32, %c0_i32_0 : i32, i32
  }
  func.func @transform_6(%arg0: i32) -> (i32, i32) {
    %c0_i32 = arith.constant 0 : i32
    %c0_i32_0 = arith.constant 0 : i32
    %c0_i32_1 = arith.constant 0 : i32
    return %c0_i32, %c0_i32_0 : i32, i32
  }
  func.func @transform_7(%arg0: i32) -> (i32, i32) {
    %c0_i32 = arith.constant 0 : i32
    %c0_i32_0 = arith.constant 0 : i32
    %c0_i32_1 = arith.constant 0 : i32
    return %c0_i32, %c0_i32_0 : i32, i32
  }
  func.func @transform_8(%arg0: i32) -> (i32, i32) {
    %c0_i32 = arith.constant 0 : i32
    %c0_i32_0 = arith.constant 0 : i32
    %c0_i32_1 = arith.constant 0 : i32
    return %c0_i32, %c0_i32_0 : i32, i32
  }
  func.func @transform_9(%arg0: i32) -> (i32, i32) {
    %c0_i32 = arith.constant 0 : i32
    %c0_i32_0 = arith.constant 0 : i32
    %c0_i32_1 = arith.constant 0 : i32
    return %c0_i32, %c0_i32_0 : i32, i32
  }
  func.func @transform_10(%arg0: i32) -> (i32, i32) {
    %c0_i32 = arith.constant 0 : i32
    %c0_i32_0 = arith.constant 0 : i32
    return %arg0, %c0_i32 : i32, i32
  }
}

</mosaic_0001>

<bundles_post_ra>
// kernel: double_conv_forward.1
= control target key start
LH: loop header
LB: loop body
LE: loop exit
PB: predicated region body
PF: predicated region fallthrough
CT: control target
= control target key end

     0   :  { %vm40_vm0 = vcmask 261120   ;;  %vm42_vm1 = vcmask 254976   ;;  %v6973_v0 = vmov 0.0   ;;  %vm198_vm2 = vcmask 257024   ;;  %s6974_s21 = smov 32   ;;  %s6975_s22 = smov 64   ;;  %s8948_s0 = inlined_call_operand.vmem [shape: f32[2,8,8,32], index: 0, kind: input, shape index: {}]   ;;  %s8949_s1 = inlined_call_operand.vmem [shape: bf16[288,128], index: 1, kind: input, shape index: {}]   ;;  %s8950_s9 = inlined_call_operand.vmem [shape: f32[128,128], index: 9, kind: input, shape index: {}]   ;;  %s8951_s3 = inlined_call_operand.vmem [shape: f32[1,128], index: 3, kind: input, shape index: {}]   ;;  %s8952_s2 = inlined_call_operand.vmem [shape: bf16[1152,128], index: 2, kind: input, shape index: {}]   ;;  %s8953_s4 = inlined_call_operand.vmem [shape: f32[1,128], index: 4, kind: input, shape index: {}]   ;;  %s8954_s5 = inlined_call_operand.vmem [shape: f32[1,128], index: 5, kind: input, shape index: {}]   ;;  %s8955_s6 = inlined_call_operand.vmem [shape: f32[1,128], index: 6, kind: input, shape index: {}]   ;;  %s8956_s7 = inlined_call_operand.vmem [shape: f32[1,128], index: 7, kind: input, shape index: {}]   ;;  %s8957_s8 = inlined_call_operand.vmem [shape: f32[1,128], index: 8, kind: input, shape index: {}]   ;;  %s8958_s10 = inlined_call_operand.vmem [shape: f32[128,128], index: 10, kind: output, shape index: {}]  }
   0x1   :  { %41 = vst.msk [vmem:[#allocation2] sm:$0xff] %vm40_vm0, %v6973_v0  ;;  %44 = vst.msk [vmem:[#allocation2 + $0x10] sm:$0xff] %vm40_vm0, %v6973_v0  ;;  %v122_v1 = vld [vmem:[%s8948_s0] sm:$0xff]  ;;  %v123_v2 = vld [vmem:[%s8948_s0 + $0x8] sm:$0xff]  ;;  %s6976_s13 = smov 96   ;;  %vm263_vm3 = vcmask 519424  }
   0x2   :  { %43 = vst.msk [vmem:[#allocation2 + $0x8] sm:$0x3] %vm42_vm1, %v6973_v0  ;;  %45 = vst.msk [vmem:[#allocation2 + $0x18] sm:$0x3] %vm42_vm1, %v6973_v0  ;;  %v124_v3 = vld [vmem:[%s8948_s0 + $0x10] sm:$0xff]  ;;  %v125_v4 = vld [vmem:[%s8948_s0 + $0x18] sm:$0xff] }
   0x3   :  { %46 = vst.msk [vmem:[#allocation2 + $0x20] sm:$0xff] %vm40_vm0, %v6973_v0  ;;  %48 = vst.msk [vmem:[#allocation2 + $0x30] sm:$0xff] %vm40_vm0, %v6973_v0  ;;  %v126_v5 = vld [vmem:[%s8948_s0 + $0x20] sm:$0xff]  ;;  %v127_v6 = vld [vmem:[%s8948_s0 + $0x28] sm:$0xff]  ;;  %vm328_vm4 = vcmask 781824   ;;  %vm393_vm5 = vcmask 1044224  }
   0x4   :  { %47 = vst.msk [vmem:[#allocation2 + $0x28] sm:$0x3] %vm42_vm1, %v6973_v0  ;;  %49 = vst.msk [vmem:[#allocation2 + $0x38] sm:$0x3] %vm42_vm1, %v6973_v0  ;;  %v128_v7 = vld [vmem:[%s8948_s0 + $0x30] sm:$0xff]  ;;  %v129_v8 = vld [vmem:[%s8948_s0 + $0x38] sm:$0xff] }
   0x5   :  { %50 = vst.msk [vmem:[#allocation2 + $0x40] sm:$0xff] %vm40_vm0, %v6973_v0  ;;  %52 = vst.msk [vmem:[#allocation2 + $0x50] sm:$0xff] %vm40_vm0, %v6973_v0  ;;  %v5155_v9 = vld [vmem:[%s8948_s0 + $0x40] sm:$0xff]  ;;  %v5156_v10 = vld [vmem:[%s8948_s0 + $0x48] sm:$0xff]  ;;  %vm6977_vm6 = vmmov 0  }
   0x6   :  { %51 = vst.msk [vmem:[#allocation2 + $0x48] sm:$0x3] %vm42_vm1, %v6973_v0  ;;  %53 = vst.msk [vmem:[#allocation2 + $0x58] sm:$0x3] %vm42_vm1, %v6973_v0  ;;  %v5157_v11 = vld [vmem:[%s8948_s0 + $0x50] sm:$0xff]  ;;  %v6756_v12 = vld [vmem:[%s8949_s1 + $0x78] sm:$0xff]  }
   0x7   :  { %54 = vst.msk [vmem:[#allocation2 + $0x60] sm:$0xff] %vm40_vm0, %v6973_v0  ;;  %56 = vst.msk [vmem:[#allocation2 + $0x70] sm:$0xff] %vm40_vm0, %v6973_v0  ;;  %v6757_v13 = vld [vmem:[%s8949_s1 + $0x38] sm:$0xff]   ;;  %5937 = vmatprep.subr.bf16.mxu0 %v6756_v12  ;;  %v6758_v14 = vld [vmem:[%s8949_s1 + $0x70] sm:$0xff]  }
   0x8   :  { %55 = vst.msk [vmem:[#allocation2 + $0x68] sm:$0x3] %vm42_vm1, %v6973_v0  ;;  %57 = vst.msk [vmem:[#allocation2 + $0x78] sm:$0x3] %vm42_vm1, %v6973_v0  ;;  %5938 = vmatpush3.bf16.msra.mxu0 %v6757_v13  ;;  %v158_v12 = vld [vmem:[#allocation2] sm:$0xff] }
   0x9   :  { %58 = vst.msk [vmem:[#allocation2 + $0x80] sm:$0xff] %vm40_vm0, %v6973_v0  ;;  %60 = vst.msk [vmem:[#allocation2 + $0x90] sm:$0xff] %vm40_vm0, %v6973_v0  ;;  %v207_v15 = vld [vmem:[#allocation2 + $0x1] sm:$0xff]  ;;  %5939 = vmatprep.subr.bf16.mxu0 %v6758_v14 }
   0xa   :  { %59 = vst.msk [vmem:[#allocation2 + $0x88] sm:$0x3] %vm42_vm1, %v6973_v0  ;;  %61 = vst.msk [vmem:[#allocation2 + $0x98] sm:$0x3] %vm42_vm1, %v6973_v0  ;;  %v272_v16 = vld [vmem:[#allocation2 + $0x2] sm:$0xff]  ;;  %v5657_v17 = vpack.c.bf16 %v207_v15, %v207_v15  ;;  %v5649_v15 = vpack.c.bf16 %v158_v12, %v158_v12  ;;  %v5162_v12 = vld [vmem:[%s8948_s0 + $0x78] sm:$0xff] }
   0xb   :  { %62 = vst.msk [vmem:[#allocation2 + $0xa0] sm:$0xff] %vm40_vm0, %v6973_v0  ;;  %64 = vst.msk [vmem:[#allocation2 + $0xb0] sm:$0xff] %vm40_vm0, %v6973_v0  ;;  %v5665_v27 = vpack.c.bf16 %v272_v16, %v272_v16 }
   0xc   :  { %63 = vst.msk [vmem:[#allocation2 + $0xa8] sm:$0x3] %vm42_vm1, %v6973_v0  ;;  %65 = vst.msk [vmem:[#allocation2 + $0xb8] sm:$0x3] %vm42_vm1, %v6973_v0  ;;  %239 = vrot.lane.b32.xlu0 %v5657_v17, %s6974_s21 }
   0xd   :  { %66 = vst.msk [vmem:[#allocation2 + $0xc0] sm:$0xff] %vm40_vm0, %v6973_v0  ;;  %68 = vst.msk [vmem:[#allocation2 + $0xd0] sm:$0xff] %vm40_vm0, %v6973_v0 }
   0xe   :  { %67 = vst.msk [vmem:[#allocation2 + $0xc8] sm:$0x3] %vm42_vm1, %v6973_v0  ;;  %69 = vst.msk [vmem:[#allocation2 + $0xd8] sm:$0x3] %vm42_vm1, %v6973_v0 }
   0xf   :  { %70 = vst.msk [vmem:[#allocation2 + $0xe0] sm:$0xff] %vm40_vm0, %v6973_v0  ;;  %72 = vst.msk [vmem:[#allocation2 + $0xf0] sm:$0xff] %vm40_vm0, %v6973_v0 }
  0x10   :  { %71 = vst.msk [vmem:[#allocation2 + $0xe8] sm:$0x3] %vm42_vm1, %v6973_v0  ;;  %73 = vst.msk [vmem:[#allocation2 + $0xf8] sm:$0x3] %vm42_vm1, %v6973_v0  ;;  %304 = vrot.lane.b32.xlu0 %v5665_v27, %s6975_s22  ;;  %v6764_v27 = vld [vmem:[%s8949_s1 + $0x58] sm:$0xff]  }
  0x11   :  { %74 = vst.msk [vmem:[#allocation2 + $0x100] sm:$0xff] %vm40_vm0, %v6973_v0  ;;  %76 = vst.msk [vmem:[#allocation2 + $0x110] sm:$0xff] %vm40_vm0, %v6973_v0 }
  0x12   :  { %75 = vst.msk [vmem:[#allocation2 + $0x108] sm:$0x3] %vm42_vm1, %v6973_v0  ;;  %77 = vst.msk [vmem:[#allocation2 + $0x118] sm:$0x3] %vm42_vm1, %v6973_v0 }
  0x13   :  { %78 = vst.msk [vmem:[#allocation2 + $0x120] sm:$0xff] %vm40_vm0, %v6973_v0  ;;  %80 = vst.msk [vmem:[#allocation2 + $0x130] sm:$0xff] %vm40_vm0, %v6973_v0 }
  0x14   :  { %79 = vst.msk [vmem:[#allocation2 + $0x128] sm:$0x3] %vm42_vm1, %v6973_v0  ;;  %81 = vst.msk [vmem:[#allocation2 + $0x138] sm:$0x3] %vm42_vm1, %v6973_v0 }
  0x15   :  { %82 = vst [vmem:[#allocation3] sm:$0xff] %v6973_v0  ;;  %83 = vst [vmem:[#allocation3 + $0x8] sm:$0x3] %v6973_v0 }
  0x16   :  { %84 = vst [vmem:[#allocation3 + $0x10] sm:$0xff] %v6973_v0  ;;  %85 = vst [vmem:[#allocation3 + $0x18] sm:$0x3] %v6973_v0 }
  0x17   :  { %86 = vst [vmem:[#allocation3 + $0x20] sm:$0xff] %v6973_v0  ;;  %87 = vst [vmem:[#allocation3 + $0x28] sm:$0x3] %v6973_v0 }
  0x18   :  { %88 = vst [vmem:[#allocation3 + $0x30] sm:$0xff] %v6973_v0  ;;  %89 = vst [vmem:[#allocation3 + $0x38] sm:$0x3] %v6973_v0 }
  0x19   :  { %90 = vst [vmem:[#allocation3 + $0x40] sm:$0xff] %v6973_v0  ;;  %91 = vst [vmem:[#allocation3 + $0x48] sm:$0x3] %v6973_v0 }
  0x1a   :  { %92 = vst [vmem:[#allocation3 + $0x50] sm:$0xff] %v6973_v0  ;;  %93 = vst [vmem:[#allocation3 + $0x58] sm:$0x3] %v6973_v0 }
  0x1b   :  { %94 = vst [vmem:[#allocation3 + $0x60] sm:$0xff] %v6973_v0  ;;  %95 = vst [vmem:[#allocation3 + $0x68] sm:$0x3] %v6973_v0 }
  0x1c   :  { %96 = vst [vmem:[#allocation3 + $0x70] sm:$0xff] %v6973_v0  ;;  %97 = vst [vmem:[#allocation3 + $0x78] sm:$0x3] %v6973_v0 }
  0x1d   :  { %98 = vst [vmem:[#allocation3 + $0x80] sm:$0xff] %v6973_v0  ;;  %99 = vst [vmem:[#allocation3 + $0x88] sm:$0x3] %v6973_v0 }
  0x1e   :  { %100 = vst [vmem:[#allocation3 + $0x90] sm:$0xff] %v6973_v0  ;;  %101 = vst [vmem:[#allocation3 + $0x98] sm:$0x3] %v6973_v0 }
  0x1f   :  { %102 = vst [vmem:[#allocation3 + $0xa0] sm:$0xff] %v6973_v0  ;;  %103 = vst [vmem:[#allocation3 + $0xa8] sm:$0x3] %v6973_v0 }
  0x20   :  { %104 = vst [vmem:[#allocation3 + $0xb0] sm:$0xff] %v6973_v0  ;;  %105 = vst [vmem:[#allocation3 + $0xb8] sm:$0x3] %v6973_v0 }
  0x21   :  { %106 = vst [vmem:[#allocation3 + $0xc0] sm:$0xff] %v6973_v0  ;;  %107 = vst [vmem:[#allocation3 + $0xc8] sm:$0x3] %v6973_v0 }
  0x22   :  { %108 = vst [vmem:[#allocation3 + $0xd0] sm:$0xff] %v6973_v0  ;;  %109 = vst [vmem:[#allocation3 + $0xd8] sm:$0x3] %v6973_v0 }
  0x23   :  { %110 = vst [vmem:[#allocation3 + $0xe0] sm:$0xff] %v6973_v0  ;;  %111 = vst [vmem:[#allocation3 + $0xe8] sm:$0x3] %v6973_v0 }
  0x24   :  { %112 = vst [vmem:[#allocation3 + $0xf0] sm:$0xff] %v6973_v0  ;;  %113 = vst [vmem:[#allocation3 + $0xf8] sm:$0x3] %v6973_v0 }
  0x25   :  { %114 = vst [vmem:[#allocation3 + $0x100] sm:$0xff] %v6973_v0  ;;  %115 = vst [vmem:[#allocation3 + $0x108] sm:$0x3] %v6973_v0 }
  0x26   :  { %116 = vst [vmem:[#allocation3 + $0x110] sm:$0xff] %v6973_v0  ;;  %117 = vst [vmem:[#allocation3 + $0x118] sm:$0x3] %v6973_v0 }
  0x27   :  { %118 = vst [vmem:[#allocation3 + $0x120] sm:$0xff] %v6973_v0  ;;  %119 = vst [vmem:[#allocation3 + $0x128] sm:$0x3] %v6973_v0 }
  0x28   :  { %120 = vst [vmem:[#allocation3 + $0x130] sm:$0xff] %v6973_v0  ;;  %121 = vst [vmem:[#allocation3 + $0x138] sm:$0x3] %v6973_v0 }
  0x29   :  { %132 = vst.msk [vmem:[#allocation2 + $0x11] sm:$0xff] %vm40_vm0, %v122_v1  ;;  %133 = vst.msk [vmem:[#allocation2 + $0x21] sm:$0xff] %vm40_vm0, %v123_v2 }
  0x2a   :  { %134 = vst.msk [vmem:[#allocation2 + $0x31] sm:$0xff] %vm40_vm0, %v124_v3  ;;  %135 = vst.msk [vmem:[#allocation2 + $0x41] sm:$0xff] %vm40_vm0, %v125_v4 }
  0x2b   :  { %136 = vst.msk [vmem:[#allocation2 + $0x51] sm:$0xff] %vm40_vm0, %v126_v5  ;;  %137 = vst.msk [vmem:[#allocation2 + $0x61] sm:$0xff] %vm40_vm0, %v127_v6 }
  0x2c   :  { %138 = vst.msk [vmem:[#allocation2 + $0x71] sm:$0xff] %vm40_vm0, %v128_v7  ;;  %139 = vst.msk [vmem:[#allocation2 + $0x81] sm:$0xff] %vm40_vm0, %v129_v8 }
  0x2d   :  { %150 = vst.msk [vmem:[#allocation2 + $0xb1] sm:$0xff] %vm40_vm0, %v5155_v9  ;;  %151 = vst.msk [vmem:[#allocation2 + $0xc1] sm:$0xff] %vm40_vm0, %v5156_v10 }
  0x2e   :  { %152 = vst.msk [vmem:[#allocation2 + $0xd1] sm:$0xff] %vm40_vm0, %v5157_v11  ;;  %157 = vst.msk [vmem:[#allocation2 + $0x121] sm:$0xff] %vm40_vm0, %v5162_v12 }
  0x2f   :  { %199 = vst.msk [vmem:[#allocation4] sm:$0xf] %vm198_vm2, %v5649_v15 }
  0x30   :  { %v450_v18 = vld [vmem:[#allocation2 + $0x12] sm:$0xff]  ;;  %v451_v19 = vld [vmem:[#allocation2 + $0x22] sm:$0xff] }
  0x31   :  { %v208_v20 = vld [vmem:[#allocation2 + $0x11] sm:$0xff]  ;;  %v7206_v21 = vpack.c.bf16 %v450_v18, %v450_v18  ;;  %v7208_v22 = vpack.c.bf16 %v451_v19, %v451_v19  ;;  %v515_v24 = vld [vmem:[#allocation2 + $0x20] sm:$0xff]  ;;  %v6760_v19 = vld [vmem:[%s8949_s1 + $0x68] sm:$0xff]  }
  0x32   :  { %v7210_v23 = vpack.c.bf16 %v208_v20, %v208_v20  ;;  %v516_v25 = vld [vmem:[#allocation2 + $0x30] sm:$0xff]  ;;  %v7213_v28 = vpack.c.bf16 %v515_v24, %v515_v24  ;;  %v579_v31 = vld [vmem:[#allocation2 + $0x21] sm:$0xff]  ;;  %v5158_v24 = vld [vmem:[%s8948_s0 + $0x58] sm:$0xff] }
  0x33   :  { %v337_v26 = vld [vmem:[#allocation2 + $0x10] sm:$0xff]  ;;  %v7215_v29 = vpack.c.bf16 %v516_v25, %v516_v25  ;;  %482 = vrot.lane.b32.xlu1 %v7206_v21, %s6974_s21  ;;  %v7221_v34 = vpack.c.bf16 %v579_v31, %v579_v31  ;;  %v453_v37 = vld [vmem:[#allocation2 + $0x42] sm:$0xff]  ;;  %683 = vst.msk [vmem:[#allocation4 + $0x8] sm:$0xf] %vm198_vm2, %v7208_v22 }
  0x34   :  { %v7217_v30 = vpack.c.bf16 %v337_v26, %v337_v26  ;;  %v580_v32 = vld [vmem:[#allocation2 + $0x31] sm:$0xff]  ;;  %v517_v38 = vld [vmem:[#allocation2 + $0x40] sm:$0xff]  ;;  %442 = vst.msk [vmem:[#allocation4 + $0x4] sm:$0xf] %vm198_vm2, %v7210_v23  ;;  %v7231_v40 = vpack.c.bf16 %v453_v37, %v453_v37  ;;  %201 = vst.msk [vmem:[#allocation4 + $0x18] sm:$0xf] %vm198_vm2, %v7213_v28  ;;  %241 = vrot.lane.b32.xlu0 %v7210_v23, %s6974_s21 }
  0x35   :  { %v452_v33 = vld [vmem:[#allocation2 + $0x32] sm:$0xff]  ;;  %v7223_v35 = vpack.c.bf16 %v580_v32, %v580_v32  ;;  %v7233_v41 = vpack.c.bf16 %v517_v38, %v517_v38  ;;  %v581_v43 = vld [vmem:[#allocation2 + $0x41] sm:$0xff]  ;;  %202 = vst.msk [vmem:[#allocation4 + $0x24] sm:$0xf] %vm198_vm2, %v7215_v29  ;;  %443 = vst.msk [vmem:[#allocation4 + $0x10] sm:$0xf] %vm198_vm2, %v7221_v34 }
  0x36   :  { %v7225_v36 = vpack.c.bf16 %v452_v33, %v452_v33  ;;  %v518_v39 = vld [vmem:[#allocation2 + $0x50] sm:$0xff]  ;;  %200 = vst.msk [vmem:[#allocation4 + $0xc] sm:$0xf] %vm198_vm2, %v7217_v30  ;;  %v7243_v46 = vpack.c.bf16 %v581_v43, %v581_v43  ;;  %v455_v49 = vld [vmem:[#allocation2 + $0x62] sm:$0xff]  ;;  %685 = vst.msk [vmem:[#allocation4 + $0x20] sm:$0xf] %vm198_vm2, %v7231_v40 }
  0x37   :  { %v7235_v42 = vpack.c.bf16 %v518_v39, %v518_v39  ;;  %v582_v44 = vld [vmem:[#allocation2 + $0x51] sm:$0xff]  ;;  %v519_v50 = vld [vmem:[#allocation2 + $0x60] sm:$0xff]  ;;  %444 = vst.msk [vmem:[#allocation4 + $0x1c] sm:$0xf] %vm198_vm2, %v7223_v35  ;;  %v7256_v52 = vpack.c.bf16 %v455_v49, %v455_v49  ;;  %203 = vst.msk [vmem:[#allocation4 + $0x30] sm:$0xf] %vm198_vm2, %v7233_v41  ;;  %484 = vrot.lane.b32.xlu1 %v7208_v22, %s6974_s21 }
  0x38   :  { %v454_v45 = vld [vmem:[#allocation2 + $0x52] sm:$0xff]  ;;  %v7245_v47 = vpack.c.bf16 %v582_v44, %v582_v44  ;;  %684 = vst.msk [vmem:[#allocation4 + $0x14] sm:$0xf] %vm198_vm2, %v7225_v36  ;;  %v7258_v53 = vpack.c.bf16 %v519_v50, %v519_v50  ;;  %v583_v55 = vld [vmem:[#allocation2 + $0x61] sm:$0xff]  ;;  %445 = vst.msk [vmem:[#allocation4 + $0x28] sm:$0xf] %vm198_vm2, %v7243_v46  ;;  %547 = vrot.lane.b32.xlu0 %v7213_v28, %s6975_s22 }
  0x39   :  { %v7247_v48 = vpack.c.bf16 %v454_v45, %v454_v45  ;;  %v520_v51 = vld [vmem:[#allocation2 + $0x70] sm:$0xff]  ;;  %204 = vst.msk [vmem:[#allocation4 + $0x3c] sm:$0xf] %vm198_vm2, %v7235_v42  ;;  %v7270_v58 = vpack.c.bf16 %v583_v55, %v583_v55  ;;  %v457_v61 = vld [vmem:[#allocation2 + $0x82] sm:$0xff]  ;;  %687 = vst.msk [vmem:[#allocation4 + $0x38] sm:$0xf] %vm198_vm2, %v7256_v52 }
  0x3a   :  { %v7260_v54 = vpack.c.bf16 %v520_v51, %v520_v51  ;;  %v584_v56 = vld [vmem:[#allocation2 + $0x71] sm:$0xff]  ;;  %v585_v62 = vld [vmem:[#allocation2 + $0x81] sm:$0xff]  ;;  %446 = vst.msk [vmem:[#allocation4 + $0x34] sm:$0xf] %vm198_vm2, %v7245_v47  ;;  %v7282_v63 = vpack.c.bf16 %v457_v61, %v457_v61  ;;  %205 = vst.msk [vmem:[#allocation4 + $0x48] sm:$0xf] %vm198_vm2, %v7258_v53 }
  0x3b   :  { %v456_v57 = vld [vmem:[#allocation2 + $0x72] sm:$0xff]  ;;  %v7272_v59 = vpack.c.bf16 %v584_v56, %v584_v56  ;;  %686 = vst.msk [vmem:[#allocation4 + $0x2c] sm:$0xf] %vm198_vm2, %v7247_v48  ;;  %v7284_v1 = vpack.c.bf16 %v585_v62, %v585_v62  ;;  %v981_v4 = vld [vmem:[#allocation2 + $0xc2] sm:$0xff]  ;;  %447 = vst.msk [vmem:[#allocation4 + $0x40] sm:$0xf] %vm198_vm2, %v7270_v58  ;;  %306 = vrot.lane.b32.xlu1 %v7206_v21, %s6975_s22 }
  0x3c   :  { %v7274_v60 = vpack.c.bf16 %v456_v57, %v456_v57  ;;  %v741_v2 = vld [vmem:[#allocation2 + $0xb1] sm:$0xff]  ;;  %206 = vst.msk [vmem:[#allocation4 + $0x54] sm:$0xf] %vm198_vm2, %v7260_v54  ;;  %v7302_v5 = vpack.c.bf16 %v981_v4, %v981_v4  ;;  %v1045_v6 = vld [vmem:[#allocation2 + $0xc0] sm:$0xff]  ;;  %689 = vst.msk [vmem:[#allocation4 + $0x50] sm:$0xf] %vm198_vm2, %v7282_v63  ;;  %369 = vrot.lane.b32.xlu0 %v7217_v30, %s6976_s13 }
  0x3d   :  { %v7292_v3 = vpack.c.bf16 %v741_v2, %v741_v2  ;;  %448 = vst.msk [vmem:[#allocation4 + $0x4c] sm:$0xf] %vm198_vm2, %v7272_v59  ;;  %v1046_v7 = vld [vmem:[#allocation2 + $0xd0] sm:$0xff]  ;;  %449 = vst.msk [vmem:[#allocation4 + $0x58] sm:$0xf] %vm198_vm2, %v7284_v1  ;;  %v7310_v9 = vpack.c.bf16 %v1045_v6, %v1045_v6  ;;  %v1109_v13 = vld [vmem:[#allocation2 + $0xc1] sm:$0xff] }
  0x3e   :  { %688 = vst.msk [vmem:[#allocation4 + $0x44] sm:$0xf] %vm198_vm2, %v7274_v60  ;;  %v868_v8 = vld [vmem:[#allocation2 + $0xb0] sm:$0xff]  ;;  %v7312_v10 = vpack.c.bf16 %v1046_v7, %v1046_v7  ;;  %v7318_v16 = vpack.c.bf16 %v1109_v13, %v1109_v13  ;;  %1213 = vst.msk [vmem:[#allocation4 + $0x68] sm:$0xf] %vm198_vm2, %v7302_v5  ;;  %v6761_v20 = vld [vmem:[%s8949_s1 + $0x28] sm:$0xff]  }
  0x3f   :  { %v7314_v11 = vpack.c.bf16 %v868_v8, %v868_v8  ;;  %v1110_v14 = vld [vmem:[#allocation2 + $0xd1] sm:$0xff]  ;;  %972 = vst.msk [vmem:[#allocation4 + $0x64] sm:$0xf] %vm198_vm2, %v7292_v3  ;;  %734 = vst.msk [vmem:[#allocation4 + $0x78] sm:$0xf] %vm198_vm2, %v7310_v9  ;;  %549 = vrot.lane.b32.xlu1 %v7215_v29, %s6975_s22  ;;  %v6762_v25 = vld [vmem:[%s8949_s1 + $0x60] sm:$0xff]  }
  0x40   :  { %v7320_v17 = vpack.c.bf16 %v1110_v14, %v1110_v14  ;;  %v6759_v18 = vld [vmem:[%s8949_s1 + $0x30] sm:$0xff]   ;;  %735 = vst.msk [vmem:[#allocation4 + $0x84] sm:$0xf] %vm198_vm2, %v7312_v10  ;;  %973 = vst.msk [vmem:[#allocation4 + $0x70] sm:$0xf] %vm198_vm2, %v7318_v16  ;;  %v6763_v26 = vld [vmem:[%s8949_s1 + $0x20] sm:$0xff]   ;;  %611 = vrot.lane.b32.xlu0 %v7221_v34, %s6976_s13 }
  0x41   :  { %733 = vst.msk [vmem:[#allocation4 + $0x6c] sm:$0xf] %vm198_vm2, %v7314_v11  ;;  %5940 = vmatpush3.bf16.msra.mxu0 %v6759_v18  ;;  %v982_v21 = vld [vmem:[#allocation2 + $0xd2] sm:$0xff]  ;;  %v5159_v31 = vld [vmem:[%s8948_s0 + $0x60] sm:$0xff]  ;;  %v6768_v44 = vld [vmem:[%s8949_s1 + $0x48] sm:$0xff]  }
  0x42   :  { %974 = vst.msk [vmem:[#allocation4 + $0x7c] sm:$0xf] %vm198_vm2, %v7320_v17  ;;  %5941 = vmatprep.subr.bf16.mxu0 %v6760_v19  ;;  %v7348_v23 = vpack.c.bf16 %v982_v21, %v982_v21  ;;  %v6765_v30 = vld [vmem:[%s8949_s1 + $0x18] sm:$0xff]   ;;  %v6767_v39 = vld [vmem:[%s8949_s1 + $0x10] sm:$0xff]   ;;  %v6771_v49 = vld [vmem:[%s8949_s1 + $0x88] sm:$0xff]  }
  0x43   :  { %153 = vst.msk [vmem:[#allocation2 + $0xe1] sm:$0xff] %vm40_vm0, %v5158_v24  ;;  %371 = vrot.lane.b32.xlu1 %v7213_v28, %s6976_s13  ;;  %154 = vst.msk [vmem:[#allocation2 + $0xf1] sm:$0xff] %vm40_vm0, %v5159_v31  ;;  %v6766_v28 = vld [vmem:[%s8949_s1 + $0x50] sm:$0xff]   ;;  %v6769_v55 = vld [vmem:[%s8949_s1 + $0x8] sm:$0xff]   ;;  %6419 = vmatprep.subr.bf16.mxu1 %v6771_v49 }
  0x44   :  { %1214 = vst.msk [vmem:[#allocation4 + $0x74] sm:$0xf] %vm198_vm2, %v7348_v23  ;;  %243 = vrot.lane.b32.xlu0 %v7221_v34, %s6974_s21  ;;  %v6770_v57 = vld [vmem:[%s8949_s1 + $0x40] sm:$0xff]   ;;  %6420 = vmatpush3.bf16.msra.mxu1 %v6771_v49  ;;  %v5160_v62 = vld [vmem:[%s8948_s0 + $0x68] sm:$0xff]  ;;  %v5161_v7 = vld [vmem:[%s8948_s0 + $0x70] sm:$0xff] }
  0x45   :  { %5942 = vmatpush3.bf16.msra.mxu0 %v6761_v20  ;;  %155 = vst.msk [vmem:[#allocation2 + $0x101] sm:$0xff] %vm40_vm0, %v5160_v62  ;;  %v6777_v4 = vld [vmem:[#allocation4 + $0x8] ss:$12 sps:$4 sm:$0xff]   ;;  %v6778_v6 = vld [vmem:[#allocation4 + $0x20] ss:$12 sps:$4 sm:$0xff]   ;;  %156 = vst.msk [vmem:[#allocation2 + $0x111] sm:$0xff] %vm40_vm0, %v5161_v7 }
  0x46   :  { %5943 = vmatprep.subr.bf16.mxu0 %v6762_v25  ;;  %6423 = vmatprep.mubr.msk.bf16.mxu1 %vm40_vm0, %v6777_v4  ;;  %v6772_v8 = vld [vmem:[%s8949_s1] sm:$0xff]   ;;  %v650_v31 = vld [vmem:[#allocation2 + $0x92] sm:$0xff] }
  0x47   :  { %613 = vrot.lane.b32.xlu1 %v7223_v35, %s6976_s13 }
  0x48   :  { %486 = vrot.lane.b32.xlu0 %v7225_v36, %s6974_s21 }
  0x49   :  { %5944 = vmatpush3.bf16.msra.mxu0 %v6763_v26  ;;  %v987_v26 = vld [vmem:[#allocation2 + $0x122] sm:$0xff] }
  0x4a   :  { %v983_v32 = vld [vmem:[#allocation2 + $0xe2] sm:$0xff]  ;;  %5945 = vmatprep.subr.bf16.mxu0 %v6764_v27  ;;  %v1048_v50 = vld [vmem:[#allocation2 + $0xf0] sm:$0xff]  ;;  %v7486_v27 = vpack.c.bf16 %v987_v26, %v987_v26 }
  0x4b   :  { %v1047_v33 = vld [vmem:[#allocation2 + $0xe0] sm:$0xff]  ;;  %v7383_v37 = vpack.c.bf16 %v983_v32, %v983_v32  ;;  %245 = vrot.lane.b32.xlu1 %v7223_v35, %s6974_s21  ;;  %v1112_v51 = vld [vmem:[#allocation2 + $0xf1] sm:$0xff]  ;;  %v7408_v34 = vpack.c.bf16 %v1048_v50, %v1048_v50 }
  0x4c   :  { %v7385_v38 = vpack.c.bf16 %v1047_v33, %v1047_v33  ;;  %v1111_v43 = vld [vmem:[#allocation2 + $0xe1] sm:$0xff]  ;;  %v7413_v56 = vpack.c.bf16 %v1112_v51, %v1112_v51  ;;  %v984_v61 = vld [vmem:[#allocation2 + $0xf2] sm:$0xff]  ;;  %308 = vrot.lane.b32.xlu0 %v7208_v22, %s6975_s22  ;;  %1219 = vst.msk [vmem:[#allocation4 + $0xb0] sm:$0xf] %vm198_vm2, %v7486_v27 }
  0x4d   :  { %v7393_v45 = vpack.c.bf16 %v1111_v43, %v1111_v43  ;;  %5946 = vmatpush3.bf16.msra.mxu0 %v6765_v30  ;;  %1215 = vst.msk [vmem:[#allocation4 + $0x80] sm:$0xf] %vm198_vm2, %v7383_v37  ;;  %v6776_v35 = vld [vmem:[%s8949_s1 + $0x80] sm:$0xff]   ;;  %v7426_v2 = vpack.c.bf16 %v984_v61, %v984_v61  ;;  %737 = vst.msk [vmem:[#allocation4 + $0x9c] sm:$0xf] %vm198_vm2, %v7408_v34  ;;  %v1050_v19 = vld [vmem:[#allocation2 + $0x110] sm:$0xff] }
  0x4e   :  { %736 = vst.msk [vmem:[#allocation4 + $0x90] sm:$0xf] %vm198_vm2, %v7385_v38  ;;  %5947 = vmatprep.subr.bf16.mxu0 %v6766_v28  ;;  %976 = vst.msk [vmem:[#allocation4 + $0x94] sm:$0xf] %vm198_vm2, %v7413_v56  ;;  %6421 = vmatprep.subr.bf16.mxu1 %v6776_v35  ;;  %v985_v13 = vld [vmem:[#allocation2 + $0x102] sm:$0xff]  ;;  %v1114_v20 = vld [vmem:[#allocation2 + $0x111] sm:$0xff]  ;;  %v7472_v21 = vpack.c.bf16 %v1050_v19, %v1050_v19 }
  0x4f   :  { %975 = vst.msk [vmem:[#allocation4 + $0x88] sm:$0xf] %vm198_vm2, %v7393_v45  ;;  %488 = vrot.lane.b32.xlu1 %v7231_v40, %s6974_s21  ;;  %1216 = vst.msk [vmem:[#allocation4 + $0x8c] sm:$0xf] %vm198_vm2, %v7426_v2  ;;  %6422 = vmatpush3.bf16.msra.mxu1 %v6776_v35  ;;  %v1049_v14 = vld [vmem:[#allocation2 + $0x100] sm:$0xff]  ;;  %v7457_v15 = vpack.c.bf16 %v985_v13, %v985_v13  ;;  %v7474_v24 = vpack.c.bf16 %v1114_v20, %v1114_v20  ;;  %v980_v32 = vld [vmem:[#allocation2 + $0xb2] sm:$0xff] }
  0x50   :  { %6439 = vmatprep.subr.mxu1 %v6973_v0  ;;  %v1113_v22 = vld [vmem:[#allocation2 + $0x101] sm:$0xff]  ;;  %551 = vrot.lane.b32.xlu0 %v7233_v41, %s6975_s22  ;;  %739 = vst.msk [vmem:[#allocation4 + $0xb4] sm:$0xf] %vm198_vm2, %v7472_v21  ;;  %v5761_v33 = vpack.c.bf16 %v980_v32, %v980_v32 }
  0x51   :  { %5948 = vmatpush3.bf16.msra.mxu0 %v6767_v39  ;;  %v7461_v18 = vpack.c.bf16 %v1113_v22, %v1113_v22  ;;  %1217 = vst.msk [vmem:[#allocation4 + $0x98] sm:$0xf] %vm198_vm2, %v7457_v15  ;;  %978 = vst.msk [vmem:[#allocation4 + $0xac] sm:$0xf] %vm198_vm2, %v7474_v24  ;;  %v692_v30 = vld [vmem:[#allocation2 + $0xa0] sm:$0xff] }
  0x52   :  { %5949 = vmatprep.subr.bf16.mxu0 %v6768_v44  ;;  %6424 = vmatmul.mubr.msk.bf16.vlgmr.msra.gmra.mxu1 %vm40_vm0, %v6778_v6  ;;  %v5721_v28 = vpack.c.bf16 %v692_v30, %v692_v30  ;;  %v804_v39 = vld [vmem:[#allocation2 + $0xa2] sm:$0xff] }
  0x53   :  { %310 = vrot.lane.b32.xlu1 %v7225_v36, %s6975_s22  ;;  %v7459_v36 = vpack.c.bf16 %v1049_v14, %v1049_v14  ;;  %977 = vst.msk [vmem:[#allocation4 + $0xa0] sm:$0xf] %vm198_vm2, %v7461_v18  ;;  %v6789_v43 = vld [vmem:[#allocation4 + $0x68] ss:$12 sps:$4 sm:$0xff]  }
  0x54   :  { %373 = vrot.lane.b32.xlu0 %v7215_v29, %s6976_s13  ;;  %v1115_v29 = vld [vmem:[#allocation2 + $0x121] sm:$0xff]  ;;  %732 = vst.msk [vmem:[#allocation4 + $0x60] sm:$0xf] %vm198_vm2, %v5721_v28  ;;  %v1116_v28 = vld [vmem:[#allocation2 + $0x131] sm:$0xff] }
  0x55   :  { %5950 = vmatpush3.bf16.msra.mxu0 %v6769_v55  ;;  %738 = vst.msk [vmem:[#allocation4 + $0xa8] sm:$0xf] %vm198_vm2, %v7459_v36 }
  0x56   :  { %5951 = vmatprep.subr.bf16.mxu0 %v6770_v57  ;;  %v6790_v44 = vld [vmem:[#allocation4 + $0x80] ss:$12 sps:$4 sm:$0xff]  }
  0x57   :  { %553 = vrot.lane.b32.xlu1 %v7235_v42, %s6975_s22 }
  0x58   :  { %615 = vrot.lane.b32.xlu0 %v7243_v46, %s6976_s13 }
  0x59   :  { %5952 = vmatpush3.bf16.msra.mxu0 %v6772_v8  ;;  %v1180_v8 = vld [vmem:[#allocation2 + $0x132] sm:$0xff] }
  0x5a   :  { %6509 = vmatprep.subr.mxu0 %v6973_v0  ;;  %v986_v0 = vld [vmem:[#allocation2 + $0x112] sm:$0xff]  ;;  %v5792_v13 = vpack.c.bf16 %v1180_v8, %v1180_v8 }
  0x5b   :  { %375 = vrot.lane.b32.xlu1 %v7233_v41, %s6976_s13  ;;  %v7484_v25 = vpack.c.bf16 %v986_v0, %v986_v0  ;;  %v7508_v41 = vpack.c.bf16 %v1115_v29, %v1115_v29 }
  0x5c   :  { %247 = vrot.lane.b32.xlu0 %v7243_v46, %s6974_s21  ;;  %v5720_v46 = vpack.c.bf16 %v650_v31, %v650_v31  ;;  %1220 = vst.msk [vmem:[#allocation4 + $0xbc] sm:$0xf] %vm198_vm2, %v5792_v13 }
  0x5d   :  { %1218 = vst.msk [vmem:[#allocation4 + $0xa4] sm:$0xf] %vm198_vm2, %v7484_v25  ;;  %979 = vst.msk [vmem:[#allocation4 + $0xb8] sm:$0xf] %vm198_vm2, %v7508_v41 }
  0x5e   :  { %690 = vst.msk [vmem:[#allocation4 + $0x5c] sm:$0xf] %vm198_vm2, %v5720_v46 }
  0x5f   :  { %617 = vrot.lane.b32.xlu1 %v7245_v47, %s6976_s13 }
  0x60   :  { %490 = vrot.lane.b32.xlu0 %v7247_v48, %s6974_s21 }
  0x63   :  { %249 = vrot.lane.b32.xlu1 %v7245_v47, %s6974_s21  ;;  %v6796_v20 = vld [vmem:[#allocation4 + $0xb0] ss:$12 sps:$4 sm:$0xff]  }
  0x64   :  { %312 = vrot.lane.b32.xlu0 %v7231_v40, %s6975_s22  ;;  %v6783_v40 = vld [vmem:[#allocation4 + $0x38] ss:$12 sps:$4 sm:$0xff]  }
  0x65   :  { %v6784_v47 = vld [vmem:[#allocation4 + $0x50] ss:$12 sps:$4 sm:$0xff]   ;;  %6427 = vmatprep.mubr.msk.bf16.mxu1 %vm40_vm0, %v6783_v40  ;;  %v6795_v19 = vld [vmem:[#allocation4 + $0x98] ss:$12 sps:$4 sm:$0xff]  }
  0x66   :  { %6428 = vmatmul.mubr.msk.bf16.gmra.mxu1 %vm40_vm0, %v6784_v47  ;;  %v1051_v47 = vld [vmem:[#allocation2 + $0x120] sm:$0xff] }
  0x67   :  { %492 = vrot.lane.b32.xlu1 %v7256_v52, %s6974_s21  ;;  %6431 = vmatprep.mubr.msk.bf16.mxu1 %vm40_vm0, %v6789_v43 }
  0x68   :  { %555 = vrot.lane.b32.xlu0 %v7258_v53, %s6975_s22 }
  0x6b   :  { %314 = vrot.lane.b32.xlu1 %v7247_v48, %s6975_s22  ;;  %v522_v48 = vld [vmem:[#allocation2 + $0x90] sm:$0xff] }
  0x6c   :  { %377 = vrot.lane.b32.xlu0 %v7235_v42, %s6976_s13  ;;  %v521_v42 = vld [vmem:[#allocation2 + $0x80] sm:$0xff] }
  0x6e   :  { %6432 = vmatmul.mubr.msk.bf16.gmra.mxu1 %vm40_vm0, %v6790_v44 }
  0x6f   :  { %557 = vrot.lane.b32.xlu1 %v7260_v54, %s6975_s22  ;;  %6435 = vmatprep.mubr.msk.bf16.mxu1 %vm40_vm0, %v6795_v19 }
  0x70   :  { %619 = vrot.lane.b32.xlu0 %v7270_v58, %s6976_s13 }
  0x73   :  { %379 = vrot.lane.b32.xlu1 %v7258_v53, %s6976_s13  ;;  %v5703_v53 = vpack.c.bf16 %v521_v42, %v521_v42  ;;  %v1052_v42 = vld [vmem:[#allocation2 + $0x130] sm:$0xff] }
  0x74   :  { %251 = vrot.lane.b32.xlu0 %v7270_v58, %s6974_s21  ;;  %v5704_v58 = vpack.c.bf16 %v522_v48, %v522_v48  ;;  %v5775_v48 = vpack.c.bf16 %v1051_v47, %v1051_v47 }
  0x76   :  { %6436 = vmatmul.mubr.msk.bf16.gmra.mxu1 %vm40_vm0, %v6796_v20 }
  0x77   :  { %621 = vrot.lane.b32.xlu1 %v7272_v59, %s6976_s13 }
  0x78   :  { %494 = vrot.lane.b32.xlu0 %v7274_v60, %s6974_s21 }
  0x7b   :  { %253 = vrot.lane.b32.xlu1 %v7272_v59, %s6974_s21  ;;  %v586_v59 = vld [vmem:[#allocation2 + $0x91] sm:$0xff] }
  0x7c   :  { %316 = vrot.lane.b32.xlu0 %v7256_v52, %s6975_s22  ;;  %v5712_v52 = vpack.c.bf16 %v586_v59, %v586_v59 }
  0x7f   :  { %496 = vrot.lane.b32.xlu1 %v7282_v63, %s6974_s21  ;;  %v740_v63 = vld [vmem:[#allocation2 + $0xa1] sm:$0xff] }
  0x80   :  { %559 = vrot.lane.b32.xlu0 %v5703_v53, %s6975_s22 }
  0x83   :  { %318 = vrot.lane.b32.xlu1 %v7274_v60, %s6975_s22  ;;  %v5729_v60 = vpack.c.bf16 %v740_v63, %v740_v63 }
  0x84   :  { %381 = vrot.lane.b32.xlu0 %v7260_v54, %s6976_s13  ;;  %v5737_v54 = vpack.c.bf16 %v804_v39, %v804_v39 }
  0x87   :  { %561 = vrot.lane.b32.xlu1 %v5704_v58, %s6975_s22 }
  0x88   :  { %623 = vrot.lane.b32.xlu0 %v7284_v1, %s6976_s13  ;;  %v240_v1 = vpop.permute.xlu0 %239 }
  0x89   :  { %264 = vst.msk [vmem:[#allocation4] sm:$0xf] %vm263_vm3, %v240_v1 }
  0x8b   :  { %383 = vrot.lane.b32.xlu1 %v5703_v53, %s6976_s13  ;;  %v5776_v53 = vpack.c.bf16 %v1052_v42, %v1052_v42 }
  0x8c   :  { %772 = vrot.lane.b32.xlu0 %v5729_v60, %s6974_s21 }
  0x8f   :  { %625 = vrot.lane.b32.xlu1 %v5712_v52, %s6976_s13 }
  0x90   :  { %1012 = vrot.lane.b32.xlu0 %v5761_v33, %s6974_s21 }
  0x93   :  { %774 = vrot.lane.b32.xlu1 %v7292_v3, %s6974_s21 }
  0x94   :  { %836 = vrot.lane.b32.xlu0 %v5737_v54, %s6975_s22 }
  0x97   :  { %1014 = vrot.lane.b32.xlu1 %v7302_v5, %s6974_s21 }
  0x98   :  { %1077 = vrot.lane.b32.xlu0 %v7310_v9, %s6975_s22 }
  0x9b   :  { %838 = vrot.lane.b32.xlu1 %v5761_v33, %s6975_s22 }
  0x9c   :  { %900 = vrot.lane.b32.xlu0 %v7314_v11, %s6976_s13  ;;  %v305_v11 = vpop.permute.xlu0 %304 }
  0x9d   :  { %329 = vst.msk [vmem:[#allocation4] sm:$0xf] %vm328_vm4, %v305_v11 }
  0x9f   :  { %1079 = vrot.lane.b32.xlu1 %v7312_v10, %s6975_s22 }
  0xa0   :  { %1141 = vrot.lane.b32.xlu0 %v7318_v16, %s6976_s13 }
  0xa3   :  { %902 = vrot.lane.b32.xlu1 %v7310_v9, %s6976_s13 }
  0xa4   :  { %776 = vrot.lane.b32.xlu0 %v7318_v16, %s6974_s21 }
  0xa5   :  { %v483_v3 = vpop.permute.xlu1 %482 }
  0xa6   :  { %506 = vst.msk [vmem:[#allocation4 + $0x4] sm:$0xf] %vm263_vm3, %v483_v3  ;;  %v242_v49 = vpop.permute.xlu0 %241 }
  0xa7   :  { %1143 = vrot.lane.b32.xlu1 %v7320_v17, %s6976_s13  ;;  %265 = vst.msk [vmem:[#allocation4 + $0xc] sm:$0xf] %vm263_vm3, %v242_v49 }
  0xa8   :  { %1016 = vrot.lane.b32.xlu0 %v7348_v23, %s6974_s21 }
  0xa9   :  { %v485_v9 = vpop.permute.xlu1 %484 }
  0xaa   :  { %507 = vst.msk [vmem:[#allocation4 + $0x10] sm:$0xf] %vm263_vm3, %v485_v9  ;;  %v548_v51 = vpop.permute.xlu0 %547 }
  0xab   :  { %778 = vrot.lane.b32.xlu1 %v7320_v17, %s6974_s21  ;;  %571 = vst.msk [vmem:[#allocation4 + $0x4] sm:$0xf] %vm328_vm4, %v548_v51 }
  0xac   :  { %840 = vrot.lane.b32.xlu0 %v7302_v5, %s6975_s22 }
  0xad   :  { %v307_v50 = vpop.permute.xlu1 %306 }
  0xae   :  { %330 = vst.msk [vmem:[#allocation4 + $0xc] sm:$0xf] %vm328_vm4, %v307_v50  ;;  %v370_v16 = vpop.permute.xlu0 %369 }
  0xaf   :  { %1018 = vrot.lane.b32.xlu1 %v7383_v37, %s6974_s21  ;;  %394 = vst.msk [vmem:[#allocation4] sm:$0xf] %vm393_vm5, %v370_v16 }
  0xb0   :  { %1081 = vrot.lane.b32.xlu0 %v7385_v38, %s6975_s22 }
  0xb1   :  { %v550_v55 = vpop.permute.xlu1 %549 }
  0xb2   :  { %572 = vst.msk [vmem:[#allocation4 + $0x10] sm:$0xf] %vm328_vm4, %v550_v55  ;;  %v612_v57 = vpop.permute.xlu0 %611 }
  0xb3   :  { %842 = vrot.lane.b32.xlu1 %v7348_v23, %s6975_s22  ;;  %635 = vst.msk [vmem:[#allocation4 + $0x4] sm:$0xf] %vm393_vm5, %v612_v57 }
  0xb4   :  { %904 = vrot.lane.b32.xlu0 %v7312_v10, %s6976_s13 }
  0xb5   :  { %v372_v17 = vpop.permute.xlu1 %371 }
  0xb6   :  { %395 = vst.msk [vmem:[#allocation4 + $0xc] sm:$0xf] %vm393_vm5, %v372_v17  ;;  %v244_v23 = vpop.permute.xlu0 %243 }
  0xb7   :  { %1083 = vrot.lane.b32.xlu1 %v7408_v34, %s6975_s22  ;;  %266 = vst.msk [vmem:[#allocation4 + $0x18] sm:$0xf] %vm263_vm3, %v244_v23 }
  0xb8   :  { %1145 = vrot.lane.b32.xlu0 %v7393_v45, %s6976_s13 }
  0xb9   :  { %v614_v5 = vpop.permute.xlu1 %613 }
  0xba   :  { %636 = vst.msk [vmem:[#allocation4 + $0x10] sm:$0xf] %vm393_vm5, %v614_v5  ;;  %v487_v61 = vpop.permute.xlu0 %486 }
  0xbb   :  { %906 = vrot.lane.b32.xlu1 %v7385_v38, %s6976_s13  ;;  %508 = vst.msk [vmem:[#allocation4 + $0x1c] sm:$0xf] %vm263_vm3, %v487_v61 }
  0xbc   :  { %780 = vrot.lane.b32.xlu0 %v7393_v45, %s6974_s21 }
  0xbd   :  { %v246_v35 = vpop.permute.xlu1 %245  ;;  %v6773_v10 = vld [vmem:[#allocation4] ss:$12 sps:$4 sm:$0xff]  }
  0xbe   :  { %267 = vst.msk [vmem:[#allocation4 + $0x24] sm:$0xf] %vm263_vm3, %v246_v35  ;;  %v309_v38 = vpop.permute.xlu0 %308 }
  0xbf   :  { %1147 = vrot.lane.b32.xlu1 %v7413_v56, %s6976_s13  ;;  %331 = vst.msk [vmem:[#allocation4 + $0x18] sm:$0xf] %vm328_vm4, %v309_v38 }
  0xc0   :  { %1020 = vrot.lane.b32.xlu0 %v7426_v2, %s6974_s21 }
  0xc1   :  { %v489_v62 = vpop.permute.xlu1 %488  ;;  %v6775_v4 = vld [vmem:[#allocation4 + $0x4] ss:$12 sps:$4 sm:$0xff]  }
  0xc2   :  { %509 = vst.msk [vmem:[#allocation4 + $0x28] sm:$0xf] %vm263_vm3, %v489_v62  ;;  %1580 = vmatprep.mubr.bf16.mxu0 %v6775_v4  ;;  %v552_v7 = vpop.permute.xlu0 %551 }
  0xc3   :  { %782 = vrot.lane.b32.xlu1 %v7413_v56, %s6974_s21  ;;  %1581 = vmatmul.mubr.bf16.vlgmr.msra.gmra.mxu0 %v6773_v10  ;;  %573 = vst.msk [vmem:[#allocation4 + $0x1c] sm:$0xf] %vm328_vm4, %v552_v7 }
  0xc4   :  { %844 = vrot.lane.b32.xlu0 %v7383_v37, %s6975_s22 }
  0xc5   :  { %v311_v6 = vpop.permute.xlu1 %310 }
  0xc6   :  { %332 = vst.msk [vmem:[#allocation4 + $0x24] sm:$0xf] %vm328_vm4, %v311_v6  ;;  %v374_v56 = vpop.permute.xlu0 %373 }
  0xc7   :  { %1022 = vrot.lane.b32.xlu1 %v7457_v15, %s6974_s21  ;;  %396 = vst.msk [vmem:[#allocation4 + $0x18] sm:$0xf] %vm393_vm5, %v374_v56 }
  0xc8   :  { %1085 = vrot.lane.b32.xlu0 %v7459_v36, %s6975_s22 }
  0xc9   :  { %v554_v45 = vpop.permute.xlu1 %553 }
  0xca   :  { %574 = vst.msk [vmem:[#allocation4 + $0x28] sm:$0xf] %vm328_vm4, %v554_v45  ;;  %v616_v37 = vpop.permute.xlu0 %615 }
  0xcb   :  { %846 = vrot.lane.b32.xlu1 %v7426_v2, %s6975_s22  ;;  %637 = vst.msk [vmem:[#allocation4 + $0x1c] sm:$0xf] %vm393_vm5, %v616_v37 }
  0xcc   :  { %908 = vrot.lane.b32.xlu0 %v7408_v34, %s6976_s13 }
  0xcd   :  { %v376_v12 = vpop.permute.xlu1 %375 }
  0xce   :  { %397 = vst.msk [vmem:[#allocation4 + $0x24] sm:$0xf] %vm393_vm5, %v376_v12  ;;  %v248_v14 = vpop.permute.xlu0 %247 }
  0xcf   :  { %1087 = vrot.lane.b32.xlu1 %v7472_v21, %s6975_s22  ;;  %268 = vst.msk [vmem:[#allocation4 + $0x30] sm:$0xf] %vm263_vm3, %v248_v14 }
  0xd0   :  { %1149 = vrot.lane.b32.xlu0 %v7461_v18, %s6976_s13 }
  0xd1   :  { %v618_v2 = vpop.permute.xlu1 %617 }
  0xd2   :  { %638 = vst.msk [vmem:[#allocation4 + $0x28] sm:$0xf] %vm393_vm5, %v618_v2  ;;  %v491_v34 = vpop.permute.xlu0 %490  ;;  %v1225_v0 = vld [vmem:[#allocation4 + $0x18] sm:$0xff] }
  0xd3   :  { %910 = vrot.lane.b32.xlu1 %v7459_v36, %s6976_s13  ;;  %510 = vst.msk [vmem:[#allocation4 + $0x34] sm:$0xf] %vm263_vm3, %v491_v34 }
  0xd4   :  { %784 = vrot.lane.b32.xlu0 %v7461_v18, %s6974_s21 }
  0xd5   :  { %v250_v22 = vpop.permute.xlu1 %249 }
  0xd6   :  { %269 = vst.msk [vmem:[#allocation4 + $0x3c] sm:$0xf] %vm263_vm3, %v250_v22  ;;  %v313_v46 = vpop.permute.xlu0 %312 }
  0xd7   :  { %1151 = vrot.lane.b32.xlu1 %v7474_v24, %s6976_s13  ;;  %333 = vst.msk [vmem:[#allocation4 + $0x30] sm:$0xf] %vm328_vm4, %v313_v46 }
  0xd8   :  { %1024 = vrot.lane.b32.xlu0 %v7484_v25, %s6974_s21 }
  0xd9   :  { %v493_v36 = vpop.permute.xlu1 %492  ;;  %v1227_v26 = vld [vmem:[#allocation4 + $0x24] sm:$0xff] }
  0xda   :  { %v6779_v29 = vld [vmem:[#allocation4 + $0x1c] ss:$12 sps:$4 sm:$0xff]   ;;  %511 = vst.msk [vmem:[#allocation4 + $0x40] sm:$0xf] %vm263_vm3, %v493_v36  ;;  %v5311_v31 = vcombine.low %v1225_v0, %v1227_v26  ;;  %v556_v18 = vpop.permute.xlu0 %555 }
  0xdb   :  { %786 = vrot.lane.b32.xlu1 %v7474_v24, %s6974_s21  ;;  %1588 = vmatprep.mubr.bf16.mxu0 %v6779_v29  ;;  %575 = vst.msk [vmem:[#allocation4 + $0x34] sm:$0xf] %vm328_vm4, %v556_v18 }
  0xdc   :  { %1589 = vmatmul.mubr.bf16.gmra.mxu0 %v5311_v31  ;;  %848 = vrot.lane.b32.xlu0 %v7457_v15, %s6975_s22 }
  0xdd   :  { %v315_v40 = vpop.permute.xlu1 %314 }
  0xde   :  { %334 = vst.msk [vmem:[#allocation4 + $0x3c] sm:$0xf] %vm328_vm4, %v315_v40  ;;  %v378_v30 = vpop.permute.xlu0 %377 }
  0xdf   :  { %1026 = vrot.lane.b32.xlu1 %v7486_v27, %s6974_s21  ;;  %398 = vst.msk [vmem:[#allocation4 + $0x30] sm:$0xf] %vm393_vm5, %v378_v30 }
  0xe0   :  { %1089 = vrot.lane.b32.xlu0 %v5775_v48, %s6975_s22 }
  0xe1   :  { %v558_v24 = vpop.permute.xlu1 %557 }
  0xe2   :  { %576 = vst.msk [vmem:[#allocation4 + $0x40] sm:$0xf] %vm328_vm4, %v558_v24  ;;  %v620_v58 = vpop.permute.xlu0 %619 }
  0xe3   :  { %850 = vrot.lane.b32.xlu1 %v7484_v25, %s6975_s22  ;;  %639 = vst.msk [vmem:[#allocation4 + $0x34] sm:$0xf] %vm393_vm5, %v620_v58  ;;  %v5784_v25 = vpack.c.bf16 %v1116_v28, %v1116_v28  ;;  %v7724_v28 = vld [vmem:[%s8950_s9 + $0x78] sm:$0xff] }
  0xe4   :  { %912 = vrot.lane.b32.xlu0 %v7472_v21, %s6976_s13  ;;  %6440 = vmatpush3.msra.mxu1 %v7724_v28 }
  0xe5   :  { %v380_v27 = vpop.permute.xlu1 %379  ;;  %6510 = vmatpush3.msra.mxu0 %v7724_v28 }
  0xe6   :  { %399 = vst.msk [vmem:[#allocation4 + $0x3c] sm:$0xf] %vm393_vm5, %v380_v27  ;;  %v252_v59 = vpop.permute.xlu0 %251 }
  0xe7   :  { %1091 = vrot.lane.b32.xlu1 %v5776_v53, %s6975_s22  ;;  %270 = vst.msk [vmem:[#allocation4 + $0x48] sm:$0xf] %vm263_vm3, %v252_v59  ;;  %v7735_v59 = vld [vmem:[#allocation3] sm:$0xff] }
  0xe8   :  { %1153 = vrot.lane.b32.xlu0 %v7508_v41, %s6976_s13  ;;  %6441 = vmatprep.subr.mxu1 %v7735_v59 }
  0xe9   :  { %v622_v15 = vpop.permute.xlu1 %621  ;;  %6511 = vmatprep.subr.mxu0 %v7735_v59  ;;  %6471 = vmatprep.mubr.msk.f32.mxu1 %vm6977_vm6, %v7735_v59 }
  0xea   :  { %640 = vst.msk [vmem:[#allocation4 + $0x40] sm:$0xf] %vm393_vm5, %v622_v15  ;;  %v495_v63 = vpop.permute.xlu0 %494  ;;  %v1229_v60 = vld [vmem:[#allocation4 + $0x30] sm:$0xff] }
  0xeb   :  { %914 = vrot.lane.b32.xlu1 %v5775_v48, %s6976_s13  ;;  %512 = vst.msk [vmem:[#allocation4 + $0x4c] sm:$0xf] %vm263_vm3, %v495_v63  ;;  %v7729_v15 = vld [vmem:[%s8950_s9 + $0x70] sm:$0xff] }
  0xec   :  { %6442 = vmatpush3.msra.mxu1 %v7729_v15  ;;  %6512 = vmatpush3.msra.mxu0 %v7729_v15 }
  0xed   :  { %v254_v52 = vpop.permute.xlu1 %253  ;;  %6443 = vmatprep.subr.mxu1 %v7735_v59  ;;  %6513 = vmatprep.subr.mxu0 %v7735_v59 }
  0xee   :  { %271 = vst.msk [vmem:[#allocation4 + $0x54] sm:$0xf] %vm263_vm3, %v254_v52  ;;  %v317_v54 = vpop.permute.xlu0 %316  ;;  %v7741_v52 = vld [vmem:[%s8950_s9 + $0x68] sm:$0xff] }
  0xef   :  { %1155 = vrot.lane.b32.xlu1 %v5784_v25, %s6976_s13  ;;  %335 = vst.msk [vmem:[#allocation4 + $0x48] sm:$0xf] %vm328_vm4, %v317_v54  ;;  %6444 = vmatpush3.msra.mxu1 %v7741_v52 }
  0xf0   :  { %6514 = vmatpush3.msra.mxu0 %v7741_v52  ;;  %6445 = vmatprep.subr.mxu1 %v7735_v59 }
  0xf1   :  { %v497_v32 = vpop.permute.xlu1 %496  ;;  %v1231_v21 = vld [vmem:[#allocation4 + $0x3c] sm:$0xff]  ;;  %6515 = vmatprep.subr.mxu0 %v7735_v59 }
  0xf2   :  { %v6781_v33 = vld [vmem:[#allocation4 + $0x34] ss:$12 sps:$4 sm:$0xff]   ;;  %513 = vst.msk [vmem:[#allocation4 + $0x58] sm:$0xf] %vm263_vm3, %v497_v32  ;;  %v5314_v39 = vcombine.low %v1229_v60, %v1231_v21  ;;  %v560_v41 = vpop.permute.xlu0 %559 }
  0xf3   :  { %1596 = vmatprep.mubr.bf16.mxu0 %v6781_v33  ;;  %577 = vst.msk [vmem:[#allocation4 + $0x4c] sm:$0xf] %vm328_vm4, %v560_v41  ;;  %v7757_v21 = vld [vmem:[%s8950_s9 + $0x60] sm:$0xff]  ;;  %v7776_v41 = vld [vmem:[%s8950_s9 + $0x50] sm:$0xff] }
  0xf4   :  { %1597 = vmatmul.mubr.bf16.gmra.mxu0 %v5314_v39  ;;  %6446 = vmatpush3.msra.mxu1 %v7757_v21  ;;  %v7767_v39 = vld [vmem:[%s8950_s9 + $0x58] sm:$0xff] }
  0xf5   :  { %v319_v1 = vpop.permute.xlu1 %318  ;;  %6516 = vmatpush3.msra.mxu0 %v7757_v21  ;;  %6447 = vmatprep.subr.mxu1 %v7735_v59 }
  0xf6   :  { %336 = vst.msk [vmem:[#allocation4 + $0x54] sm:$0xf] %vm328_vm4, %v319_v1  ;;  %v382_v43 = vpop.permute.xlu0 %381  ;;  %6517 = vmatprep.subr.mxu0 %v7735_v59  ;;  %6448 = vmatpush3.msra.mxu1 %v7767_v39 }
  0xf7   :  { %400 = vst.msk [vmem:[#allocation4 + $0x48] sm:$0xf] %vm393_vm5, %v382_v43  ;;  %6518 = vmatpush3.msra.mxu0 %v7767_v39  ;;  %6449 = vmatprep.subr.mxu1 %v7735_v59 }
  0xf8   :  { %6519 = vmatprep.subr.mxu0 %v7735_v59  ;;  %6450 = vmatpush3.msra.mxu1 %v7776_v41 }
  0xf9   :  { %v562_v3 = vpop.permute.xlu1 %561  ;;  %6520 = vmatpush3.msra.mxu0 %v7776_v41  ;;  %6451 = vmatprep.subr.mxu1 %v7735_v59 }
  0xfa   :  { %578 = vst.msk [vmem:[#allocation4 + $0x58] sm:$0xf] %vm328_vm4, %v562_v3  ;;  %v624_v11 = vpop.permute.xlu0 %623  ;;  %6521 = vmatprep.subr.mxu0 %v7735_v59 }
  0xfb   :  { %641 = vst.msk [vmem:[#allocation4 + $0x4c] sm:$0xf] %vm393_vm5, %v624_v11 }
  0xfd   :  { %v384_v44 = vpop.permute.xlu1 %383 }
  0xfe   :  { %401 = vst.msk [vmem:[#allocation4 + $0x54] sm:$0xf] %vm393_vm5, %v384_v44  ;;  %v773_v49 = vpop.permute.xlu0 %772 }
  0xff   :  { %796 = vst.msk [vmem:[#allocation4 + $0x60] sm:$0xf] %vm263_vm3, %v773_v49 }
 0x101   :  { %v626_v9 = vpop.permute.xlu1 %625 }
 0x102   :  { %642 = vst.msk [vmem:[#allocation4 + $0x58] sm:$0xf] %vm393_vm5, %v626_v9  ;;  %v1013_v51 = vpop.permute.xlu0 %1012  ;;  %v1233_v55 = vld [vmem:[#allocation4 + $0x48] sm:$0xff] }
 0x103   :  { %1036 = vst.msk [vmem:[#allocation4 + $0x64] sm:$0xf] %vm263_vm3, %v1013_v51  ;;  %v7787_v9 = vld [vmem:[%s8950_s9 + $0x48] sm:$0xff] }
 0x104   :  { %6452 = vmatpush3.msra.mxu1 %v7787_v9  ;;  %6522 = vmatpush3.msra.mxu0 %v7787_v9 }
 0x105   :  { %v775_v50 = vpop.permute.xlu1 %774  ;;  %6453 = vmatprep.subr.mxu1 %v7735_v59  ;;  %6523 = vmatprep.subr.mxu0 %v7735_v59 }
 0x106   :  { %797 = vst.msk [vmem:[#allocation4 + $0x6c] sm:$0xf] %vm263_vm3, %v775_v50  ;;  %v837_v23 = vpop.permute.xlu0 %836  ;;  %v7795_v50 = vld [vmem:[%s8950_s9 + $0x40] sm:$0xff] }
 0x107   :  { %860 = vst.msk [vmem:[#allocation4 + $0x60] sm:$0xf] %vm328_vm4, %v837_v23  ;;  %6454 = vmatpush3.msra.mxu1 %v7795_v50  ;;  %6524 = vmatpush3.msra.mxu0 %v7795_v50 }
 0x108   :  { %6455 = vmatprep.subr.mxu1 %v7735_v59  ;;  %6525 = vmatprep.subr.mxu0 %v7735_v59 }
 0x109   :  { %v1015_v16 = vpop.permute.xlu1 %1014  ;;  %v1235_v17 = vld [vmem:[#allocation4 + $0x54] sm:$0xff] }
 0x10a   :  { %v6785_v57 = vld [vmem:[#allocation4 + $0x4c] ss:$12 sps:$4 sm:$0xff]   ;;  %1037 = vst.msk [vmem:[#allocation4 + $0x70] sm:$0xf] %vm263_vm3, %v1015_v16  ;;  %v5317_v5 = vcombine.low %v1233_v55, %v1235_v17  ;;  %v1078_v61 = vpop.permute.xlu0 %1077  ;;  %v7814_v17 = vld [vmem:[%s8950_s9 + $0x30] sm:$0xff] }
 0x10b   :  { %1604 = vmatprep.mubr.bf16.mxu0 %v6785_v57  ;;  %1101 = vst.msk [vmem:[#allocation4 + $0x64] sm:$0xf] %vm328_vm4, %v1078_v61  ;;  %v7805_v55 = vld [vmem:[%s8950_s9 + $0x38] sm:$0xff] }
 0x10c   :  { %1605 = vmatmul.mubr.bf16.gmra.mxu0 %v5317_v5  ;;  %6456 = vmatpush3.msra.mxu1 %v7805_v55  ;;  %v7825_v5 = vld [vmem:[%s8950_s9 + $0x28] sm:$0xff] }
 0x10d   :  { %v839_v35 = vpop.permute.xlu1 %838  ;;  %6457 = vmatprep.subr.mxu1 %v7735_v59  ;;  %6526 = vmatpush3.msra.mxu0 %v7805_v55 }
 0x10e   :  { %861 = vst.msk [vmem:[#allocation4 + $0x6c] sm:$0xf] %vm328_vm4, %v839_v35  ;;  %v901_v10 = vpop.permute.xlu0 %900  ;;  %6458 = vmatpush3.msra.mxu1 %v7814_v17  ;;  %6527 = vmatprep.subr.mxu0 %v7735_v59  ;;  %v7834_v35 = vld [vmem:[%s8950_s9 + $0x20] sm:$0xff] }
 0x10f   :  { %924 = vst.msk [vmem:[#allocation4 + $0x60] sm:$0xf] %vm393_vm5, %v901_v10  ;;  %6459 = vmatprep.subr.mxu1 %v7735_v59  ;;  %6528 = vmatpush3.msra.mxu0 %v7814_v17 }
 0x110   :  { %6460 = vmatpush3.msra.mxu1 %v7825_v5  ;;  %6529 = vmatprep.subr.mxu0 %v7735_v59 }
 0x111   :  { %v1080_v62 = vpop.permute.xlu1 %1079  ;;  %6461 = vmatprep.subr.mxu1 %v7735_v59  ;;  %6530 = vmatpush3.msra.mxu0 %v7825_v5 }
 0x112   :  { %1102 = vst.msk [vmem:[#allocation4 + $0x70] sm:$0xf] %vm328_vm4, %v1080_v62  ;;  %v1142_v38 = vpop.permute.xlu0 %1141  ;;  %6462 = vmatpush3.msra.mxu1 %v7834_v35  ;;  %v7845_v62 = vld [vmem:[%s8950_s9 + $0x18] sm:$0xff]  ;;  %6531 = vmatprep.subr.mxu0 %v7735_v59 }
 0x113   :  { %1165 = vst.msk [vmem:[#allocation4 + $0x64] sm:$0xf] %vm393_vm5, %v1142_v38  ;;  %6463 = vmatprep.subr.mxu1 %v7735_v59  ;;  %6532 = vmatpush3.msra.mxu0 %v7834_v35 }
 0x114   :  { %6464 = vmatpush3.msra.mxu1 %v7845_v62  ;;  %6533 = vmatprep.subr.mxu0 %v7735_v59 }
 0x115   :  { %v903_v4 = vpop.permute.xlu1 %902  ;;  %6465 = vmatprep.subr.mxu1 %v7735_v59  ;;  %6534 = vmatpush3.msra.mxu0 %v7845_v62 }
 0x116   :  { %925 = vst.msk [vmem:[#allocation4 + $0x6c] sm:$0xf] %vm393_vm5, %v903_v4  ;;  %v777_v7 = vpop.permute.xlu0 %776  ;;  %v7854_v4 = vld [vmem:[%s8950_s9 + $0x10] sm:$0xff]  ;;  %6535 = vmatprep.subr.mxu0 %v7735_v59 }
 0x117   :  { %798 = vst.msk [vmem:[#allocation4 + $0x78] sm:$0xf] %vm263_vm3, %v777_v7  ;;  %6466 = vmatpush3.msra.mxu1 %v7854_v4  ;;  %6536 = vmatpush3.msra.mxu0 %v7854_v4  ;;  %v7874_v7 = vld [vmem:[%s8950_s9] sm:$0xff] }
 0x118   :  { %6467 = vmatprep.subr.mxu1 %v7735_v59  ;;  %6537 = vmatprep.subr.mxu0 %v7735_v59 }
 0x119   :  { %v1144_v6 = vpop.permute.xlu1 %1143 }
 0x11a   :  { %1166 = vst.msk [vmem:[#allocation4 + $0x70] sm:$0xf] %vm393_vm5, %v1144_v6  ;;  %v1017_v56 = vpop.permute.xlu0 %1016  ;;  %v1237_v8 = vld [vmem:[#allocation4 + $0x60] sm:$0xff]  ;;  %v7862_v6 = vld [vmem:[%s8950_s9 + $0x8] sm:$0xff] }
 0x11b   :  { %1038 = vst.msk [vmem:[#allocation4 + $0x7c] sm:$0xf] %vm263_vm3, %v1017_v56  ;;  %6468 = vmatpush3.msra.mxu1 %v7862_v6  ;;  %6538 = vmatpush3.msra.mxu0 %v7862_v6 }
 0x11c   :  { %6469 = vmatprep.subr.mxu1 %v7735_v59  ;;  %6539 = vmatprep.subr.mxu0 %v7735_v59 }
 0x11d   :  { %v779_v45 = vpop.permute.xlu1 %778  ;;  %6470 = vmatpush3.msra.mxu1 %v7874_v7  ;;  %6540 = vmatpush3.msra.mxu0 %v7874_v7 }
 0x11e   :  { %799 = vst.msk [vmem:[#allocation4 + $0x84] sm:$0xf] %vm263_vm3, %v779_v45  ;;  %v841_v14 = vpop.permute.xlu0 %840  ;;  %6474 = vmatprep.subr.mxu1 %v7735_v59 }
 0x11f   :  { %862 = vst.msk [vmem:[#allocation4 + $0x78] sm:$0xf] %vm328_vm4, %v841_v14 }
 0x121   :  { %v1019_v12 = vpop.permute.xlu1 %1018  ;;  %v1239_v13 = vld [vmem:[#allocation4 + $0x6c] sm:$0xff] }
 0x122   :  { %v6787_v37 = vld [vmem:[#allocation4 + $0x64] ss:$12 sps:$4 sm:$0xff]   ;;  %1039 = vst.msk [vmem:[#allocation4 + $0x88] sm:$0xf] %vm263_vm3, %v1019_v12  ;;  %v5320_v2 = vcombine.low %v1237_v8, %v1239_v13  ;;  %v1082_v19 = vpop.permute.xlu0 %1081 }
 0x123   :  { %1612 = vmatprep.mubr.bf16.mxu0 %v6787_v37  ;;  %1103 = vst.msk [vmem:[#allocation4 + $0x7c] sm:$0xf] %vm328_vm4, %v1082_v19 }
 0x124   :  { %1613 = vmatmul.mubr.bf16.gmra.mxu0 %v5320_v2 }
 0x125   :  { %v843_v22 = vpop.permute.xlu1 %842 }
 0x126   :  { %863 = vst.msk [vmem:[#allocation4 + $0x84] sm:$0xf] %vm328_vm4, %v843_v22  ;;  %v905_v34 = vpop.permute.xlu0 %904  ;;  %v6425_v22 = vpop.f32.mrf.mxu1 }
 0x127   :  { %926 = vst.msk [vmem:[#allocation4 + $0x78] sm:$0xf] %vm393_vm5, %v905_v34 }
 0x129   :  { %v1084_v20 = vpop.permute.xlu1 %1083 }
 0x12a   :  { %1104 = vst.msk [vmem:[#allocation4 + $0x88] sm:$0xf] %vm328_vm4, %v1084_v20  ;;  %v1146_v36 = vpop.permute.xlu0 %1145  ;;  %v1679_v20 = vpop.f32.mrf.mxu1 }
 0x12b   :  { %1167 = vst.msk [vmem:[#allocation4 + $0x7c] sm:$0xf] %vm393_vm5, %v1146_v36 }
 0x12c   :  { %v6426_v36 = vpop.f32.mrf.mxu1 }
 0x12d   :  { %v907_v0 = vpop.permute.xlu1 %906 }
 0x12e   :  { %927 = vst.msk [vmem:[#allocation4 + $0x84] sm:$0xf] %vm393_vm5, %v907_v0  ;;  %v781_v29 = vpop.permute.xlu0 %780 }
 0x12f   :  { %800 = vst.msk [vmem:[#allocation4 + $0x90] sm:$0xf] %vm263_vm3, %v781_v29  ;;  %v1682_v29 = vpop.f32.mrf.mxu1 }
 0x131   :  { %v1148_v26 = vpop.permute.xlu1 %1147 }
 0x132   :  { %1168 = vst.msk [vmem:[#allocation4 + $0x88] sm:$0xf] %vm393_vm5, %v1148_v26  ;;  %v1021_v46 = vpop.permute.xlu0 %1020  ;;  %v1241_v40 = vld [vmem:[#allocation4 + $0x78] sm:$0xff] }
 0x133   :  { %1040 = vst.msk [vmem:[#allocation4 + $0x94] sm:$0xf] %vm263_vm3, %v1021_v46 }
 0x135   :  { %v783_v31 = vpop.permute.xlu1 %782 }
 0x136   :  { %801 = vst.msk [vmem:[#allocation4 + $0x9c] sm:$0xf] %vm263_vm3, %v783_v31  ;;  %v845_v48 = vpop.permute.xlu0 %844 }
 0x137   :  { %864 = vst.msk [vmem:[#allocation4 + $0x90] sm:$0xf] %vm328_vm4, %v845_v48 }
 0x139   :  { %v1023_v47 = vpop.permute.xlu1 %1022  ;;  %v1243_v18 = vld [vmem:[#allocation4 + $0x84] sm:$0xff] }
 0x13a   :  { %v6791_v42 = vld [vmem:[#allocation4 + $0x7c] ss:$12 sps:$4 sm:$0xff]   ;;  %1041 = vst.msk [vmem:[#allocation4 + $0xa0] sm:$0xf] %vm263_vm3, %v1023_v47  ;;  %v5323_v24 = vcombine.low %v1241_v40, %v1243_v18  ;;  %v1086_v30 = vpop.permute.xlu0 %1085  ;;  %v6429_v40 = vpop.f32.mrf.mxu1 }
 0x13b   :  { %1620 = vmatprep.mubr.bf16.mxu0 %v6791_v42  ;;  %1105 = vst.msk [vmem:[#allocation4 + $0x94] sm:$0xf] %vm328_vm4, %v1086_v30  ;;  %v7889_v42 = vld [vmem:[%s8951_s3] ss:$0 sm:$0xff] }
 0x13c   :  { %1621 = vmatmul.mubr.bf16.gmra.mxu0 %v5323_v24  ;;  %v1695_v30 = vpop.f32.mrf.mxu1 }
 0x13d   :  { %v847_v53 = vpop.permute.xlu1 %846 }
 0x13e   :  { %865 = vst.msk [vmem:[#allocation4 + $0x9c] sm:$0xf] %vm328_vm4, %v847_v53  ;;  %v909_v58 = vpop.permute.xlu0 %908 }
 0x13f   :  { %928 = vst.msk [vmem:[#allocation4 + $0x90] sm:$0xf] %vm393_vm5, %v909_v58 }
 0x141   :  { %v1088_v27 = vpop.permute.xlu1 %1087 }
 0x142   :  { %1106 = vst.msk [vmem:[#allocation4 + $0xa0] sm:$0xf] %vm328_vm4, %v1088_v27  ;;  %v1150_v63 = vpop.permute.xlu0 %1149 }
 0x143   :  { %1169 = vst.msk [vmem:[#allocation4 + $0x94] sm:$0xf] %vm393_vm5, %v1150_v63 }
 0x145   :  { %v911_v25 = vpop.permute.xlu1 %910 }
 0x146   :  { %929 = vst.msk [vmem:[#allocation4 + $0x9c] sm:$0xf] %vm393_vm5, %v911_v25  ;;  %v785_v32 = vpop.permute.xlu0 %784 }
 0x147   :  { %802 = vst.msk [vmem:[#allocation4 + $0xa8] sm:$0xf] %vm263_vm3, %v785_v32 }
 0x149   :  { %v1152_v60 = vpop.permute.xlu1 %1151 }
 0x14a   :  { %1170 = vst.msk [vmem:[#allocation4 + $0xa0] sm:$0xf] %vm393_vm5, %v1152_v60  ;;  %v1025_v54 = vpop.permute.xlu0 %1024  ;;  %v1245_v1 = vld [vmem:[#allocation4 + $0x90] sm:$0xff] }
 0x14b   :  { %1042 = vst.msk [vmem:[#allocation4 + $0xac] sm:$0xf] %vm263_vm3, %v1025_v54 }
 0x14d   :  { %v787_v33 = vpop.permute.xlu1 %786 }
 0x14e   :  { %803 = vst.msk [vmem:[#allocation4 + $0xb4] sm:$0xf] %vm263_vm3, %v787_v33  ;;  %v849_v49 = vpop.permute.xlu0 %848  ;;  %v6430_v33 = vpop.f32.mrf.mxu1 }
 0x14f   :  { %866 = vst.msk [vmem:[#allocation4 + $0xa8] sm:$0xf] %vm328_vm4, %v849_v49 }
 0x151   :  { %v1027_v3 = vpop.permute.xlu1 %1026  ;;  %v1247_v43 = vld [vmem:[#allocation4 + $0x9c] sm:$0xff] }
 0x152   :  { %v6793_v44 = vld [vmem:[#allocation4 + $0x94] ss:$12 sps:$4 sm:$0xff]   ;;  %1043 = vst.msk [vmem:[#allocation4 + $0xb8] sm:$0xf] %vm263_vm3, %v1027_v3  ;;  %v5326_v11 = vcombine.low %v1245_v1, %v1247_v43  ;;  %v1090_v16 = vpop.permute.xlu0 %1089 }
 0x153   :  { %1628 = vmatprep.mubr.bf16.mxu0 %v6793_v44  ;;  %1107 = vst.msk [vmem:[#allocation4 + $0xac] sm:$0xf] %vm328_vm4, %v1090_v16 }
 0x154   :  { %1629 = vmatmul.mubr.bf16.gmra.mxu0 %v5326_v11 }
 0x155   :  { %v851_v51 = vpop.permute.xlu1 %850 }
 0x156   :  { %867 = vst.msk [vmem:[#allocation4 + $0xb4] sm:$0xf] %vm328_vm4, %v851_v51  ;;  %v913_v23 = vpop.permute.xlu0 %912  ;;  %v1698_v51 = vpop.f32.mrf.mxu1 }
 0x157   :  { %930 = vst.msk [vmem:[#allocation4 + $0xa8] sm:$0xf] %vm393_vm5, %v913_v23 }
 0x159   :  { %v1092_v57 = vpop.permute.xlu1 %1091 }
 0x15a   :  { %1108 = vst.msk [vmem:[#allocation4 + $0xb8] sm:$0xf] %vm328_vm4, %v1092_v57  ;;  %v1154_v10 = vpop.permute.xlu0 %1153 }
 0x15b   :  { %1171 = vst.msk [vmem:[#allocation4 + $0xac] sm:$0xf] %vm393_vm5, %v1154_v10 }
 0x15d   :  { %v915_v61 = vpop.permute.xlu1 %914 }
 0x15e   :  { %931 = vst.msk [vmem:[#allocation4 + $0xb4] sm:$0xf] %vm393_vm5, %v915_v61 }
 0x161   :  { %v1156_v38 = vpop.permute.xlu1 %1155 }
 0x162   :  { %1172 = vst.msk [vmem:[#allocation4 + $0xb8] sm:$0xf] %vm393_vm5, %v1156_v38 }
 0x165   :  { %v6799_v56 = vld [vmem:[#allocation4 + $0xa8] ss:$12 sps:$4 sm:$0xff]  }
 0x169   :  { %v6797_v45 = vld [vmem:[#allocation4 + $0xac] ss:$12 sps:$4 sm:$0xff]  }
 0x16a   :  { %1636 = vmatprep.mubr.bf16.mxu0 %v6797_v45 }
 0x16b   :  { %1637 = vmatmul.mubr.bf16.gmra.mxu0 %v6799_v56 }
 0x16c   :  { %6541 = vmatprep.mubr.msk.f32.mxu0 %vm6977_vm6, %v7735_v59 }
 0x183   :  { %v5953_v8 = vpop.f32.mrf.mxu0 }
 0x185   :  { %v5954_v12 = vpop.f32.mrf.mxu0 }
 0x186   :  { %v5955_v47 = vadd.f32 %v5954_v12, %v5953_v8 }
 0x187   :  { %v5956_v13 = vpop.f32.mrf.mxu0 }
 0x188   :  { %v1583_v27 = vadd.f32 %v5955_v47, %v7889_v42 }
 0x189   :  { %v5957_v37 = vpop.f32.mrf.mxu0 }
 0x18a   :  { %v5958_v31 = vadd.f32 %v5957_v37, %v5956_v13  ;;  %v7897_v54 = vadd.f32 %v1679_v20, %v1583_v27 }
 0x18c   :  { %v1586_v24 = vadd.f32 %v5958_v31, %v7889_v42 }
 0x18e   :  { %v7894_v63 = vadd.f32 %v1682_v29, %v1586_v24 }
 0x190   :  { %v1758_v44 = vadd.f32 %v7894_v63, %v7897_v54 }
 0x19c   :  { %v5959_v2 = vpop.f32.mrf.mxu0 }
 0x19e   :  { %v5960_v14 = vpop.f32.mrf.mxu0 }
 0x19f   :  { %v5961_v18 = vadd.f32 %v5960_v14, %v5959_v2 }
 0x1a0   :  { %v5962_v19 = vpop.f32.mrf.mxu0 }
 0x1a1   :  { %v1591_v58 = vadd.f32 %v5961_v18, %v7889_v42 }
 0x1a2   :  { %v5963_v34 = vpop.f32.mrf.mxu0 }
 0x1a3   :  { %v5964_v48 = vadd.f32 %v5963_v34, %v5962_v19  ;;  %v7899_v1 = vadd.f32 %v6425_v22, %v1591_v58 }
 0x1a5   :  { %v1594_v60 = vadd.f32 %v5964_v48, %v7889_v42  ;;  %v1759_v23 = vadd.f32 %v1758_v44, %v7899_v1  ;;  %v1773_v29 = vmul.f32 %v7899_v1, %v7899_v1 }
 0x1a7   :  { %v7904_v11 = vadd.f32 %v6426_v36, %v1594_v60 }
 0x1a9   :  { %v1760_v38 = vadd.f32 %v1759_v23, %v7904_v11 }
 0x1b4   :  { %v5965_v0 = vpop.f32.mrf.mxu0 }
 0x1b6   :  { %v5966_v26 = vpop.f32.mrf.mxu0 }
 0x1b7   :  { %v5967_v25 = vadd.f32 %v5966_v26, %v5965_v0  ;;  %v1772_v0 = vmul.f32 %v7894_v63, %v7894_v63  ;;  %v1771_v26 = vmul.f32 %v7897_v54, %v7897_v54 }
 0x1b8   :  { %v5968_v46 = vpop.f32.mrf.mxu0 }
 0x1b9   :  { %v1599_v3 = vadd.f32 %v5967_v25, %v7889_v42 }
 0x1ba   :  { %v5969_v53 = vpop.f32.mrf.mxu0 }
 0x1bb   :  { %v5970_v32 = vadd.f32 %v5969_v53, %v5968_v46  ;;  %v7907_v57 = vadd.f32 %v1695_v30, %v1599_v3  ;;  %v1779_v46 = vadd.f32 %v1772_v0, %v1771_v26 }
 0x1bd   :  { %v1602_v49 = vadd.f32 %v5970_v32, %v7889_v42  ;;  %v1761_v12 = vadd.f32 %v1760_v38, %v7907_v57  ;;  %v1775_v18 = vmul.f32 %v7907_v57, %v7907_v57  ;;  %v1780_v24 = vadd.f32 %v1779_v46, %v1773_v29 }
 0x1bf   :  { %v7911_v45 = vadd.f32 %v1698_v51, %v1602_v49 }
 0x1c1   :  { %v1762_v2 = vadd.f32 %v1761_v12, %v7911_v45  ;;  %v1776_v30 = vmul.f32 %v7911_v45, %v7911_v45 }
 0x1cc   :  { %v5971_v43 = vpop.f32.mrf.mxu0 }
 0x1ce   :  { %v5972_v16 = vpop.f32.mrf.mxu0 }
 0x1cf   :  { %v5973_v61 = vadd.f32 %v5972_v16, %v5971_v43 }
 0x1d0   :  { %v5974_v10 = vpop.f32.mrf.mxu0 }
 0x1d1   :  { %v1607_v56 = vadd.f32 %v5973_v61, %v7889_v42 }
 0x1d2   :  { %v5975_v8 = vpop.f32.mrf.mxu0 }
 0x1d3   :  { %v7915_v13 = vadd.f32 %v6429_v40, %v1607_v56  ;;  %v5976_v37 = vadd.f32 %v5975_v8, %v5974_v10  ;;  %v1774_v40 = vmul.f32 %v7904_v11, %v7904_v11 }
 0x1d5   :  { %v1610_v14 = vadd.f32 %v5976_v37, %v7889_v42  ;;  %v1763_v22 = vadd.f32 %v1762_v2, %v7915_v13  ;;  %v1781_v53 = vadd.f32 %v1780_v24, %v1774_v40  ;;  %v1777_v25 = vmul.f32 %v7915_v13, %v7915_v13 }
 0x1d7   :  { %v7920_v19 = vadd.f32 %v6430_v33, %v1610_v14  ;;  %v1782_v58 = vadd.f32 %v1781_v53, %v1775_v18 }
 0x1d9   :  { %v1764_v20 = vadd.f32 %v1763_v22, %v7920_v19  ;;  %v1783_v60 = vadd.f32 %v1782_v58, %v1776_v30  ;;  %v1778_v32 = vmul.f32 %v7920_v19, %v7920_v19 }
 0x1db   :  { %v1765_v34 = vrot.slane %v1764_v20, 4  ;;  %v1784_v33 = vadd.f32 %v1783_v60, %v1777_v25 }
 0x1dd   :  { %v1766_v36 = vadd.f32 %v1765_v34, %v1764_v20  ;;  %v1785_v3 = vadd.f32 %v1784_v33, %v1778_v32 }
 0x1df   :  { %v1767_v31 = vrot.slane %v1766_v36, 2  ;;  %v1786_v43 = vrot.slane %v1785_v3, 4 }
 0x1e1   :  { %v1768_v47 = vadd.f32 %v1767_v31, %v1766_v36  ;;  %v1787_v44 = vadd.f32 %v1786_v43, %v1785_v3 }
 0x1e3   :  { %v1769_v48 = vrot.slane %v1768_v47, 1  ;;  %v1788_v49 = vrot.slane %v1787_v44, 2 }
 0x1e4   :  { %v5977_v51 = vpop.f32.mrf.mxu0 }
 0x1e5   :  { %v1770_v27 = vadd.f32 %v1769_v48, %v1768_v47  ;;  %v1789_v16 = vadd.f32 %v1788_v49, %v1787_v44 }
 0x1e6   :  { %v5978_v23 = vpop.f32.mrf.mxu0 }
 0x1e7   :  { %6472 = vmatmul.mubr.f32.vlgmr.msra.gmra.mxu1 %v1770_v27  ;;  %v1790_v61 = vrot.slane %v1789_v16, 1 }
 0x1e8   :  { %6475 = vmatpush3.msra.mxu1 %v7724_v28  ;;  %6506 = vmatprep.mubr.msk.f32.mxu1 %vm6977_vm6, %v7735_v59  ;;  %v5980_v10 = vpop.f32.mrf.mxu0 }
 0x1e9   :  { %6476 = vmatprep.subr.mxu1 %v7735_v59  ;;  %v1791_v38 = vadd.f32 %v1790_v61, %v1789_v16 }
 0x1ea   :  { %6477 = vmatpush3.msra.mxu1 %v7729_v15  ;;  %v5981_v56 = vpop.f32.mrf.mxu0 }
 0x1eb   :  { %6478 = vmatprep.subr.mxu1 %v7735_v59 }
 0x1ec   :  { %6479 = vmatpush3.msra.mxu1 %v7741_v52 }
 0x1ed   :  { %6480 = vmatprep.subr.mxu1 %v7735_v59 }
 0x1ee   :  { %6481 = vmatpush3.msra.mxu1 %v7757_v21 }
 0x1ef   :  { %6482 = vmatprep.subr.mxu1 %v7735_v59 }
 0x1f0   :  { %6483 = vmatpush3.msra.mxu1 %v7767_v39 }
 0x1f1   :  { %6484 = vmatprep.subr.mxu1 %v7735_v59 }
 0x1f2   :  { %6485 = vmatpush3.msra.mxu1 %v7776_v41 }
 0x1f3   :  { %6486 = vmatprep.subr.mxu1 %v7735_v59 }
 0x1f4   :  { %6487 = vmatpush3.msra.mxu1 %v7787_v9 }
 0x1f5   :  { %6488 = vmatprep.subr.mxu1 %v7735_v59 }
 0x1f6   :  { %6489 = vmatpush3.msra.mxu1 %v7795_v50 }
 0x1f7   :  { %6490 = vmatprep.subr.mxu1 %v7735_v59 }
 0x1f8   :  { %6491 = vmatpush3.msra.mxu1 %v7805_v55 }
 0x1f9   :  { %6492 = vmatprep.subr.mxu1 %v7735_v59 }
 0x1fa   :  { %6493 = vmatpush3.msra.mxu1 %v7814_v17 }
 0x1fb   :  { %6494 = vmatprep.subr.mxu1 %v7735_v59 }
 0x1fc   :  { %6495 = vmatpush3.msra.mxu1 %v7825_v5  ;;  %v5983_v8 = vpop.f32.mrf.mxu0 }
 0x1fd   :  { %6496 = vmatprep.subr.mxu1 %v7735_v59 }
 0x1fe   :  { %6497 = vmatpush3.msra.mxu1 %v7834_v35  ;;  %v5984_v12 = vpop.f32.mrf.mxu0 }
 0x1ff   :  { %6498 = vmatprep.subr.mxu1 %v7735_v59 }
 0x200   :  { %6499 = vmatpush3.msra.mxu1 %v7845_v62  ;;  %v5986_v37 = vpop.f32.mrf.mxu0 }
 0x201   :  { %6500 = vmatprep.subr.mxu1 %v7735_v59 }
 0x202   :  { %6501 = vmatpush3.msra.mxu1 %v7854_v4 }
 0x203   :  { %6502 = vmatprep.subr.mxu1 %v7735_v59 }
 0x204   :  { %6503 = vmatpush3.msra.mxu1 %v7862_v6 }
 0x205   :  { %6504 = vmatprep.subr.mxu1 %v7735_v59 }
 0x206   :  { %6505 = vmatpush3.msra.mxu1 %v7874_v7 }
 0x207   :  { %6507 = vmatmul.mubr.f32.vlgmr.msra.gmra.mxu1 %v1791_v38  ;;  %6544 = vmatprep.subr.mxu1 %v7735_v59 }
 0x208   :  { %6545 = vmatpush3.msra.mxu1 %v7724_v28  ;;  %6576 = vmatprep.mubr.msk.f32.mxu1 %vm6977_vm6, %v7735_v59  ;;  %v6433_v28 = vpop.f32.mrf.mxu1 }
 0x209   :  { %6546 = vmatprep.subr.mxu1 %v7735_v59 }
 0x20a   :  { %6547 = vmatpush3.msra.mxu1 %v7729_v15  ;;  %v1711_v15 = vpop.f32.mrf.mxu1 }
 0x20b   :  { %6548 = vmatprep.subr.mxu1 %v7735_v59 }
 0x20c   :  { %6549 = vmatpush3.msra.mxu1 %v7741_v52  ;;  %v5987_v52 = vpop.f32.mrf.mxu0 }
 0x20d   :  { %6550 = vmatprep.subr.mxu1 %v7735_v59  ;;  %v5988_v20 = vadd.f32 %v5987_v52, %v5986_v37 }
 0x20e   :  { %6551 = vmatpush3.msra.mxu1 %v7757_v21 }
 0x20f   :  { %6552 = vmatprep.subr.mxu1 %v7735_v59  ;;  %v1626_v26 = vadd.f32 %v5988_v20, %v7889_v42 }
 0x210   :  { %6553 = vmatpush3.msra.mxu1 %v7767_v39  ;;  %v6434_v39 = vpop.f32.mrf.mxu1 }
 0x211   :  { %6554 = vmatprep.subr.mxu1 %v7735_v59  ;;  %v8019_v47 = vadd.f32 %v6434_v39, %v1626_v26 }
 0x212   :  { %6555 = vmatpush3.msra.mxu1 %v7776_v41  ;;  %v1714_v2 = vpop.f32.mrf.mxu1 }
 0x213   :  { %6556 = vmatprep.subr.mxu1 %v7735_v59  ;;  %v2018_v25 = vmul.f32 %v8019_v47, %v8019_v47 }
 0x214   :  { %6557 = vmatpush3.msra.mxu1 %v7787_v9  ;;  %v5989_v21 = vpop.f32.mrf.mxu0  ;;  %v5982_v9 = vadd.f32 %v5981_v56, %v5980_v10  ;;  %v6437_v22 = vpop.f32.mrf.mxu1 }
 0x215   :  { %6558 = vmatprep.subr.mxu1 %v7735_v59 }
 0x216   :  { %6559 = vmatpush3.msra.mxu1 %v7795_v50  ;;  %v5990_v41 = vpop.f32.mrf.mxu0  ;;  %v5979_v50 = vadd.f32 %v5978_v23, %v5977_v51  ;;  %v1727_v0 = vpop.f32.mrf.mxu1 }
 0x217   :  { %6560 = vmatprep.subr.mxu1 %v7735_v59  ;;  %v5991_v36 = vadd.f32 %v5990_v41, %v5989_v21 }
 0x218   :  { %6561 = vmatpush3.msra.mxu1 %v7805_v55  ;;  %v5985_v55 = vadd.f32 %v5984_v12, %v5983_v8  ;;  %v5992_v14 = vpop.f32.mrf.mxu0  ;;  %v6438_v46 = vpop.f32.mrf.mxu1 }
 0x219   :  { %6562 = vmatprep.subr.mxu1 %v7735_v59  ;;  %v1631_v40 = vadd.f32 %v5991_v36, %v7889_v42 }
 0x21a   :  { %6563 = vmatpush3.msra.mxu1 %v7814_v17  ;;  %v1618_v17 = vadd.f32 %v5982_v9, %v7889_v42  ;;  %v5993_v34 = vpop.f32.mrf.mxu0  ;;  %v1730_v48 = vpop.f32.mrf.mxu1 }
 0x21b   :  { %6564 = vmatprep.subr.mxu1 %v7735_v59  ;;  %v8028_v27 = vadd.f32 %v1727_v0, %v1631_v40  ;;  %v6802_v40 = vld [vmem:[%s8952_s2 + $0x38] sm:$0xff]  }
 0x21c   :  { %6565 = vmatpush3.msra.mxu1 %v7825_v5  ;;  %v1615_v5 = vadd.f32 %v5979_v50, %v7889_v42 }
 0x21d   :  { %6566 = vmatprep.subr.mxu1 %v7735_v59  ;;  %v2019_v51 = vmul.f32 %v8028_v27, %v8028_v27 }
 0x21e   :  { %6567 = vmatpush3.msra.mxu1 %v7834_v35  ;;  %v1623_v35 = vadd.f32 %v5985_v55, %v7889_v42  ;;  %v8012_v29 = vadd.f32 %v1711_v15, %v1615_v5 }
 0x21f   :  { %6568 = vmatprep.subr.mxu1 %v7735_v59 }
 0x220   :  { %6569 = vmatpush3.msra.mxu1 %v7845_v62  ;;  %v8008_v62 = vadd.f32 %v1714_v2, %v1618_v17  ;;  %v8014_v31 = vadd.f32 %v6433_v28, %v1623_v35  ;;  %v2015_v24 = vmul.f32 %v8012_v29, %v8012_v29 }
 0x221   :  { %6570 = vmatprep.subr.mxu1 %v7735_v59 }
 0x222   :  { %6571 = vmatpush3.msra.mxu1 %v7854_v4  ;;  %v5994_v4 = vadd.f32 %v5993_v34, %v5992_v14  ;;  %v2002_v30 = vadd.f32 %v8008_v62, %v8012_v29 }
 0x223   :  { %6572 = vmatprep.subr.mxu1 %v7735_v59 }
 0x224   :  { %6573 = vmatpush3.msra.mxu1 %v7862_v6  ;;  %v2016_v6 = vmul.f32 %v8008_v62, %v8008_v62  ;;  %v1634_v18 = vadd.f32 %v5994_v4, %v7889_v42  ;;  %v2003_v32 = vadd.f32 %v2002_v30, %v8014_v31  ;;  %v6800_v4 = vld [vmem:[%s8952_s2 + $0x78] sm:$0xff]   ;;  %v6809_v30 = vld [vmem:[%s8952_s2 + $0xe8] sm:$0xff]  }
 0x225   :  { %6574 = vmatprep.subr.mxu1 %v7735_v59  ;;  %6079 = vmatprep.subr.bf16.mxu0 %v6800_v4  ;;  %v6868_v4 = vld [vmem:[%s8952_s2 + $0x1f8] sm:$0xff]  }
 0x226   :  { %6575 = vmatpush3.msra.mxu1 %v7874_v7  ;;  %v2017_v7 = vmul.f32 %v8014_v31, %v8014_v31  ;;  %v2023_v58 = vadd.f32 %v2016_v6, %v2015_v24  ;;  %v8033_v33 = vadd.f32 %v1730_v48, %v1634_v18  ;;  %v2004_v49 = vadd.f32 %v2003_v32, %v8019_v47  ;;  %v6803_v6 = vld [vmem:[%s8952_s2 + $0xb8] sm:$0xff]   ;;  %v6804_v18 = vld [vmem:[%s8952_s2 + $0x70] sm:$0xff]   ;;  %v6813_v32 = vld [vmem:[%s8952_s2 + $0xe0] sm:$0xff]  }
 0x227   :  { %v6805_v24 = vld [vmem:[%s8952_s2 + $0xf0] sm:$0xff]  }
 0x228   :  { %v2024_v43 = vadd.f32 %v2023_v58, %v2017_v7  ;;  %v2005_v10 = vadd.f32 %v2004_v49, %v8028_v27  ;;  %v2020_v38 = vmul.f32 %v8033_v33, %v8033_v33  ;;  %v6806_v7 = vld [vmem:[%s8952_s2 + $0x30] sm:$0xff]   ;;  %v6810_v58 = vld [vmem:[%s8952_s2 + $0x28] sm:$0xff]   ;;  %v6817_v49 = vld [vmem:[%s8952_s2 + $0xd8] sm:$0xff]  }
 0x229   :  { %v6807_v48 = vld [vmem:[%s8952_s2 + $0xb0] sm:$0xff]  }
 0x22a   :  { %v2025_v23 = vadd.f32 %v2024_v43, %v2018_v25  ;;  %v2006_v28 = vadd.f32 %v2005_v10, %v8033_v33  ;;  %v6811_v25 = vld [vmem:[%s8952_s2 + $0xa8] sm:$0xff]   ;;  %v6815_v43 = vld [vmem:[%s8952_s2 + $0xa0] sm:$0xff]   ;;  %v6821_v10 = vld [vmem:[%s8952_s2 + $0xd0] sm:$0xff]  }
 0x22b   :  { %v5995_v53 = vpop.f32.mrf.mxu0 }
 0x22c   :  { %v2026_v12 = vadd.f32 %v2025_v23, %v2019_v51  ;;  %v6818_v51 = vld [vmem:[%s8952_s2 + $0x18] sm:$0xff]  }
 0x22d   :  { %v5996_v60 = vpop.f32.mrf.mxu0  ;;  %v6819_v23 = vld [vmem:[%s8952_s2 + $0x98] sm:$0xff]  }
 0x22e   :  { %v5997_v3 = vadd.f32 %v5996_v60, %v5995_v53  ;;  %v2027_v52 = vadd.f32 %v2026_v12, %v2020_v38  ;;  %v6808_v53 = vld [vmem:[%s8952_s2 + $0x68] sm:$0xff]   ;;  %v6812_v60 = vld [vmem:[%s8952_s2 + $0x60] sm:$0xff]   ;;  %v6823_v38 = vld [vmem:[%s8952_s2 + $0x90] sm:$0xff]  }
 0x22f   :  { %v5998_v44 = vpop.f32.mrf.mxu0  ;;  %v6825_v12 = vld [vmem:[%s8952_s2 + $0xc8] sm:$0xff]  }
 0x230   :  { %v1639_v16 = vadd.f32 %v5997_v3, %v7889_v42  ;;  %v6814_v3 = vld [vmem:[%s8952_s2 + $0x20] sm:$0xff]  }
 0x231   :  { %v5999_v61 = vpop.f32.mrf.mxu0 }
 0x232   :  { %v8042_v56 = vadd.f32 %v6437_v22, %v1639_v16  ;;  %v6000_v8 = vadd.f32 %v5999_v61, %v5998_v44  ;;  %v6816_v44 = vld [vmem:[%s8952_s2 + $0x58] sm:$0xff]   ;;  %v5793_v16 = vpack.c.bf16 %v7735_v59, %v7735_v59  ;;  %v6820_v61 = vld [vmem:[%s8952_s2 + $0x50] sm:$0xff]  }
 0x233   :  { %v6822_v59 = vld [vmem:[%s8952_s2 + $0x10] sm:$0xff]  }
 0x234   :  { %v2021_v37 = vmul.f32 %v8042_v56, %v8042_v56  ;;  %v1642_v15 = vadd.f32 %v6000_v8, %v7889_v42  ;;  %v2007_v21 = vadd.f32 %v2006_v28, %v8042_v56  ;;  %2296 = vst [vmem:[#allocation5] sm:$0xf] %v5793_v16  ;;  %2730 = vst [vmem:[#allocation5 + $0x120] sm:$0xf] %v5793_v16  ;;  %v6824_v8 = vld [vmem:[%s8952_s2 + $0x48] sm:$0xff]  }
 0x235   :  { %v6826_v28 = vld [vmem:[%s8952_s2 + $0x8] sm:$0xff]   ;;  %2592 = vst [vmem:[#allocation5 + $0x114] sm:$0xf] %v5793_v16  ;;  %3026 = vst [vmem:[#allocation5 + $0x234] sm:$0xf] %v5793_v16 }
 0x236   :  { %v8049_v39 = vadd.f32 %v6438_v46, %v1642_v15  ;;  %v2028_v41 = vadd.f32 %v2027_v52, %v2021_v37  ;;  %v6801_v46 = vld [vmem:[%s8952_s2 + $0xf8] sm:$0xff]   ;;  %v6827_v37 = vld [vmem:[%s8952_s2 + $0x88] sm:$0xff]   ;;  %v6828_v15 = vld [vmem:[%s8952_s2 + $0x40] sm:$0xff]  }
 0x237   :  { %6143 = vmatprep.subr.bf16.mxu1 %v6801_v46  ;;  %v6829_v52 = vld [vmem:[%s8952_s2 + $0xc0] sm:$0xff]   ;;  %v3034_v46 = vld [vmem:[#allocation3 + $0x131] sm:$0xff] }
 0x238   :  { %v2008_v9 = vadd.f32 %v2007_v21, %v8049_v39  ;;  %v2022_v2 = vmul.f32 %v8049_v39, %v8049_v39  ;;  %v6830_v21 = vld [vmem:[%s8952_s2] sm:$0xff]  }
 0x23a   :  { %v2009_v50 = vrot.slane %v2008_v9, 4  ;;  %v2029_v55 = vadd.f32 %v2028_v41, %v2022_v2  ;;  %v6831_v41 = vld [vmem:[%s8952_s2 + $0x80] sm:$0xff]  }
 0x23b   :  { %v2352_v2 = vld [vmem:[#allocation3 + $0x2] sm:$0xff] }
 0x23c   :  { %v2010_v14 = vadd.f32 %v2009_v50, %v2008_v9  ;;  %v2030_v22 = vrot.slane %v2029_v55, 4  ;;  %v2304_v9 = vld [vmem:[#allocation3 + $0x1] sm:$0xff] }
 0x23d   :  { %v5801_v50 = vpack.c.bf16 %v2304_v9, %v2304_v9 }
 0x23e   :  { %v2011_v17 = vrot.slane %v2010_v14, 2  ;;  %v2031_v20 = vadd.f32 %v2030_v22, %v2029_v55  ;;  %v5809_v55 = vpack.c.bf16 %v2352_v2, %v2352_v2 }
 0x23f   :  { %2344 = vst [vmem:[#allocation5 + $0x4] sm:$0xf] %v5801_v50 }
 0x240   :  { %v2012_v5 = vadd.f32 %v2011_v17, %v2010_v14  ;;  %v2032_v35 = vrot.slane %v2031_v20, 2  ;;  %2392 = vst [vmem:[#allocation5 + $0x8] sm:$0xf] %v5809_v55  ;;  %v2600_v14 = vld [vmem:[#allocation3 + $0x91] sm:$0xff] }
 0x241   :  { %v5856_v22 = vpack.c.bf16 %v2600_v14, %v2600_v14  ;;  %v2648_v17 = vld [vmem:[#allocation3 + $0x92] sm:$0xff] }
 0x242   :  { %v2013_v42 = vrot.slane %v2012_v5, 1  ;;  %v2033_v34 = vadd.f32 %v2032_v35, %v2031_v20  ;;  %v5864_v20 = vpack.c.bf16 %v2648_v17, %v2648_v17 }
 0x243   :  { %2640 = vst [vmem:[#allocation5 + $0x118] sm:$0xf] %v5856_v22 }
 0x244   :  { %v2014_v0 = vadd.f32 %v2013_v42, %v2012_v5  ;;  %v2034_v36 = vrot.slane %v2033_v34, 1  ;;  %2688 = vst [vmem:[#allocation5 + $0x11c] sm:$0xf] %v5864_v20  ;;  %v6853_v42 = vld [vmem:[%s8952_s2 + $0x178] sm:$0xff]  }
 0x246   :  { %6542 = vmatmul.mubr.f32.vlgmr.msra.gmra.mxu0 %v2014_v0  ;;  %v2035_v26 = vadd.f32 %v2034_v36, %v2033_v34  ;;  %v2738_v34 = vld [vmem:[#allocation3 + $0xa1] sm:$0xff] }
 0x247   :  { %6080 = vmatpush3.bf16.msra.mxu0 %v6802_v40  ;;  %v5873_v0 = vpack.c.bf16 %v2738_v34, %v2738_v34  ;;  %v2786_v36 = vld [vmem:[#allocation3 + $0xa2] sm:$0xff] }
 0x248   :  { %6577 = vmatmul.mubr.f32.vlgmr.msra.gmra.mxu1 %v2035_v26  ;;  %6081 = vmatprep.subr.bf16.mxu0 %v6804_v18  ;;  %v5881_v26 = vpack.c.bf16 %v2786_v36, %v2786_v36 }
 0x249   :  { %6144 = vmatpush3.bf16.msra.mxu1 %v6803_v6  ;;  %2778 = vst [vmem:[#allocation5 + $0x124] sm:$0xf] %v5873_v0  ;;  %v5928_v6 = vpack.c.bf16 %v3034_v46, %v3034_v46 }
 0x24a   :  { %6145 = vmatprep.subr.bf16.mxu1 %v6805_v24  ;;  %2826 = vst [vmem:[#allocation5 + $0x128] sm:$0xf] %v5881_v26 }
 0x24b   :  { %6082 = vmatpush3.bf16.msra.mxu0 %v6806_v7  ;;  %3074 = vst [vmem:[#allocation5 + $0x238] sm:$0xf] %v5928_v6 }
 0x24c   :  { %6083 = vmatprep.subr.bf16.mxu0 %v6808_v53 }
 0x24d   :  { %6146 = vmatpush3.bf16.msra.mxu1 %v6807_v48 }
 0x24e   :  { %6147 = vmatprep.subr.bf16.mxu1 %v6809_v30  ;;  %v1937_v30 = vlaneseq }
 0x24f   :  { %6084 = vmatpush3.bf16.msra.mxu0 %v6810_v58 }
 0x250   :  { %6085 = vmatprep.subr.bf16.mxu0 %v6812_v60  ;;  %v1938_v58 = vshrl.u32 %v1937_v30, 7 }
 0x251   :  { %6148 = vmatpush3.bf16.msra.mxu1 %v6811_v25  ;;  %v3082_v25 = vld [vmem:[#allocation3 + $0x132] sm:$0xff] }
 0x252   :  { %6149 = vmatprep.subr.bf16.mxu1 %v6813_v32  ;;  %v5936_v60 = vpack.c.bf16 %v3082_v25, %v3082_v25  ;;  %v8158_v32 = vsub.s32 0, %v1938_v58 }
 0x253   :  { %6086 = vmatpush3.bf16.msra.mxu0 %v6814_v3 }
 0x254   :  { %6087 = vmatprep.subr.bf16.mxu0 %v6816_v44  ;;  %3122 = vst [vmem:[#allocation5 + $0x23c] sm:$0xf] %v5936_v60  ;;  %8995 = vst [vmem:[#allocation6_spill] sm:$0xff] %v8158_v32 }
 0x255   :  { %6150 = vmatpush3.bf16.msra.mxu1 %v6815_v43  ;;  %v8164_v43 = vld [vmem:[%s8953_s4] sm:$0x1] }
 0x256   :  { %6151 = vmatprep.subr.bf16.mxu1 %v6817_v49 }
 0x257   :  { %6088 = vmatpush3.bf16.msra.mxu0 %v6818_v51 }
 0x258   :  { %6089 = vmatprep.subr.bf16.mxu0 %v6820_v61 }
 0x259   :  { %6152 = vmatpush3.bf16.msra.mxu1 %v6819_v23 }
 0x25a   :  { %6153 = vmatprep.subr.bf16.mxu1 %v6821_v10 }
 0x25b   :  { %6090 = vmatpush3.bf16.msra.mxu0 %v6822_v59 }
 0x25c   :  { %6091 = vmatprep.subr.bf16.mxu0 %v6824_v8 }
 0x25d   :  { %6154 = vmatpush3.bf16.msra.mxu1 %v6823_v38 }
 0x25e   :  { %6155 = vmatprep.subr.bf16.mxu1 %v6825_v12 }
 0x25f   :  { %6092 = vmatpush3.bf16.msra.mxu0 %v6826_v28 }
 0x260   :  { %6093 = vmatprep.subr.bf16.mxu0 %v6828_v15 }
 0x261   :  { %6156 = vmatpush3.bf16.msra.mxu1 %v6827_v37 }
 0x262   :  { %6157 = vmatprep.subr.bf16.mxu1 %v6829_v52 }
 0x263   :  { %6094 = vmatpush3.bf16.msra.mxu0 %v6830_v21 }
 0x264   :  { %6207 = vmatprep.subr.bf16.mxu0 %v6853_v42 }
 0x265   :  { %6158 = vmatpush3.bf16.msra.mxu1 %v6831_v41 }
 0x266   :  { %6271 = vmatprep.subr.bf16.mxu1 %v6868_v4 }
 0x2a7   :  { %v1858_v5 = vpop.f32.mrf.mxu1 }
 0x2a8   :  { %v1932_v40 = vmul.f32 %v1858_v5, %v1858_v5  ;;  %v1940_v3 = vrot.slane %v1858_v5, %v8158_v32 }
 0x2a9   :  { %v6473_v35 = vpop.f32.mrf.mxu1 }
 0x2aa   :  { %v1941_v51 = vsub.f32 %v7897_v54, %v1940_v3  ;;  %v1942_v16 = vsub.f32 %v7894_v63, %v1940_v3  ;;  %v1943_v23 = vsub.f32 %v7899_v1, %v1940_v3  ;;  %v1944_v61 = vsub.f32 %v7904_v11, %v1940_v3  ;;  %v8179_v54 = vld [vmem:[%s8954_s5] ss:$0 sm:$0xff] }
 0x2ab   :  { %v1945_v59 = vsub.f32 %v7907_v57, %v1940_v3  ;;  %v1946_v38 = vsub.f32 %v7911_v45, %v1940_v3  ;;  %v1947_v8 = vsub.f32 %v7915_v13, %v1940_v3  ;;  %v1948_v12 = vsub.f32 %v7920_v19, %v1940_v3 }
 0x2c7   :  { %v1928_v18 = vpop.f32.mrf.mxu1 }
 0x2c8   :  { %v1933_v24 = vsub.f32 %v1928_v18, %v1932_v40 }
 0x2c9   :  { %v6508_v7 = vpop.f32.mrf.mxu1 }
 0x2ca   :  { %v1934_v48 = vmax.f32 %v1933_v24, 0.0 }
 0x2cc   :  { %v1935_v53 = vadd.f32 1e-05, %v1934_v48 }
 0x2ce   :  { %6962 = vrsqrt.f32 %v1935_v53 }
 0x2db   :  { %v6963_v44 = vpop.eup %6962 }
 0x2dc   :  { %v1950_v49 = vmul.f32 %v6963_v44, %v8164_v43 }
 0x2de   :  { %v1954_v10 = vrot.slane %v1950_v49, %v8158_v32 }
 0x2e0   :  { %v1955_v63 = vmul.f32 %v1954_v10, %v1941_v51  ;;  %v1956_v28 = vmul.f32 %v1954_v10, %v1942_v16  ;;  %v1957_v1 = vmul.f32 %v1954_v10, %v1943_v23  ;;  %v1958_v37 = vmul.f32 %v1954_v10, %v1944_v61 }
 0x2e1   :  { %v1959_v11 = vmul.f32 %v1954_v10, %v1945_v59  ;;  %v1960_v15 = vmul.f32 %v1954_v10, %v1946_v38  ;;  %v1961_v52 = vmul.f32 %v1954_v10, %v1947_v8  ;;  %v1962_v21 = vmul.f32 %v1954_v10, %v1948_v12 }
 0x2e2   :  { %v1970_v57 = vadd.f32 %v8179_v54, %v1955_v63  ;;  %v1971_v45 = vadd.f32 %v8179_v54, %v1956_v28  ;;  %v1972_v13 = vadd.f32 %v8179_v54, %v1957_v1  ;;  %v1973_v19 = vadd.f32 %v8179_v54, %v1958_v37 }
 0x2e3   :  { %v1974_v41 = vadd.f32 %v8179_v54, %v1959_v11  ;;  %v1975_v9 = vadd.f32 %v8179_v54, %v1960_v15  ;;  %v1976_v2 = vadd.f32 %v8179_v54, %v1961_v52  ;;  %v1977_v50 = vadd.f32 %v8179_v54, %v1962_v21 }
 0x2e4   :  { %vm1978_vm7 = vcmp.ge.f32.partialorder %v1970_v57, 0.0  ;;  %vm1979_vm8 = vcmp.ge.f32.partialorder %v1971_v45, 0.0  ;;  %vm1980_vm9 = vcmp.ge.f32.partialorder %v1972_v13, 0.0  ;;  %vm1981_vm10 = vcmp.ge.f32.partialorder %v1973_v19, 0.0 }
 0x2e5   :  { %vm1982_vm11 = vcmp.ge.f32.partialorder %v1974_v41, 0.0  ;;  %vm1983_vm12 = vcmp.ge.f32.partialorder %v1975_v9, 0.0  ;;  %vm1984_vm13 = vcmp.ge.f32.partialorder %v1976_v2, 0.0  ;;  %vm1985_vm14 = vcmp.ge.f32.partialorder %v1977_v50, 0.0 }
 0x2e6   :  { %v1986_v55 = vmul.f32 0.2, %v1970_v57  ;;  %v1987_v14 = vmul.f32 0.2, %v1971_v45  ;;  %v1988_v22 = vmul.f32 0.2, %v1972_v13 }
 0x2e7   :  { %v1989_v17 = vmul.f32 0.2, %v1973_v19  ;;  %v1990_v20 = vmul.f32 0.2, %v1974_v41  ;;  %v1991_v5 = vmul.f32 0.2, %v1975_v9 }
 0x2e8   :  { %v1992_v35 = vmul.f32 0.2, %v1976_v2  ;;  %v1993_v42 = vmul.f32 0.2, %v1977_v50  ;;  %v1994_v34 = vsel %vm1978_vm7, %v1970_v57, %v1986_v55  ;;  %v1995_v0 = vsel %vm1979_vm8, %v1971_v45, %v1987_v14 }
 0x2e9   :  { %v1996_v36 = vsel %vm1980_vm9, %v1972_v13, %v1988_v22  ;;  %v1997_v26 = vsel %vm1981_vm10, %v1973_v19, %v1989_v17  ;;  %v1998_v4 = vsel %vm1982_vm11, %v1974_v41, %v1990_v20  ;;  %v1999_v46 = vsel %vm1983_vm12, %v1975_v9, %v1991_v5  ;;  %2239 = vst [vmem:[#allocation3 + $0x11] sm:$0xff] %v1994_v34 }
 0x2ea   :  { %2240 = vst [vmem:[#allocation3 + $0x21] sm:$0xff] %v1995_v0  ;;  %v2000_v40 = vsel %vm1984_vm13, %v1976_v2, %v1992_v35  ;;  %v2001_v6 = vsel %vm1985_vm14, %v1977_v50, %v1993_v42  ;;  %2241 = vst [vmem:[#allocation3 + $0x31] sm:$0xff] %v1996_v36  ;;  %v5802_v18 = vpack.c.bf16 %v1994_v34, %v1994_v34 }
 0x2eb   :  { %2242 = vst [vmem:[#allocation3 + $0x41] sm:$0xff] %v1997_v26  ;;  %2243 = vst [vmem:[#allocation3 + $0x51] sm:$0xff] %v1998_v4  ;;  %v5803_v24 = vpack.c.bf16 %v1995_v0, %v1995_v0  ;;  %v5804_v7 = vpack.c.bf16 %v1996_v36, %v1996_v36  ;;  %v5805_v48 = vpack.c.bf16 %v1997_v26, %v1997_v26 }
 0x2ec   :  { %2244 = vst [vmem:[#allocation3 + $0x61] sm:$0xff] %v1999_v46  ;;  %2245 = vst [vmem:[#allocation3 + $0x71] sm:$0xff] %v2000_v40  ;;  %v5806_v53 = vpack.c.bf16 %v1998_v4, %v1998_v4  ;;  %v5807_v30 = vpack.c.bf16 %v1999_v46, %v1999_v46  ;;  %v5808_v58 = vpack.c.bf16 %v2000_v40, %v2000_v40 }
 0x2ed   :  { %2246 = vst [vmem:[#allocation3 + $0x81] sm:$0xff] %v2001_v6  ;;  %2345 = vst [vmem:[#allocation5 + $0x28] sm:$0xf] %v5802_v18  ;;  %v6854_v6 = vld [vmem:[%s8952_s2 + $0x138] sm:$0xff]  }
 0x2ee   :  { %2346 = vst [vmem:[#allocation5 + $0x4c] sm:$0xf] %v5803_v24  ;;  %2347 = vst [vmem:[#allocation5 + $0x70] sm:$0xf] %v5804_v7 }
 0x2ef   :  { %2348 = vst [vmem:[#allocation5 + $0x94] sm:$0xf] %v5805_v48  ;;  %2349 = vst [vmem:[#allocation5 + $0xb8] sm:$0xf] %v5806_v53 }
 0x2f0   :  { %2350 = vst [vmem:[#allocation5 + $0xdc] sm:$0xf] %v5807_v30  ;;  %2351 = vst [vmem:[#allocation5 + $0x100] sm:$0xf] %v5808_v58  ;;  %v2257_v25 = vld [vmem:[#allocation3 + $0x10] sm:$0xff] }
 0x2f1   :  { %v2353_v60 = vld [vmem:[#allocation3 + $0x12] sm:$0xff]  ;;  %v2401_v3 = vld [vmem:[#allocation3 + $0x20] sm:$0xff]  ;;  %v5794_v44 = vpack.c.bf16 %v2257_v25, %v2257_v25 }
 0x2f2   :  { %v5810_v49 = vpack.c.bf16 %v2353_v60, %v2353_v60  ;;  %v5818_v51 = vpack.c.bf16 %v2401_v3, %v2401_v3  ;;  %v2259_v16 = vld [vmem:[#allocation3 + $0x30] sm:$0xff]  ;;  %v2354_v23 = vld [vmem:[#allocation3 + $0x22] sm:$0xff] }
 0x2f3   :  { %v2355_v61 = vld [vmem:[#allocation3 + $0x32] sm:$0xff]  ;;  %v5796_v10 = vpack.c.bf16 %v2259_v16, %v2259_v16  ;;  %v5811_v59 = vpack.c.bf16 %v2354_v23, %v2354_v23  ;;  %v2403_v8 = vld [vmem:[#allocation3 + $0x40] sm:$0xff]  ;;  %2297 = vst [vmem:[#allocation5 + $0x24] sm:$0xf] %v5794_v44  ;;  %2440 = vst [vmem:[#allocation5 + $0xc] sm:$0xf] %v5794_v44 }
 0x2f4   :  { %v5812_v38 = vpack.c.bf16 %v2355_v61, %v2355_v61  ;;  %v2261_v12 = vld [vmem:[#allocation3 + $0x50] sm:$0xff]  ;;  %v2356_v63 = vld [vmem:[#allocation3 + $0x42] sm:$0xff]  ;;  %2393 = vst [vmem:[#allocation5 + $0x2c] sm:$0xf] %v5810_v49  ;;  %2441 = vst [vmem:[#allocation5 + $0x30] sm:$0xf] %v5818_v51  ;;  %v5820_v28 = vpack.c.bf16 %v2403_v8, %v2403_v8 }
 0x2f5   :  { %2298 = vst [vmem:[#allocation5 + $0x48] sm:$0xf] %v5818_v51  ;;  %v5798_v1 = vpack.c.bf16 %v2261_v12, %v2261_v12  ;;  %v2357_v37 = vld [vmem:[#allocation3 + $0x52] sm:$0xff]  ;;  %v5813_v11 = vpack.c.bf16 %v2356_v63, %v2356_v63  ;;  %v2405_v15 = vld [vmem:[#allocation3 + $0x60] sm:$0xff]  ;;  %2536 = vst [vmem:[#allocation5 + $0x14] sm:$0xf] %v5810_v49 }
 0x2f6   :  { %v2263_v52 = vld [vmem:[#allocation3 + $0x70] sm:$0xff]  ;;  %2585 = vst [vmem:[#allocation5 + $0x18] sm:$0xf] %v5818_v51  ;;  %2299 = vst [vmem:[#allocation5 + $0x6c] sm:$0xf] %v5796_v10  ;;  %v5814_v21 = vpack.c.bf16 %v2357_v37, %v2357_v37  ;;  %v5822_v57 = vpack.c.bf16 %v2405_v15, %v2405_v15  ;;  %v2358_v13 = vld [vmem:[#allocation3 + $0x62] sm:$0xff] }
 0x2f7   :  { %2394 = vst [vmem:[#allocation5 + $0x50] sm:$0xf] %v5811_v59  ;;  %2395 = vst [vmem:[#allocation5 + $0x74] sm:$0xf] %v5812_v38  ;;  %v5800_v45 = vpack.c.bf16 %v2263_v52, %v2263_v52  ;;  %v2359_v19 = vld [vmem:[#allocation3 + $0x72] sm:$0xff]  ;;  %v2407_v41 = vld [vmem:[#allocation3 + $0x80] sm:$0xff]  ;;  %v5815_v9 = vpack.c.bf16 %v2358_v13, %v2358_v13 }
 0x2f8   :  { %2442 = vst [vmem:[#allocation5 + $0x54] sm:$0xf] %v5796_v10  ;;  %2537 = vst [vmem:[#allocation5 + $0x38] sm:$0xf] %v5811_v59  ;;  %v5816_v2 = vpack.c.bf16 %v2359_v19, %v2359_v19  ;;  %v5824_v50 = vpack.c.bf16 %v2407_v41, %v2407_v41  ;;  %v2448_v55 = vld [vmem:[#allocation3 + $0x11] sm:$0xff]  ;;  %v2449_v14 = vld [vmem:[#allocation3 + $0x21] sm:$0xff] }
 0x2f9   :  { %2586 = vst [vmem:[#allocation5 + $0x3c] sm:$0xf] %v5796_v10  ;;  %2538 = vst [vmem:[#allocation5 + $0x5c] sm:$0xf] %v5812_v38  ;;  %v2594_v22 = vld [vmem:[#allocation3 + $0x31] sm:$0xff]  ;;  %v5825_v17 = vpack.c.bf16 %v2448_v55, %v2448_v55  ;;  %v5826_v20 = vpack.c.bf16 %v2449_v14, %v2449_v14  ;;  %v2451_v35 = vld [vmem:[#allocation3 + $0x41] sm:$0xff] }
 0x2fa   :  { %2443 = vst [vmem:[#allocation5 + $0x78] sm:$0xf] %v5820_v28  ;;  %2300 = vst [vmem:[#allocation5 + $0x90] sm:$0xf] %v5820_v28  ;;  %v5850_v5 = vpack.c.bf16 %v2594_v22, %v2594_v22  ;;  %v2596_v42 = vld [vmem:[#allocation3 + $0x51] sm:$0xff]  ;;  %v2453_v34 = vld [vmem:[#allocation3 + $0x61] sm:$0xff]  ;;  %v5828_v0 = vpack.c.bf16 %v2451_v35, %v2451_v35 }
 0x2fb   :  { %2301 = vst [vmem:[#allocation5 + $0xb4] sm:$0xf] %v5798_v1  ;;  %2396 = vst [vmem:[#allocation5 + $0x98] sm:$0xf] %v5813_v11  ;;  %v5852_v36 = vpack.c.bf16 %v2596_v42, %v2596_v42  ;;  %v5830_v26 = vpack.c.bf16 %v2453_v34, %v2453_v34  ;;  %v2598_v4 = vld [vmem:[#allocation3 + $0x71] sm:$0xff]  ;;  %v2455_v46 = vld [vmem:[#allocation3 + $0x81] sm:$0xff] }
 0x2fc   :  { %2444 = vst [vmem:[#allocation5 + $0x9c] sm:$0xf] %v5798_v1  ;;  %2539 = vst [vmem:[#allocation5 + $0x80] sm:$0xf] %v5813_v11  ;;  %v2503_v40 = vld [vmem:[#allocation3 + $0x82] sm:$0xff]  ;;  %v5854_v18 = vpack.c.bf16 %v2598_v4, %v2598_v4  ;;  %v5832_v24 = vpack.c.bf16 %v2455_v46, %v2455_v46  ;;  %v2642_v53 = vld [vmem:[#allocation3 + $0x32] sm:$0xff] }
 0x2fd   :  { %2587 = vst [vmem:[#allocation5 + $0x60] sm:$0xf] %v5820_v28  ;;  %2588 = vst [vmem:[#allocation5 + $0x84] sm:$0xf] %v5798_v1  ;;  %v5840_v7 = vpack.c.bf16 %v2503_v40, %v2503_v40  ;;  %v2641_v48 = vld [vmem:[#allocation3 + $0x22] sm:$0xff]  ;;  %v5858_v58 = vpack.c.bf16 %v2642_v53, %v2642_v53  ;;  %v2644_v60 = vld [vmem:[#allocation3 + $0x52] sm:$0xff] }
 0x2fe   :  { %2397 = vst [vmem:[#allocation5 + $0xbc] sm:$0xf] %v5814_v21  ;;  %2445 = vst [vmem:[#allocation5 + $0xc0] sm:$0xf] %v5822_v57  ;;  %v5857_v30 = vpack.c.bf16 %v2641_v48, %v2641_v48  ;;  %v2643_v25 = vld [vmem:[#allocation3 + $0x42] sm:$0xff]  ;;  %v5860_v16 = vpack.c.bf16 %v2644_v60, %v2644_v60  ;;  %v6855_v59 = vld [vmem:[%s8952_s2 + $0x170] sm:$0xff]  }
 0x2ff   :  { %2302 = vst [vmem:[#allocation5 + $0xd8] sm:$0xf] %v5822_v57  ;;  %2303 = vst [vmem:[#allocation5 + $0xfc] sm:$0xf] %v5800_v45  ;;  %v2645_v3 = vld [vmem:[#allocation3 + $0x62] sm:$0xff]  ;;  %v5859_v51 = vpack.c.bf16 %v2643_v25, %v2643_v25  ;;  %v6873_v38 = vld [vmem:[%s8952_s2 + $0x1b8] sm:$0xff]  }
 0x300   :  { %2446 = vst [vmem:[#allocation5 + $0xe4] sm:$0xf] %v5800_v45  ;;  %2540 = vst [vmem:[#allocation5 + $0xa4] sm:$0xf] %v5814_v21  ;;  %v6832_v44 = vld [vmem:[#allocation5] ss:$36 sps:$4 sm:$0xff]   ;;  %v5861_v23 = vpack.c.bf16 %v2645_v3, %v2645_v3 }
 0x301   :  { %2589 = vst [vmem:[#allocation5 + $0xa8] sm:$0xf] %v5822_v57  ;;  %2590 = vst [vmem:[#allocation5 + $0xcc] sm:$0xf] %v5800_v45  ;;  %v6834_v49 = vld [vmem:[#allocation5 + $0x4] ss:$36 sps:$4 sm:$0xff]  }
 0x302   :  { %2398 = vst [vmem:[#allocation5 + $0xe0] sm:$0xf] %v5815_v9  ;;  %2399 = vst [vmem:[#allocation5 + $0x104] sm:$0xf] %v5816_v2  ;;  %v6835_v61 = vld [vmem:[#allocation5 + $0x8] ss:$36 sps:$4 sm:$0xff]   ;;  %4186 = vmatprep.mubr.bf16.mxu0 %v6834_v49 }
 0x303   :  { %2447 = vst [vmem:[#allocation5 + $0x108] sm:$0xf] %v5824_v50  ;;  %2541 = vst [vmem:[#allocation5 + $0xc8] sm:$0xf] %v5815_v9  ;;  %v6837_v10 = vld [vmem:[#allocation5 + $0xc] ss:$36 sps:$4 sm:$0xff]   ;;  %4187 = vmatmul.mubr.bf16.vlgmr.msra.gmra.mxu0 %v6832_v44 }
 0x304   :  { %2542 = vst [vmem:[#allocation5 + $0xec] sm:$0xf] %v5816_v2  ;;  %2591 = vst [vmem:[#allocation5 + $0xf0] sm:$0xf] %v5824_v50  ;;  %v6838_v8 = vld [vmem:[#allocation5 + $0x4c] ss:$36 sps:$4 sm:$0xff]   ;;  %4283 = vmatprep.mubr.bf16.mxu1 %v6837_v10  ;;  %6208 = vmatpush3.bf16.msra.mxu0 %v6854_v6 }
 0x305   :  { %2488 = vst [vmem:[#allocation5 + $0x10] sm:$0xf] %v5825_v17  ;;  %2489 = vst [vmem:[#allocation5 + $0x34] sm:$0xf] %v5826_v20  ;;  %v6840_v12 = vld [vmem:[#allocation5 + $0x54] ss:$36 sps:$4 sm:$0xff]   ;;  %4284 = vmatmul.mubr.bf16.vlgmr.msra.gmra.mxu1 %v6835_v61  ;;  %4194 = vmatprep.mubr.bf16.mxu0 %v6838_v8 }
 0x306   :  { %2633 = vst [vmem:[#allocation5 + $0x1c] sm:$0xf] %v5826_v20  ;;  %2634 = vst [vmem:[#allocation5 + $0x40] sm:$0xf] %v5850_v5  ;;  %v6856_v63 = vld [vmem:[%s8952_s2 + $0x130] sm:$0xff]   ;;  %v6857_v1 = vld [vmem:[%s8952_s2 + $0x168] sm:$0xff]   ;;  %4291 = vmatprep.mubr.bf16.mxu1 %v6840_v12  ;;  %6209 = vmatprep.subr.bf16.mxu0 %v6855_v59  ;;  %v8233_v50 = vpop.f32.mrf.mxu0 }
 0x307   :  { %2490 = vst [vmem:[#allocation5 + $0x58] sm:$0xf] %v5850_v5  ;;  %2491 = vst [vmem:[#allocation5 + $0x7c] sm:$0xf] %v5828_v0  ;;  %v6874_v28 = vld [vmem:[%s8952_s2 + $0x1f0] sm:$0xff]   ;;  %v3133_v37 = vld [vmem:[#allocation5 + $0x48] sm:$0xff]  ;;  %6272 = vmatpush3.bf16.msra.mxu1 %v6873_v38  ;;  %v2176_v17 = vmul.f32 %v8233_v50, %v8233_v50 }
 0x308   :  { %2635 = vst [vmem:[#allocation5 + $0x64] sm:$0xf] %v5828_v0  ;;  %2636 = vst [vmem:[#allocation5 + $0x88] sm:$0xf] %v5852_v36  ;;  %v3138_v11 = vld [vmem:[#allocation5 + $0x6c] sm:$0xff]  ;;  %6210 = vmatpush3.bf16.msra.mxu0 %v6856_v63  ;;  %6273 = vmatprep.subr.bf16.mxu1 %v6874_v28  ;;  %v6859_v57 = vld [vmem:[%s8952_s2 + $0x160] sm:$0xff]   ;;  %v6543_v5 = vpop.f32.mrf.mxu0  ;;  %v2172_v35 = vpop.f32.mrf.mxu1  ;;  %v2184_v28 = vrot.slane %v8233_v50, %v8158_v32 }
 0x309   :  { %2492 = vst [vmem:[#allocation5 + $0xa0] sm:$0xf] %v5852_v36  ;;  %2493 = vst [vmem:[#allocation5 + $0xc4] sm:$0xf] %v5830_v26  ;;  %v6875_v15 = vld [vmem:[%s8952_s2 + $0x1b0] sm:$0xff]   ;;  %v6858_v52 = vld [vmem:[%s8952_s2 + $0x128] sm:$0xff]   ;;  %v5513_v21 = vcombine.low %v3133_v37, %v3138_v11  ;;  %6211 = vmatprep.subr.bf16.mxu0 %v6857_v1  ;;  %v2177_v4 = vsub.f32 %v2172_v35, %v2176_v17 }
 0x30a   :  { %2637 = vst [vmem:[#allocation5 + $0xac] sm:$0xf] %v5830_v26  ;;  %2638 = vst [vmem:[#allocation5 + $0xd0] sm:$0xf] %v5854_v18  ;;  %v6843_v45 = vld [vmem:[#allocation5 + $0x94] ss:$36 sps:$4 sm:$0xff]   ;;  %v6578_v0 = vpop.f32.mrf.mxu1 }
 0x30b   :  { %2494 = vst [vmem:[#allocation5 + $0xe8] sm:$0xf] %v5854_v18  ;;  %2495 = vst [vmem:[#allocation5 + $0x10c] sm:$0xf] %v5832_v24  ;;  %v6879_v13 = vld [vmem:[%s8952_s2 + $0x1e8] sm:$0xff]   ;;  %4195 = vmatmul.mubr.bf16.gmra.mxu0 %v5513_v21  ;;  %6274 = vmatpush3.bf16.msra.mxu1 %v6875_v15  ;;  %v6860_v2 = vld [vmem:[%s8952_s2 + $0x120] sm:$0xff]   ;;  %v2185_v15 = vsub.f32 %v8012_v29, %v2184_v28  ;;  %v2187_v21 = vsub.f32 %v8014_v31, %v2184_v28 }
 0x30c   :  { %2543 = vst [vmem:[#allocation5 + $0x110] sm:$0xf] %v5840_v7  ;;  %2639 = vst [vmem:[#allocation5 + $0xf4] sm:$0xf] %v5832_v24  ;;  %v6842_v19 = vld [vmem:[#allocation5 + $0x50] ss:$36 sps:$4 sm:$0xff]   ;;  %4202 = vmatprep.mubr.bf16.mxu0 %v6843_v45  ;;  %6212 = vmatpush3.bf16.msra.mxu0 %v6858_v52  ;;  %v2186_v52 = vsub.f32 %v8008_v62, %v2184_v28 }
 0x30d   :  { %2687 = vst [vmem:[#allocation5 + $0xf8] sm:$0xf] %v5840_v7  ;;  %2681 = vst [vmem:[#allocation5 + $0x20] sm:$0xf] %v5857_v30  ;;  %v6884_v41 = vld [vmem:[%s8952_s2 + $0x1a8] sm:$0xff]   ;;  %4292 = vmatmul.mubr.bf16.gmra.mxu1 %v6842_v19  ;;  %6213 = vmatprep.subr.bf16.mxu0 %v6859_v57  ;;  %v6865_v55 = vld [vmem:[%s8952_s2 + $0x158] sm:$0xff]   ;;  %v2188_v57 = vsub.f32 %v8019_v47, %v2184_v28  ;;  %v2190_v19 = vsub.f32 %v8033_v33, %v2184_v28 }
 0x30e   :  { %2682 = vst [vmem:[#allocation5 + $0x44] sm:$0xf] %v5858_v58  ;;  %2683 = vst [vmem:[#allocation5 + $0x68] sm:$0xf] %v5859_v51  ;;  %v6845_v9 = vld [vmem:[#allocation5 + $0x9c] ss:$36 sps:$4 sm:$0xff]   ;;  %6275 = vmatprep.subr.bf16.mxu1 %v6879_v13  ;;  %v2189_v13 = vsub.f32 %v8028_v27, %v2184_v28 }
 0x30f   :  { %2684 = vst [vmem:[#allocation5 + $0x8c] sm:$0xf] %v5860_v16  ;;  %2685 = vst [vmem:[#allocation5 + $0xb0] sm:$0xf] %v5861_v23  ;;  %v3143_v14 = vld [vmem:[#allocation5 + $0x90] sm:$0xff]  ;;  %4299 = vmatprep.mubr.bf16.mxu1 %v6845_v9  ;;  %v6885_v20 = vld [vmem:[%s8952_s2 + $0x1e0] sm:$0xff]   ;;  %6276 = vmatpush3.bf16.msra.mxu1 %v6884_v41  ;;  %v2191_v41 = vsub.f32 %v8042_v56, %v2184_v28  ;;  %v2192_v9 = vsub.f32 %v8049_v39, %v2184_v28 }
 0x310   :  { %v3148_v22 = vld [vmem:[#allocation5 + $0xb4] sm:$0xff]  ;;  %v6886_v42 = vld [vmem:[%s8952_s2 + $0x1a0] sm:$0xff]   ;;  %6214 = vmatpush3.bf16.msra.mxu0 %v6860_v2  ;;  %6277 = vmatprep.subr.bf16.mxu1 %v6885_v20  ;;  %v6887_v7 = vld [vmem:[%s8952_s2 + $0x148] sm:$0xff]   ;;  %v2178_v53 = vmax.f32 %v2177_v4, 0.0 }
 0x311   :  { %v6867_v34 = vld [vmem:[%s8952_s2 + $0x118] sm:$0xff]   ;;  %v5522_v36 = vcombine.low %v3143_v14, %v3148_v22  ;;  %6215 = vmatprep.subr.bf16.mxu0 %v6865_v55  ;;  %v6876_v26 = vld [vmem:[%s8952_s2 + $0x150] sm:$0xff]   ;;  %v6850_v58 = vld [vmem:[#allocation5 + $0xe4] ss:$36 sps:$4 sm:$0xff]  }
 0x312   :  { %v6848_v46 = vld [vmem:[#allocation5 + $0xdc] ss:$36 sps:$4 sm:$0xff]   ;;  %v6878_v40 = vld [vmem:[%s8952_s2 + $0x110] sm:$0xff]   ;;  %v2179_v44 = vadd.f32 1e-05, %v2178_v53  ;;  %v6889_v51 = vld [vmem:[%s8952_s2 + $0x108] sm:$0xff]  }
 0x313   :  { %v6890_v6 = vld [vmem:[%s8952_s2 + $0x1d8] sm:$0xff]   ;;  %4203 = vmatmul.mubr.bf16.gmra.mxu0 %v5522_v36  ;;  %6278 = vmatpush3.bf16.msra.mxu1 %v6886_v42  ;;  %v6896_v48 = vld [vmem:[%s8952_s2 + $0x1d0] sm:$0xff]   ;;  %v6901_v16 = vld [vmem:[%s8952_s2 + $0x1c8] sm:$0xff]  }
 0x314   :  { %v6895_v18 = vld [vmem:[%s8952_s2 + $0x198] sm:$0xff]   ;;  %4210 = vmatprep.mubr.bf16.mxu0 %v6848_v46  ;;  %6216 = vmatpush3.bf16.msra.mxu0 %v6867_v34  ;;  %v6897_v49 = vld [vmem:[%s8952_s2 + $0x190] sm:$0xff]   ;;  %6964 = vrsqrt.f32 %v2179_v44  ;;  %v6898_v61 = vld [vmem:[%s8952_s2 + $0x140] sm:$0xff]  }
 0x315   :  { %v6847_v24 = vld [vmem:[#allocation5 + $0x98] ss:$36 sps:$4 sm:$0xff]   ;;  %6217 = vmatprep.subr.bf16.mxu0 %v6876_v26  ;;  %6279 = vmatprep.subr.bf16.mxu1 %v6890_v6  ;;  %v6852_v10 = vld [vmem:[#allocation5 + $0xe0] ss:$36 sps:$4 sm:$0xff]   ;;  %v6905_v59 = vld [vmem:[%s8952_s2 + $0x188] sm:$0xff]  }
 0x316   :  { %v3153_v30 = vld [vmem:[#allocation5 + $0xd8] sm:$0xff]  ;;  %4300 = vmatmul.mubr.bf16.gmra.mxu1 %v6847_v24  ;;  %v6900_v38 = vld [vmem:[%s8952_s2 + $0x100] sm:$0xff]  }
 0x317   :  { %v2646_v25 = vld [vmem:[#allocation3 + $0x72] sm:$0xff]  ;;  %v3158_v60 = vld [vmem:[#allocation5 + $0xfc] sm:$0xff]  ;;  %4307 = vmatprep.mubr.bf16.mxu1 %v6850_v58  ;;  %6280 = vmatpush3.bf16.msra.mxu1 %v6895_v18 }
 0x318   :  { %v5862_v3 = vpack.c.bf16 %v2646_v25, %v2646_v25  ;;  %6218 = vmatpush3.bf16.msra.mxu0 %v6878_v40  ;;  %6281 = vmatprep.subr.bf16.mxu1 %v6896_v48  ;;  %v5531_v23 = vcombine.low %v3153_v30, %v3158_v60  ;;  %v6909_v8 = vld [vmem:[%s8952_s2 + $0x1c0] sm:$0xff]   ;;  %v8291_v12 = vld [vmem:[%s8952_s2 + $0x238] sm:$0xff]  }
 0x319   :  { %6219 = vmatprep.subr.bf16.mxu0 %v6887_v7  ;;  %v6910_v63 = vld [vmem:[%s8952_s2 + $0x180] sm:$0xff]  }
 0x31a   :  { %2686 = vst [vmem:[#allocation5 + $0xd4] sm:$0xf] %v5862_v3  ;;  %v8299_v1 = vld [vmem:[#allocation3] sm:$0xff] }
 0x31b   :  { %4211 = vmatmul.mubr.bf16.gmra.mxu0 %v5531_v23  ;;  %6282 = vmatpush3.bf16.msra.mxu1 %v6897_v49 }
 0x31c   :  { %6220 = vmatpush3.bf16.msra.mxu0 %v6889_v51  ;;  %6283 = vmatprep.subr.bf16.mxu1 %v6901_v16 }
 0x31d   :  { %6221 = vmatprep.subr.bf16.mxu0 %v6898_v61 }
 0x31e   :  { %4308 = vmatmul.mubr.bf16.gmra.mxu1 %v6852_v10 }
 0x31f   :  { %6284 = vmatpush3.bf16.msra.mxu1 %v6905_v59 }
 0x320   :  { %6222 = vmatpush3.bf16.msra.mxu0 %v6900_v38  ;;  %6285 = vmatprep.subr.bf16.mxu1 %v6909_v8 }
 0x321   :  { %6579 = vmatprep.subr.bf16.mxu0 %v8291_v12  ;;  %v6965_v37 = vpop.eup %6964 }
 0x322   :  { %v2193_v11 = vmul.f32 %v6965_v37, %v8164_v43 }
 0x323   :  { %6286 = vmatpush3.bf16.msra.mxu1 %v6910_v63 }
 0x324   :  { %6611 = vmatprep.subr.mxu1 %v8299_v1  ;;  %v2197_v45 = vrot.slane %v2193_v11, %v8158_v32 }
 0x326   :  { %v2198_v2 = vmul.f32 %v2197_v45, %v2185_v15  ;;  %v2199_v43 = vmul.f32 %v2197_v45, %v2186_v52  ;;  %v2200_v50 = vmul.f32 %v2197_v45, %v2187_v21  ;;  %v2201_v29 = vmul.f32 %v2197_v45, %v2188_v57 }
 0x327   :  { %v2202_v55 = vmul.f32 %v2197_v45, %v2189_v13  ;;  %v2203_v62 = vmul.f32 %v2197_v45, %v2190_v19  ;;  %v2204_v14 = vmul.f32 %v2197_v45, %v2191_v41  ;;  %v2205_v31 = vmul.f32 %v2197_v45, %v2192_v9 }
 0x328   :  { %v2206_v47 = vadd.f32 %v8179_v54, %v2198_v2  ;;  %v2207_v22 = vadd.f32 %v8179_v54, %v2199_v43  ;;  %v2208_v27 = vadd.f32 %v8179_v54, %v2200_v50  ;;  %v2209_v33 = vadd.f32 %v8179_v54, %v2201_v29 }
 0x329   :  { %v2210_v56 = vadd.f32 %v8179_v54, %v2202_v55  ;;  %v2211_v39 = vadd.f32 %v8179_v54, %v2203_v62  ;;  %v2212_v17 = vadd.f32 %v8179_v54, %v2204_v14  ;;  %v2213_v20 = vadd.f32 %v8179_v54, %v2205_v31 }
 0x32a   :  { %vm2214_vm15 = vcmp.ge.f32.partialorder %v2206_v47, 0.0  ;;  %vm2215_vm0 = vcmp.ge.f32.partialorder %v2207_v22, 0.0  ;;  %vm2216_vm1 = vcmp.ge.f32.partialorder %v2208_v27, 0.0  ;;  %vm2217_vm2 = vcmp.ge.f32.partialorder %v2209_v33, 0.0 }
 0x32b   :  { %vm2218_vm3 = vcmp.ge.f32.partialorder %v2210_v56, 0.0  ;;  %vm2219_vm4 = vcmp.ge.f32.partialorder %v2211_v39, 0.0  ;;  %vm2220_vm5 = vcmp.ge.f32.partialorder %v2212_v17, 0.0  ;;  %vm2221_vm7 = vcmp.ge.f32.partialorder %v2213_v20, 0.0 }
 0x32c   :  { %v2222_v5 = vmul.f32 0.2, %v2206_v47  ;;  %v2223_v35 = vmul.f32 0.2, %v2207_v22  ;;  %v2224_v42 = vmul.f32 0.2, %v2208_v27 }
 0x32d   :  { %v2225_v34 = vmul.f32 0.2, %v2209_v33  ;;  %v2226_v0 = vmul.f32 0.2, %v2210_v56  ;;  %v2227_v36 = vmul.f32 0.2, %v2211_v39 }
 0x32e   :  { %v2228_v26 = vmul.f32 0.2, %v2212_v17  ;;  %v2229_v4 = vmul.f32 0.2, %v2213_v20  ;;  %v2230_v46 = vsel %vm2214_vm15, %v2206_v47, %v2222_v5  ;;  %v2231_v54 = vsel %vm2215_vm0, %v2207_v22, %v2223_v35 }
 0x32f   :  { %v2232_v40 = vsel %vm2216_vm1, %v2208_v27, %v2224_v42  ;;  %v2233_v6 = vsel %vm2217_vm2, %v2209_v33, %v2225_v34  ;;  %v2234_v18 = vsel %vm2218_vm3, %v2210_v56, %v2226_v0  ;;  %v2235_v24 = vsel %vm2219_vm4, %v2211_v39, %v2227_v36  ;;  %2248 = vst [vmem:[#allocation3 + $0xb1] sm:$0xff] %v2230_v46 }
 0x330   :  { %2249 = vst [vmem:[#allocation3 + $0xc1] sm:$0xff] %v2231_v54  ;;  %v2236_v7 = vsel %vm2220_vm5, %v2212_v17, %v2228_v26  ;;  %v2237_v48 = vsel %vm2221_vm7, %v2213_v20, %v2229_v4  ;;  %2250 = vst [vmem:[#allocation3 + $0xd1] sm:$0xff] %v2232_v40  ;;  %v5874_v53 = vpack.c.bf16 %v2230_v46, %v2230_v46  ;;  %v3163_v4 = vld [vmem:[#allocation5 + $0x120] sm:$0xff] }
 0x331   :  { %2251 = vst [vmem:[#allocation3 + $0xe1] sm:$0xff] %v2233_v6  ;;  %2252 = vst [vmem:[#allocation3 + $0xf1] sm:$0xff] %v2234_v18  ;;  %v5875_v30 = vpack.c.bf16 %v2231_v54, %v2231_v54  ;;  %v5876_v58 = vpack.c.bf16 %v2232_v40, %v2232_v40  ;;  %v5877_v25 = vpack.c.bf16 %v2233_v6, %v2233_v6 }
 0x332   :  { %2253 = vst [vmem:[#allocation3 + $0x101] sm:$0xff] %v2235_v24  ;;  %2254 = vst [vmem:[#allocation3 + $0x111] sm:$0xff] %v2236_v7  ;;  %v5878_v60 = vpack.c.bf16 %v2234_v18, %v2234_v18  ;;  %v5879_v3 = vpack.c.bf16 %v2235_v24, %v2235_v24  ;;  %v5880_v44 = vpack.c.bf16 %v2236_v7, %v2236_v7 }
 0x333   :  { %2255 = vst [vmem:[#allocation3 + $0x121] sm:$0xff] %v2237_v48  ;;  %2779 = vst [vmem:[#allocation5 + $0x148] sm:$0xf] %v5874_v53 }
 0x334   :  { %2780 = vst [vmem:[#allocation5 + $0x16c] sm:$0xf] %v5875_v30  ;;  %2922 = vst [vmem:[#allocation5 + $0x130] sm:$0xf] %v5874_v53 }
 0x335   :  { %2923 = vst [vmem:[#allocation5 + $0x154] sm:$0xf] %v5875_v30  ;;  %3067 = vst [vmem:[#allocation5 + $0x13c] sm:$0xf] %v5875_v30 }
 0x336   :  { %2781 = vst [vmem:[#allocation5 + $0x190] sm:$0xf] %v5876_v58  ;;  %2782 = vst [vmem:[#allocation5 + $0x1b4] sm:$0xf] %v5877_v25  ;;  %v2691_v49 = vld [vmem:[#allocation3 + $0xb0] sm:$0xff] }
 0x337   :  { %2783 = vst [vmem:[#allocation5 + $0x1d8] sm:$0xf] %v5878_v60  ;;  %2784 = vst [vmem:[#allocation5 + $0x1fc] sm:$0xf] %v5879_v3  ;;  %v2787_v51 = vld [vmem:[#allocation3 + $0xb2] sm:$0xff]  ;;  %v2835_v16 = vld [vmem:[#allocation3 + $0xc0] sm:$0xff]  ;;  %v5866_v23 = vpack.c.bf16 %v2691_v49, %v2691_v49 }
 0x338   :  { %3068 = vst [vmem:[#allocation5 + $0x160] sm:$0xf] %v5876_v58  ;;  %2785 = vst [vmem:[#allocation5 + $0x220] sm:$0xf] %v5880_v44  ;;  %v5882_v61 = vpack.c.bf16 %v2787_v51, %v2787_v51  ;;  %v5890_v10 = vpack.c.bf16 %v2835_v16, %v2835_v16  ;;  %v2693_v59 = vld [vmem:[#allocation3 + $0xd0] sm:$0xff]  ;;  %v2788_v38 = vld [vmem:[#allocation3 + $0xc2] sm:$0xff] }
 0x339   :  { %v2789_v8 = vld [vmem:[#allocation3 + $0xd2] sm:$0xff]  ;;  %v5868_v63 = vpack.c.bf16 %v2693_v59, %v2693_v59  ;;  %v5883_v28 = vpack.c.bf16 %v2788_v38, %v2788_v38  ;;  %v2837_v11 = vld [vmem:[#allocation3 + $0xe0] sm:$0xff]  ;;  %2731 = vst [vmem:[#allocation5 + $0x144] sm:$0xf] %v5866_v23  ;;  %2874 = vst [vmem:[#allocation5 + $0x12c] sm:$0xf] %v5866_v23 }
 0x33a   :  { %v5884_v37 = vpack.c.bf16 %v2789_v8, %v2789_v8  ;;  %v2695_v15 = vld [vmem:[#allocation3 + $0xf0] sm:$0xff]  ;;  %v2790_v52 = vld [vmem:[#allocation3 + $0xe2] sm:$0xff]  ;;  %2827 = vst [vmem:[#allocation5 + $0x14c] sm:$0xf] %v5882_v61  ;;  %2875 = vst [vmem:[#allocation5 + $0x150] sm:$0xf] %v5890_v10  ;;  %v5892_v21 = vpack.c.bf16 %v2837_v11, %v2837_v11 }
 0x33b   :  { %2732 = vst [vmem:[#allocation5 + $0x168] sm:$0xf] %v5890_v10  ;;  %v5870_v57 = vpack.c.bf16 %v2695_v15, %v2695_v15  ;;  %v2791_v45 = vld [vmem:[#allocation3 + $0xf2] sm:$0xff]  ;;  %v5885_v13 = vpack.c.bf16 %v2790_v52, %v2790_v52  ;;  %v2839_v19 = vld [vmem:[#allocation3 + $0x100] sm:$0xff]  ;;  %2970 = vst [vmem:[#allocation5 + $0x134] sm:$0xf] %v5882_v61 }
 0x33c   :  { %v2697_v41 = vld [vmem:[#allocation3 + $0x110] sm:$0xff]  ;;  %3019 = vst [vmem:[#allocation5 + $0x138] sm:$0xf] %v5890_v10  ;;  %2733 = vst [vmem:[#allocation5 + $0x18c] sm:$0xf] %v5868_v63  ;;  %v5886_v9 = vpack.c.bf16 %v2791_v45, %v2791_v45  ;;  %v5894_v2 = vpack.c.bf16 %v2839_v19, %v2839_v19  ;;  %v2792_v50 = vld [vmem:[#allocation3 + $0x102] sm:$0xff] }
 0x33d   :  { %2828 = vst [vmem:[#allocation5 + $0x170] sm:$0xf] %v5883_v28  ;;  %2829 = vst [vmem:[#allocation5 + $0x194] sm:$0xf] %v5884_v37  ;;  %v5872_v43 = vpack.c.bf16 %v2697_v41, %v2697_v41  ;;  %v2793_v29 = vld [vmem:[#allocation3 + $0x112] sm:$0xff]  ;;  %v2841_v55 = vld [vmem:[#allocation3 + $0x120] sm:$0xff]  ;;  %v5887_v62 = vpack.c.bf16 %v2792_v50, %v2792_v50 }
 0x33e   :  { %2876 = vst [vmem:[#allocation5 + $0x174] sm:$0xf] %v5868_v63  ;;  %2971 = vst [vmem:[#allocation5 + $0x158] sm:$0xf] %v5883_v28  ;;  %v5888_v14 = vpack.c.bf16 %v2793_v29, %v2793_v29  ;;  %v5896_v31 = vpack.c.bf16 %v2841_v55, %v2841_v55  ;;  %v2884_v47 = vld [vmem:[#allocation3 + $0xd1] sm:$0xff]  ;;  %v2885_v22 = vld [vmem:[#allocation3 + $0xe1] sm:$0xff] }
 0x33f   :  { %3020 = vst [vmem:[#allocation5 + $0x15c] sm:$0xf] %v5868_v63  ;;  %2972 = vst [vmem:[#allocation5 + $0x17c] sm:$0xf] %v5884_v37  ;;  %v3030_v27 = vld [vmem:[#allocation3 + $0xf1] sm:$0xff]  ;;  %v5899_v33 = vpack.c.bf16 %v2884_v47, %v2884_v47  ;;  %v5900_v56 = vpack.c.bf16 %v2885_v22, %v2885_v22  ;;  %v2887_v17 = vld [vmem:[#allocation3 + $0x101] sm:$0xff] }
 0x340   :  { %2877 = vst [vmem:[#allocation5 + $0x198] sm:$0xf] %v5892_v21  ;;  %2734 = vst [vmem:[#allocation5 + $0x1b0] sm:$0xf] %v5892_v21  ;;  %v5924_v39 = vpack.c.bf16 %v3030_v27, %v3030_v27  ;;  %v3032_v20 = vld [vmem:[#allocation3 + $0x111] sm:$0xff]  ;;  %v2889_v5 = vld [vmem:[#allocation3 + $0x121] sm:$0xff]  ;;  %v5902_v35 = vpack.c.bf16 %v2887_v17, %v2887_v17 }
 0x341   :  { %2735 = vst [vmem:[#allocation5 + $0x1d4] sm:$0xf] %v5870_v57  ;;  %2830 = vst [vmem:[#allocation5 + $0x1b8] sm:$0xf] %v5885_v13  ;;  %v5926_v42 = vpack.c.bf16 %v3032_v20, %v3032_v20  ;;  %v5904_v34 = vpack.c.bf16 %v2889_v5, %v2889_v5  ;;  %v2937_v0 = vld [vmem:[#allocation3 + $0x122] sm:$0xff]  ;;  %v3076_v26 = vld [vmem:[#allocation3 + $0xd2] sm:$0xff] }
 0x342   :  { %2878 = vst [vmem:[#allocation5 + $0x1bc] sm:$0xf] %v5870_v57  ;;  %2973 = vst [vmem:[#allocation5 + $0x1a0] sm:$0xf] %v5885_v13  ;;  %v3075_v36 = vld [vmem:[#allocation3 + $0xc2] sm:$0xff]  ;;  %v5912_v46 = vpack.c.bf16 %v2937_v0, %v2937_v0  ;;  %v5930_v40 = vpack.c.bf16 %v3076_v26, %v3076_v26  ;;  %v3135_v19 = vld [vmem:[#allocation5 + $0x58] sm:$0xff] }
 0x343   :  { %3021 = vst [vmem:[#allocation5 + $0x180] sm:$0xf] %v5892_v21  ;;  %3022 = vst [vmem:[#allocation5 + $0x1a4] sm:$0xf] %v5870_v57  ;;  %v5929_v54 = vpack.c.bf16 %v3075_v36, %v3075_v36  ;;  %v3168_v6 = vld [vmem:[#allocation5 + $0x144] sm:$0xff]  ;;  %v3178_v25 = vld [vmem:[#allocation5 + $0x18c] sm:$0xff] }
 0x344   :  { %3117 = vst [vmem:[#allocation5 + $0x188] sm:$0xf] %v5885_v13  ;;  %2831 = vst [vmem:[#allocation5 + $0x1dc] sm:$0xf] %v5886_v9  ;;  %v6861_v18 = vld [vmem:[#allocation5 + $0x124] ss:$36 sps:$4 sm:$0xff]   ;;  %v5540_v7 = vcombine.low %v3163_v4, %v3168_v6 }
 0x345   :  { %2879 = vst [vmem:[#allocation5 + $0x1e0] sm:$0xf] %v5894_v2  ;;  %2736 = vst [vmem:[#allocation5 + $0x1f8] sm:$0xf] %v5894_v2  ;;  %v6863_v24 = vld [vmem:[#allocation5 + $0x12c] ss:$36 sps:$4 sm:$0xff]   ;;  %4218 = vmatprep.mubr.bf16.mxu0 %v6861_v18 }
 0x346   :  { %2737 = vst [vmem:[#allocation5 + $0x21c] sm:$0xf] %v5872_v43  ;;  %2880 = vst [vmem:[#allocation5 + $0x204] sm:$0xf] %v5872_v43  ;;  %v6866_v48 = vld [vmem:[#allocation5 + $0x128] ss:$36 sps:$4 sm:$0xff]   ;;  %4315 = vmatprep.mubr.bf16.mxu1 %v6863_v24  ;;  %4219 = vmatmul.mubr.bf16.gmra.mxu0 %v5540_v7 }
 0x347   :  { %2974 = vst [vmem:[#allocation5 + $0x1c4] sm:$0xf] %v5886_v9  ;;  %3023 = vst [vmem:[#allocation5 + $0x1c8] sm:$0xf] %v5894_v2  ;;  %v6869_v53 = vld [vmem:[#allocation5 + $0x16c] ss:$36 sps:$4 sm:$0xff]   ;;  %4316 = vmatmul.mubr.bf16.gmra.mxu1 %v6866_v48 }
 0x348   :  { %3024 = vst [vmem:[#allocation5 + $0x1ec] sm:$0xf] %v5872_v43  ;;  %3118 = vst [vmem:[#allocation5 + $0x1ac] sm:$0xf] %v5886_v9  ;;  %v6871_v30 = vld [vmem:[#allocation5 + $0x174] ss:$36 sps:$4 sm:$0xff]   ;;  %4226 = vmatprep.mubr.bf16.mxu0 %v6869_v53 }
 0x349   :  { %2832 = vst [vmem:[#allocation5 + $0x200] sm:$0xf] %v5887_v62  ;;  %2833 = vst [vmem:[#allocation5 + $0x224] sm:$0xf] %v5888_v14  ;;  %4323 = vmatprep.mubr.bf16.mxu1 %v6871_v30  ;;  %v3173_v58 = vld [vmem:[#allocation5 + $0x168] sm:$0xff]  ;;  %v3183_v51 = vld [vmem:[#allocation5 + $0x1b0] sm:$0xff] }
 0x34a   :  { %2881 = vst [vmem:[#allocation5 + $0x228] sm:$0xf] %v5896_v31  ;;  %2975 = vst [vmem:[#allocation5 + $0x1e8] sm:$0xf] %v5887_v62  ;;  %v5549_v60 = vcombine.low %v3173_v58, %v3178_v25  ;;  %v6877_v3 = vld [vmem:[#allocation5 + $0x170] ss:$36 sps:$4 sm:$0xff]  }
 0x34b   :  { %2976 = vst [vmem:[#allocation5 + $0x20c] sm:$0xf] %v5888_v14  ;;  %3025 = vst [vmem:[#allocation5 + $0x210] sm:$0xf] %v5896_v31  ;;  %v6880_v44 = vld [vmem:[#allocation5 + $0x1b4] ss:$36 sps:$4 sm:$0xff]  }
 0x34c   :  { %3119 = vst [vmem:[#allocation5 + $0x1d0] sm:$0xf] %v5887_v62  ;;  %3120 = vst [vmem:[#allocation5 + $0x1f4] sm:$0xf] %v5888_v14  ;;  %v6882_v49 = vld [vmem:[#allocation5 + $0x1bc] ss:$36 sps:$4 sm:$0xff]  }
 0x34d   :  { %2924 = vst [vmem:[#allocation5 + $0x178] sm:$0xf] %v5899_v33  ;;  %2925 = vst [vmem:[#allocation5 + $0x19c] sm:$0xf] %v5900_v56  ;;  %v3188_v16 = vld [vmem:[#allocation5 + $0x1d4] sm:$0xff]  ;;  %v3198_v8 = vld [vmem:[#allocation5 + $0x21c] sm:$0xff] }
 0x34e   :  { %3069 = vst [vmem:[#allocation5 + $0x184] sm:$0xf] %v5900_v56  ;;  %3070 = vst [vmem:[#allocation5 + $0x1a8] sm:$0xf] %v5924_v39  ;;  %4227 = vmatmul.mubr.bf16.gmra.mxu0 %v5549_v60  ;;  %v5558_v23 = vcombine.low %v3183_v51, %v3188_v16  ;;  %v6888_v61 = vld [vmem:[#allocation5 + $0x1b8] ss:$36 sps:$4 sm:$0xff]  }
 0x34f   :  { %2926 = vst [vmem:[#allocation5 + $0x1c0] sm:$0xf] %v5924_v39  ;;  %2927 = vst [vmem:[#allocation5 + $0x1e4] sm:$0xf] %v5902_v35  ;;  %4324 = vmatmul.mubr.bf16.gmra.mxu1 %v6877_v3  ;;  %4234 = vmatprep.mubr.bf16.mxu0 %v6880_v44  ;;  %v6891_v10 = vld [vmem:[#allocation5 + $0x1fc] ss:$36 sps:$4 sm:$0xff]  }
 0x350   :  { %3071 = vst [vmem:[#allocation5 + $0x1cc] sm:$0xf] %v5902_v35  ;;  %3072 = vst [vmem:[#allocation5 + $0x1f0] sm:$0xf] %v5926_v42  ;;  %4331 = vmatprep.mubr.bf16.mxu1 %v6882_v49  ;;  %v3193_v38 = vld [vmem:[#allocation5 + $0x1f8] sm:$0xff]  ;;  %v6916_v21 = vld [vmem:[%s8952_s2 + $0x230] sm:$0xff]  }
 0x351   :  { %2928 = vst [vmem:[#allocation5 + $0x208] sm:$0xf] %v5926_v42  ;;  %2929 = vst [vmem:[#allocation5 + $0x22c] sm:$0xf] %v5904_v34  ;;  %v6893_v59 = vld [vmem:[#allocation5 + $0x204] ss:$36 sps:$4 sm:$0xff]   ;;  %v5567_v63 = vcombine.low %v3193_v38, %v3198_v8 }
 0x352   :  { %3073 = vst [vmem:[#allocation5 + $0x214] sm:$0xf] %v5904_v34  ;;  %2977 = vst [vmem:[#allocation5 + $0x230] sm:$0xf] %v5912_v46  ;;  %v6899_v28 = vld [vmem:[#allocation5 + $0x200] ss:$36 sps:$4 sm:$0xff]  }
 0x353   :  { %3115 = vst [vmem:[#allocation5 + $0x140] sm:$0xf] %v5929_v54  ;;  %3116 = vst [vmem:[#allocation5 + $0x164] sm:$0xf] %v5930_v40  ;;  %v6904_v37 = vld [vmem:[#allocation5 + $0x14] ss:$36 sps:$4 sm:$0xff]  }
 0x354   :  { %3121 = vst [vmem:[#allocation5 + $0x218] sm:$0xf] %v5912_v46  ;;  %v6908_v11 = vld [vmem:[#allocation5 + $0x1c] ss:$36 sps:$4 sm:$0xff]   ;;  %v6902_v15 = vld [vmem:[#allocation5 + $0x10] ss:$36 sps:$4 sm:$0xff]  }
 0x355   :  { %v6906_v52 = vld [vmem:[#allocation5 + $0x18] ss:$36 sps:$4 sm:$0xff]   ;;  %v6914_v45 = vld [vmem:[#allocation5 + $0x64] ss:$36 sps:$4 sm:$0xff]   ;;  %v6924_v47 = vld [vmem:[#allocation5 + $0xec] ss:$36 sps:$4 sm:$0xff]  }
 0x356   :  { %4235 = vmatmul.mubr.bf16.gmra.mxu0 %v5558_v23  ;;  %v6912_v57 = vld [vmem:[#allocation5 + $0x5c] ss:$36 sps:$4 sm:$0xff]   ;;  %v6922_v13 = vld [vmem:[%s8952_s2 + $0x228] sm:$0xff]   ;;  %v6940_v22 = vld [vmem:[%s8952_s2 + $0x210] sm:$0xff]  }
 0x357   :  { %4332 = vmatmul.mubr.bf16.gmra.mxu1 %v6888_v61  ;;  %4242 = vmatprep.mubr.bf16.mxu0 %v6891_v10  ;;  %v3140_v41 = vld [vmem:[#allocation5 + $0x7c] sm:$0xff]  ;;  %v6918_v43 = vld [vmem:[#allocation5 + $0xa4] ss:$36 sps:$4 sm:$0xff]   ;;  %v6926_v27 = vld [vmem:[#allocation5 + $0xf4] ss:$36 sps:$4 sm:$0xff]  }
 0x358   :  { %4339 = vmatprep.mubr.bf16.mxu1 %v6893_v59  ;;  %v5517_v9 = vcombine.low %v3135_v19, %v3140_v41  ;;  %v6917_v2 = vld [vmem:[#allocation5 + $0x60] ss:$36 sps:$4 sm:$0xff]   ;;  %v6934_v62 = vld [vmem:[%s8952_s2 + $0x218] sm:$0xff]   ;;  %v6923_v31 = vld [vmem:[#allocation5 + $0xa8] ss:$36 sps:$4 sm:$0xff]  }
 0x359   :  { %v6928_v50 = vld [vmem:[%s8952_s2 + $0x220] sm:$0xff]   ;;  %v3155_v33 = vld [vmem:[#allocation5 + $0xe8] sm:$0xff]  ;;  %v6929_v20 = vld [vmem:[#allocation5 + $0xf0] ss:$36 sps:$4 sm:$0xff]  }
 0x35a   :  { %v3145_v29 = vld [vmem:[#allocation5 + $0xa0] sm:$0xff]  ;;  %v3160_v56 = vld [vmem:[#allocation5 + $0x10c] sm:$0xff]  ;;  %v6930_v5 = vld [vmem:[#allocation5 + $0x134] ss:$36 sps:$4 sm:$0xff]  }
 0x35b   :  { %v3150_v55 = vld [vmem:[#allocation5 + $0xc4] sm:$0xff]  ;;  %v5535_v17 = vcombine.low %v3155_v33, %v3160_v56  ;;  %v6932_v42 = vld [vmem:[#allocation5 + $0x13c] ss:$36 sps:$4 sm:$0xff]   ;;  %v3165_v34 = vld [vmem:[#allocation5 + $0x130] sm:$0xff] }
 0x35c   :  { %v5526_v14 = vcombine.low %v3145_v29, %v3150_v55  ;;  %v6946_v39 = vld [vmem:[%s8952_s2 + $0x208] sm:$0xff]   ;;  %v6952_v35 = vld [vmem:[%s8952_s2 + $0x200] sm:$0xff]   ;;  %v3170_v0 = vld [vmem:[#allocation5 + $0x154] sm:$0xff] }
 0x35d   :  { %v5544_v36 = vcombine.low %v3165_v34, %v3170_v0  ;;  %v6935_v26 = vld [vmem:[#allocation5 + $0x138] ss:$36 sps:$4 sm:$0xff]   ;;  %v6938_v46 = vld [vmem:[#allocation5 + $0x184] ss:$36 sps:$4 sm:$0xff]   ;;  %v6944_v7 = vld [vmem:[#allocation5 + $0x1cc] ss:$36 sps:$4 sm:$0xff]  }
 0x35e   :  { %4243 = vmatmul.mubr.bf16.gmra.mxu0 %v5567_v63  ;;  %v6936_v4 = vld [vmem:[#allocation5 + $0x17c] ss:$36 sps:$4 sm:$0xff]   ;;  %v6942_v24 = vld [vmem:[#allocation5 + $0x1c4] ss:$36 sps:$4 sm:$0xff]   ;;  %v6948_v25 = vld [vmem:[#allocation5 + $0x20c] ss:$36 sps:$4 sm:$0xff]  }
 0x35f   :  { %4340 = vmatmul.mubr.bf16.gmra.mxu1 %v6899_v28  ;;  %4380 = vmatprep.mubr.bf16.mxu0 %v6904_v37  ;;  %v3175_v54 = vld [vmem:[#allocation5 + $0x178] sm:$0xff]  ;;  %v6941_v18 = vld [vmem:[#allocation5 + $0x180] ss:$36 sps:$4 sm:$0xff]   ;;  %v6947_v58 = vld [vmem:[#allocation5 + $0x1c8] ss:$36 sps:$4 sm:$0xff]  }
 0x360   :  { %4477 = vmatprep.mubr.bf16.mxu1 %v6908_v11  ;;  %v3180_v40 = vld [vmem:[#allocation5 + $0x19c] sm:$0xff]  ;;  %v3190_v53 = vld [vmem:[#allocation5 + $0x1e4] sm:$0xff]  ;;  %v6950_v60 = vld [vmem:[#allocation5 + $0x214] ss:$36 sps:$4 sm:$0xff]  }
 0x361   :  { %v5553_v6 = vcombine.low %v3175_v54, %v3180_v40  ;;  %v3185_v48 = vld [vmem:[#allocation5 + $0x1c0] sm:$0xff]  ;;  %v3195_v3 = vld [vmem:[#allocation5 + $0x208] sm:$0xff]  ;;  %v6953_v51 = vld [vmem:[#allocation5 + $0x210] ss:$36 sps:$4 sm:$0xff]  }
 0x362   :  { %v5562_v30 = vcombine.low %v3185_v48, %v3190_v53  ;;  %v3200_v44 = vld [vmem:[#allocation5 + $0x22c] sm:$0xff]  ;;  %v6954_v16 = vld [vmem:[#allocation5 + $0x20] ss:$36 sps:$4 sm:$0xff]   ;;  %v6957_v10 = vld [vmem:[#allocation5 + $0xf8] ss:$36 sps:$4 sm:$0xff]  }
 0x363   :  { %v5571_v49 = vcombine.low %v3195_v3, %v3200_v44  ;;  %v6955_v23 = vld [vmem:[#allocation5 + $0x68] ss:$36 sps:$4 sm:$0xff]   ;;  %v6956_v61 = vld [vmem:[#allocation5 + $0xb0] ss:$36 sps:$4 sm:$0xff]   ;;  %v6958_v59 = vld [vmem:[#allocation5 + $0x140] ss:$36 sps:$4 sm:$0xff]  }
 0x364   :  { %v6959_v38 = vld [vmem:[#allocation5 + $0x188] ss:$36 sps:$4 sm:$0xff]   ;;  %v6960_v8 = vld [vmem:[#allocation5 + $0x1d0] ss:$36 sps:$4 sm:$0xff]   ;;  %v6961_v63 = vld [vmem:[#allocation5 + $0x218] ss:$36 sps:$4 sm:$0xff]  }
 0x365   :  { %v8358_v11 = vld [vmem:[%s8955_s6] ss:$0 sm:$0xff]  ;;  %v8367_v55 = vld [vmem:[%s8950_s9 + $0x78] sm:$0xff] }
 0x366   :  { %4381 = vmatmul.mubr.bf16.vlgmr.msra.gmra.mxu0 %v6902_v15  ;;  %8996 = vst [vmem:[#allocation7_spill] sm:$0xff] %v8367_v55  ;;  %v8403_v48 = vld [vmem:[%s8950_s9 + $0x60] sm:$0xff] }
 0x367   :  { %4478 = vmatmul.mubr.bf16.vlgmr.msra.gmra.mxu1 %v6906_v52  ;;  %6580 = vmatpush3.bf16.msra.mxu0 %v8291_v12  ;;  %v6920_v12 = vld [vmem:[#allocation5 + $0xac] ss:$36 sps:$4 sm:$0xff]   ;;  %8999 = vst [vmem:[#allocation10_spill] sm:$0xff] %v8403_v48 }
 0x368   :  { %4388 = vmatprep.mubr.bf16.mxu0 %v6912_v57  ;;  %4485 = vmatprep.mubr.bf16.mxu1 %v6914_v45 }
 0x369   :  { %6581 = vmatprep.subr.bf16.mxu0 %v6916_v21  ;;  %6612 = vmatpush3.msra.mxu1 %v8367_v55 }
 0x36a   :  { %6613 = vmatprep.subr.mxu1 %v8299_v1 }
 0x36b   :  { %6582 = vmatpush3.bf16.msra.mxu0 %v6916_v21 }
 0x36c   :  { %6583 = vmatprep.subr.bf16.mxu0 %v6922_v13 }
 0x36e   :  { %4389 = vmatmul.mubr.bf16.gmra.mxu0 %v5517_v9 }
 0x36f   :  { %4486 = vmatmul.mubr.bf16.gmra.mxu1 %v6917_v2  ;;  %4396 = vmatprep.mubr.bf16.mxu0 %v6918_v43 }
 0x370   :  { %4493 = vmatprep.mubr.bf16.mxu1 %v6920_v12  ;;  %6584 = vmatpush3.bf16.msra.mxu0 %v6922_v13 }
 0x371   :  { %6585 = vmatprep.subr.bf16.mxu0 %v6928_v50 }
 0x374   :  { %6586 = vmatpush3.bf16.msra.mxu0 %v6928_v50 }
 0x375   :  { %6587 = vmatprep.subr.bf16.mxu0 %v6934_v62 }
 0x376   :  { %4397 = vmatmul.mubr.bf16.gmra.mxu0 %v5526_v14 }
 0x377   :  { %4494 = vmatmul.mubr.bf16.gmra.mxu1 %v6923_v31  ;;  %4404 = vmatprep.mubr.bf16.mxu0 %v6924_v47 }
 0x378   :  { %4501 = vmatprep.mubr.bf16.mxu1 %v6926_v27  ;;  %6588 = vmatpush3.bf16.msra.mxu0 %v6934_v62 }
 0x379   :  { %6589 = vmatprep.subr.bf16.mxu0 %v6940_v22 }
 0x37c   :  { %6590 = vmatpush3.bf16.msra.mxu0 %v6940_v22 }
 0x37d   :  { %6591 = vmatprep.subr.bf16.mxu0 %v6946_v39 }
 0x37e   :  { %4405 = vmatmul.mubr.bf16.gmra.mxu0 %v5535_v17 }
 0x37f   :  { %4502 = vmatmul.mubr.bf16.gmra.mxu1 %v6929_v20  ;;  %4412 = vmatprep.mubr.bf16.mxu0 %v6930_v5 }
 0x380   :  { %4509 = vmatprep.mubr.bf16.mxu1 %v6932_v42  ;;  %6592 = vmatpush3.bf16.msra.mxu0 %v6946_v39  ;;  %v8379_v39 = vld [vmem:[%s8950_s9 + $0x70] sm:$0xff] }
 0x381   :  { %6593 = vmatprep.subr.bf16.mxu0 %v6952_v35  ;;  %8997 = vst [vmem:[#allocation8_spill] sm:$0xff] %v8379_v39  ;;  %6614 = vmatpush3.msra.mxu1 %v8379_v39 }
 0x382   :  { %6615 = vmatprep.subr.mxu1 %v8299_v1 }
 0x384   :  { %6594 = vmatpush3.bf16.msra.mxu0 %v6952_v35 }
 0x385   :  { %6646 = vmatprep.subr.mxu0 %v8299_v1 }
 0x386   :  { %4413 = vmatmul.mubr.bf16.gmra.mxu0 %v5544_v36 }
 0x387   :  { %4510 = vmatmul.mubr.bf16.gmra.mxu1 %v6935_v26  ;;  %4420 = vmatprep.mubr.bf16.mxu0 %v6936_v4  ;;  %v8391_v26 = vld [vmem:[%s8950_s9 + $0x68] sm:$0xff] }
 0x388   :  { %4517 = vmatprep.mubr.bf16.mxu1 %v6938_v46  ;;  %8998 = vst [vmem:[#allocation9_spill] sm:$0xff] %v8391_v26  ;;  %6616 = vmatpush3.msra.mxu1 %v8391_v26 }
 0x389   :  { %6617 = vmatprep.subr.mxu1 %v8299_v1 }
 0x38a   :  { %6618 = vmatpush3.msra.mxu1 %v8403_v48 }
 0x38b   :  { %6619 = vmatprep.subr.mxu1 %v8299_v1 }
 0x38e   :  { %4421 = vmatmul.mubr.bf16.gmra.mxu0 %v5553_v6 }
 0x38f   :  { %4518 = vmatmul.mubr.bf16.gmra.mxu1 %v6941_v18  ;;  %4428 = vmatprep.mubr.bf16.mxu0 %v6942_v24 }
 0x390   :  { %4525 = vmatprep.mubr.bf16.mxu1 %v6944_v7 }
 0x396   :  { %4429 = vmatmul.mubr.bf16.gmra.mxu0 %v5562_v30 }
 0x397   :  { %4526 = vmatmul.mubr.bf16.gmra.mxu1 %v6947_v58  ;;  %4436 = vmatprep.mubr.bf16.mxu0 %v6948_v25 }
 0x398   :  { %4533 = vmatprep.mubr.bf16.mxu1 %v6950_v60 }
 0x39e   :  { %4437 = vmatmul.mubr.bf16.gmra.mxu0 %v5571_v49 }
 0x39f   :  { %4534 = vmatmul.mubr.bf16.gmra.mxu1 %v6953_v51  ;;  %6595 = vmatprep.mubr.bf16.mxu0 %v6954_v16  ;;  %v8415_v51 = vld [vmem:[%s8950_s9 + $0x58] sm:$0xff] }
 0x3a0   :  { %6643 = vmatprep.mubr.msk.f32.mxu1 %vm6977_vm6, %v8299_v1  ;;  %9000 = vst [vmem:[#allocation11_spill] sm:$0xff] %v8415_v51  ;;  %6620 = vmatpush3.msra.mxu1 %v8415_v51 }
 0x3a1   :  { %6621 = vmatprep.subr.mxu1 %v8299_v1 }
 0x3a6   :  { %6596 = vmatmul.mubr.bf16.vlgmr.msra.gmra.mxu0 %v6955_v23 }
 0x3a7   :  { %6599 = vmatprep.mubr.bf16.mxu0 %v6956_v61  ;;  %6647 = vmatpush3.msra.mxu0 %v8367_v55 }
 0x3a8   :  { %6648 = vmatprep.subr.mxu0 %v8299_v1 }
 0x3a9   :  { %6649 = vmatpush3.msra.mxu0 %v8379_v39 }
 0x3aa   :  { %6650 = vmatprep.subr.mxu0 %v8299_v1 }
 0x3ab   :  { %6651 = vmatpush3.msra.mxu0 %v8391_v26 }
 0x3ac   :  { %6652 = vmatprep.subr.mxu0 %v8299_v1 }
 0x3ad   :  { %6653 = vmatpush3.msra.mxu0 %v8403_v48 }
 0x3ae   :  { %6600 = vmatmul.mubr.bf16.gmra.mxu0 %v6957_v10  ;;  %6654 = vmatprep.subr.mxu0 %v8299_v1 }
 0x3af   :  { %6603 = vmatprep.mubr.bf16.mxu0 %v6958_v59  ;;  %6655 = vmatpush3.msra.mxu0 %v8415_v51 }
 0x3b0   :  { %6656 = vmatprep.subr.mxu0 %v8299_v1 }
 0x3b6   :  { %6604 = vmatmul.mubr.bf16.gmra.mxu0 %v6959_v38 }
 0x3b7   :  { %6607 = vmatprep.mubr.bf16.mxu0 %v6960_v8 }
 0x3be   :  { %6608 = vmatmul.mubr.bf16.gmra.mxu0 %v6961_v63 }
 0x3bf   :  { %6678 = vmatprep.mubr.msk.f32.mxu0 %vm6977_vm6, %v8299_v1 }
 0x3c3   :  { %v6095_v28 = vpop.f32.mrf.mxu0 }
 0x3c5   :  { %v6159_v37 = vpop.f32.mrf.mxu1  ;;  %v6096_v15 = vpop.f32.mrf.mxu0 }
 0x3c6   :  { %v6097_v52 = vadd.f32 %v6096_v15, %v6095_v28  ;;  %v8427_v28 = vld [vmem:[%s8950_s9 + $0x50] sm:$0xff] }
 0x3c7   :  { %v6160_v21 = vpop.f32.mrf.mxu1  ;;  %v6098_v57 = vpop.f32.mrf.mxu0  ;;  %9001 = vst [vmem:[#allocation12_spill] sm:$0xff] %v8427_v28  ;;  %6622 = vmatpush3.msra.mxu1 %v8427_v28  ;;  %6657 = vmatpush3.msra.mxu0 %v8427_v28 }
 0x3c8   :  { %v4189_v45 = vadd.f32 %v6097_v52, %v8358_v11  ;;  %v6161_v13 = vadd.f32 %v6160_v21, %v6159_v37  ;;  %6623 = vmatprep.subr.mxu1 %v8299_v1  ;;  %6658 = vmatprep.subr.mxu0 %v8299_v1  ;;  %v8440_v21 = vld [vmem:[%s8950_s9 + $0x48] sm:$0xff] }
 0x3c9   :  { %v6162_v19 = vpop.f32.mrf.mxu1  ;;  %v6099_v41 = vpop.f32.mrf.mxu0  ;;  %9002 = vst [vmem:[#allocation13_spill] sm:$0xff] %v8440_v21  ;;  %6624 = vmatpush3.msra.mxu1 %v8440_v21  ;;  %6659 = vmatpush3.msra.mxu0 %v8440_v21 }
 0x3ca   :  { %v8361_v9 = vadd.f32 %v6161_v13, %v4189_v45  ;;  %v6100_v2 = vadd.f32 %v6099_v41, %v6098_v57  ;;  %6625 = vmatprep.subr.mxu1 %v8299_v1  ;;  %6660 = vmatprep.subr.mxu0 %v8299_v1  ;;  %v8449_v57 = vld [vmem:[%s8950_s9 + $0x40] sm:$0xff]  ;;  %v8458_v45 = vld [vmem:[%s8950_s9 + $0x38] sm:$0xff]  ;;  %v8467_v13 = vld [vmem:[%s8950_s9 + $0x30] sm:$0xff] }
 0x3cb   :  { %v6163_v43 = vpop.f32.mrf.mxu1  ;;  %v6101_v50 = vpop.f32.mrf.mxu0  ;;  %9003 = vst [vmem:[#allocation14_spill] sm:$0xff] %v8449_v57  ;;  %6626 = vmatpush3.msra.mxu1 %v8449_v57  ;;  %6661 = vmatpush3.msra.mxu0 %v8449_v57  ;;  %9004 = vst [vmem:[#allocation15_spill] sm:$0xff] %v8458_v45 }
 0x3cc   :  { %v4192_v12 = vadd.f32 %v6100_v2, %v8358_v11  ;;  %v6164_v29 = vadd.f32 %v6163_v43, %v6162_v19  ;;  %6627 = vmatprep.subr.mxu1 %v8299_v1  ;;  %6662 = vmatprep.subr.mxu0 %v8299_v1  ;;  %9005 = vst [vmem:[#allocation16_spill] sm:$0xff] %v8467_v13  ;;  %v8476_v19 = vld [vmem:[%s8950_s9 + $0x28] sm:$0xff] }
 0x3cd   :  { %v6165_v62 = vpop.f32.mrf.mxu1  ;;  %v6102_v14 = vpop.f32.mrf.mxu0  ;;  %6628 = vmatpush3.msra.mxu1 %v8458_v45  ;;  %6663 = vmatpush3.msra.mxu0 %v8458_v45  ;;  %9006 = vst [vmem:[#allocation17_spill] sm:$0xff] %v8476_v19 }
 0x3ce   :  { %v8371_v31 = vadd.f32 %v6164_v29, %v4192_v12  ;;  %v6103_v47 = vadd.f32 %v6102_v14, %v6101_v50  ;;  %6629 = vmatprep.subr.mxu1 %v8299_v1  ;;  %6664 = vmatprep.subr.mxu0 %v8299_v1  ;;  %v8489_v14 = vld [vmem:[%s8950_s9 + $0x20] sm:$0xff] }
 0x3cf   :  { %v6166_v22 = vpop.f32.mrf.mxu1  ;;  %v6104_v27 = vpop.f32.mrf.mxu0  ;;  %6630 = vmatpush3.msra.mxu1 %v8467_v13  ;;  %6665 = vmatpush3.msra.mxu0 %v8467_v13  ;;  %9007 = vst [vmem:[#allocation18_spill] sm:$0xff] %v8489_v14 }
 0x3d0   :  { %v4197_v33 = vadd.f32 %v6103_v47, %v8358_v11  ;;  %v6167_v56 = vadd.f32 %v6166_v22, %v6165_v62  ;;  %6631 = vmatprep.subr.mxu1 %v8299_v1  ;;  %6666 = vmatprep.subr.mxu0 %v8299_v1  ;;  %v8494_v47 = vld [vmem:[%s8950_s9 + $0x18] sm:$0xff] }
 0x3d1   :  { %v6168_v17 = vpop.f32.mrf.mxu1  ;;  %v6105_v20 = vpop.f32.mrf.mxu0  ;;  %6632 = vmatpush3.msra.mxu1 %v8476_v19  ;;  %6667 = vmatpush3.msra.mxu0 %v8476_v19  ;;  %9008 = vst [vmem:[#allocation19_spill] sm:$0xff] %v8494_v47 }
 0x3d2   :  { %v8383_v5 = vadd.f32 %v6167_v56, %v4197_v33  ;;  %v6106_v35 = vadd.f32 %v6105_v20, %v6104_v27  ;;  %6633 = vmatprep.subr.mxu1 %v8299_v1  ;;  %6668 = vmatprep.subr.mxu0 %v8299_v1 }
 0x3d3   :  { %v6169_v42 = vpop.f32.mrf.mxu1  ;;  %v6107_v34 = vpop.f32.mrf.mxu0  ;;  %6634 = vmatpush3.msra.mxu1 %v8489_v14  ;;  %6669 = vmatpush3.msra.mxu0 %v8489_v14 }
 0x3d4   :  { %v4200_v0 = vadd.f32 %v6106_v35, %v8358_v11  ;;  %v6170_v36 = vadd.f32 %v6169_v42, %v6168_v17  ;;  %6635 = vmatprep.subr.mxu1 %v8299_v1  ;;  %v8503_v17 = vld [vmem:[%s8950_s9 + $0x10] sm:$0xff]  ;;  %6670 = vmatprep.subr.mxu0 %v8299_v1 }
 0x3d5   :  { %v6108_v46 = vpop.f32.mrf.mxu0  ;;  %9009 = vst [vmem:[#allocation20_spill] sm:$0xff] %v8503_v17  ;;  %6636 = vmatpush3.msra.mxu1 %v8494_v47  ;;  %6671 = vmatpush3.msra.mxu0 %v8494_v47 }
 0x3d6   :  { %v6171_v4 = vpop.f32.mrf.mxu1  ;;  %v8395_v54 = vadd.f32 %v6170_v36, %v4200_v0  ;;  %v6109_v40 = vadd.f32 %v6108_v46, %v6107_v34  ;;  %6637 = vmatprep.subr.mxu1 %v8299_v1  ;;  %v8514_v0 = vld [vmem:[%s8950_s9 + $0x8] sm:$0xff]  ;;  %6672 = vmatprep.subr.mxu0 %v8299_v1 }
 0x3d7   :  { %v6110_v18 = vpop.f32.mrf.mxu0  ;;  %9010 = vst [vmem:[#allocation21_spill] sm:$0xff] %v8514_v0  ;;  %6638 = vmatpush3.msra.mxu1 %v8503_v17  ;;  %6673 = vmatpush3.msra.mxu0 %v8503_v17 }
 0x3d8   :  { %v6172_v6 = vpop.f32.mrf.mxu1  ;;  %v4205_v24 = vadd.f32 %v6109_v40, %v8358_v11  ;;  %6639 = vmatprep.subr.mxu1 %v8299_v1 }
 0x3d9   :  { %v6173_v7 = vadd.f32 %v6172_v6, %v6171_v4  ;;  %v6111_v30 = vpop.f32.mrf.mxu0  ;;  %v8521_v6 = vld [vmem:[#allocation3] sm:$0xff]  ;;  %6640 = vmatpush3.msra.mxu1 %v8514_v0 }
 0x3da   :  { %v6174_v53 = vpop.f32.mrf.mxu1  ;;  %v6112_v25 = vadd.f32 %v6111_v30, %v6110_v18  ;;  %9011 = vst [vmem:[#allocation22_spill] sm:$0xff] %v8521_v6  ;;  %6674 = vmatprep.subr.mxu0 %v8521_v6  ;;  %6641 = vmatprep.subr.mxu1 %v8521_v6 }
 0x3db   :  { %v8407_v58 = vadd.f32 %v6173_v7, %v4205_v24  ;;  %v6113_v3 = vpop.f32.mrf.mxu0  ;;  %6675 = vmatpush3.msra.mxu0 %v8514_v0 }
 0x3dc   :  { %v6175_v60 = vpop.f32.mrf.mxu1  ;;  %v4208_v44 = vadd.f32 %v6112_v25, %v8358_v11  ;;  %6676 = vmatprep.subr.mxu0 %v8521_v6 }
 0x3dd   :  { %v6176_v49 = vadd.f32 %v6175_v60, %v6174_v53  ;;  %v6114_v23 = vpop.f32.mrf.mxu0 }
 0x3de   :  { %v6177_v16 = vpop.f32.mrf.mxu1  ;;  %v6115_v10 = vadd.f32 %v6114_v23, %v6113_v3  ;;  %v8534_v3 = vld [vmem:[%s8950_s9] sm:$0xff] }
 0x3df   :  { %v8419_v61 = vadd.f32 %v6176_v49, %v4208_v44  ;;  %v6116_v38 = vpop.f32.mrf.mxu0  ;;  %9012 = vst [vmem:[#allocation23_spill] sm:$0xff] %v8534_v3  ;;  %6642 = vmatpush3.msra.mxu1 %v8534_v3  ;;  %6677 = vmatpush3.msra.mxu0 %v8534_v3 }
 0x3e0   :  { %v6178_v59 = vpop.f32.mrf.mxu1  ;;  %v4213_v8 = vadd.f32 %v6115_v10, %v8358_v11  ;;  %6681 = vmatprep.subr.mxu1 %v8521_v6  ;;  %6716 = vmatprep.subr.mxu0 %v8521_v6 }
 0x3e1   :  { %v6179_v63 = vadd.f32 %v6178_v59, %v6177_v16  ;;  %v6117_v37 = vpop.f32.mrf.mxu0 }
 0x3e2   :  { %v8433_v52 = vadd.f32 %v6117_v37, %v6116_v38  ;;  %v8482_v41 = vpop.f32.mrf.mxu1 }
 0x3e3   :  { %v8431_v15 = vadd.f32 %v6179_v63, %v4213_v8 }
 0x3e4   :  { %v8484_v2 = vpop.f32.mrf.mxu1 }
 0x406   :  { %v6119_v43 = vpop.f32.mrf.mxu0 }
 0x407   :  { %v6183_v50 = vpop.f32.mrf.mxu1 }
 0x408   :  { %v6120_v12 = vpop.f32.mrf.mxu0 }
 0x409   :  { %v6121_v29 = vadd.f32 %v6120_v12, %v6119_v43  ;;  %v6184_v62 = vpop.f32.mrf.mxu1 }
 0x40a   :  { %v6185_v22 = vadd.f32 %v6184_v62, %v6183_v50  ;;  %v6122_v27 = vpop.f32.mrf.mxu0 }
 0x40b   :  { %v4221_v33 = vadd.f32 %v6121_v29, %v8358_v11  ;;  %v6186_v56 = vpop.f32.mrf.mxu1 }
 0x40c   :  { %v6123_v20 = vpop.f32.mrf.mxu0 }
 0x40d   :  { %v8508_v35 = vadd.f32 %v6185_v22, %v4221_v33  ;;  %v6124_v42 = vadd.f32 %v6123_v20, %v6122_v27  ;;  %v6187_v34 = vpop.f32.mrf.mxu1 }
 0x40e   :  { %v6188_v36 = vadd.f32 %v6187_v34, %v6186_v56  ;;  %v6125_v4 = vpop.f32.mrf.mxu0 }
 0x40f   :  { %v4224_v46 = vadd.f32 %v6124_v42, %v8358_v11  ;;  %v6189_v40 = vpop.f32.mrf.mxu1 }
 0x410   :  { %v6126_v18 = vpop.f32.mrf.mxu0 }
 0x411   :  { %v8526_v24 = vadd.f32 %v6188_v36, %v4224_v46  ;;  %v6127_v7 = vadd.f32 %v6126_v18, %v6125_v4  ;;  %v6190_v53 = vpop.f32.mrf.mxu1 }
 0x412   :  { %v6191_v30 = vadd.f32 %v6190_v53, %v6189_v40  ;;  %v6128_v25 = vpop.f32.mrf.mxu0 }
 0x413   :  { %v4229_v1 = vadd.f32 %v6127_v7, %v8358_v11  ;;  %v6192_v60 = vpop.f32.mrf.mxu1 }
 0x414   :  { %v6129_v44 = vpop.f32.mrf.mxu0 }
 0x415   :  { %v8538_v49 = vadd.f32 %v6191_v30, %v4229_v1  ;;  %v6130_v16 = vadd.f32 %v6129_v44, %v6128_v25  ;;  %v6193_v23 = vpop.f32.mrf.mxu1 }
 0x416   :  { %v6194_v10 = vadd.f32 %v6193_v23, %v6192_v60  ;;  %v6131_v59 = vpop.f32.mrf.mxu0 }
 0x417   :  { %9013 = vst [vmem:[#allocation24_spill] sm:$0xff] %v8538_v49  ;;  %v4232_v38 = vadd.f32 %v6130_v16, %v8358_v11  ;;  %v6195_v8 = vpop.f32.mrf.mxu1 }
 0x418   :  { %v6132_v63 = vpop.f32.mrf.mxu0 }
 0x419   :  { %v8543_v37 = vadd.f32 %v6194_v10, %v4232_v38  ;;  %v6133_v43 = vadd.f32 %v6132_v63, %v6131_v59  ;;  %v6196_v50 = vpop.f32.mrf.mxu1 }
 0x41a   :  { %v6197_v12 = vadd.f32 %v6196_v50, %v6195_v8  ;;  %v6134_v29 = vpop.f32.mrf.mxu0 }
 0x41b   :  { %9014 = vst [vmem:[#allocation25_spill] sm:$0xff] %v8543_v37  ;;  %v4237_v62 = vadd.f32 %v6133_v43, %v8358_v11  ;;  %v6198_v22 = vpop.f32.mrf.mxu1 }
 0x41c   :  { %v6135_v27 = vpop.f32.mrf.mxu0 }
 0x41d   :  { %v8546_v33 = vadd.f32 %v6197_v12, %v4237_v62  ;;  %v6136_v56 = vadd.f32 %v6135_v27, %v6134_v29  ;;  %v6199_v20 = vpop.f32.mrf.mxu1 }
 0x41e   :  { %v6200_v42 = vadd.f32 %v6199_v20, %v6198_v22  ;;  %v6137_v34 = vpop.f32.mrf.mxu0 }
 0x41f   :  { %9015 = vst [vmem:[#allocation26_spill] sm:$0xff] %v8546_v33  ;;  %v4240_v36 = vadd.f32 %v6136_v56, %v8358_v11  ;;  %v6201_v4 = vpop.f32.mrf.mxu1 }
 0x420   :  { %v6138_v46 = vpop.f32.mrf.mxu0 }
 0x421   :  { %v8549_v40 = vadd.f32 %v6200_v42, %v4240_v36  ;;  %v6139_v18 = vadd.f32 %v6138_v46, %v6137_v34  ;;  %v6202_v7 = vpop.f32.mrf.mxu1 }
 0x422   :  { %v6140_v53 = vpop.f32.mrf.mxu0  ;;  %v6203_v25 = vadd.f32 %v6202_v7, %v6201_v4 }
 0x423   :  { %9016 = vst [vmem:[#allocation27_spill] sm:$0xff] %v8549_v40  ;;  %v4245_v30 = vadd.f32 %v6139_v18, %v8358_v11  ;;  %v8552_v1 = vpop.f32.mrf.mxu1 }
 0x424   :  { %9017 = vst [vmem:[#allocation28_spill] sm:$0xff] %v8552_v1  ;;  %v6141_v60 = vpop.f32.mrf.mxu0 }
 0x425   :  { %v8554_v44 = vadd.f32 %v6203_v25, %v4245_v30  ;;  %v8556_v16 = vadd.f32 %v6141_v60, %v6140_v53  ;;  %v8558_v23 = vpop.f32.mrf.mxu1 }
 0x426   :  { %9020 = vst [vmem:[#allocation31_spill] sm:$0xff] %v8558_v23  ;;  %v6223_v10 = vpop.f32.mrf.mxu0 }
 0x427   :  { %9018 = vst [vmem:[#allocation29_spill] sm:$0xff] %v8554_v44  ;;  %9019 = vst [vmem:[#allocation30_spill] sm:$0xff] %v8556_v16  ;;  %v8560_v59 = vpop.f32.mrf.mxu1 }
 0x428   :  { %v6224_v38 = vpop.f32.mrf.mxu0 }
 0x429   :  { %v6225_v8 = vadd.f32 %v6224_v38, %v6223_v10  ;;  %v6288_v63 = vpop.f32.mrf.mxu1 }
 0x42a   :  { %v6226_v43 = vpop.f32.mrf.mxu0 }
 0x42b   :  { %v8563_v50 = vadd.f32 %v6225_v8, %v8361_v9  ;;  %v6290_v12 = vpop.f32.mrf.mxu1 }
 0x42c   :  { %v6227_v29 = vpop.f32.mrf.mxu0 }
 0x42d   :  { %v6291_v62 = vpop.f32.mrf.mxu1 }
 0x42e   :  { %v6229_v22 = vpop.f32.mrf.mxu0  ;;  %v6292_v49 = vadd.f32 %v6291_v62, %v6290_v12 }
 0x42f   :  { %v6293_v27 = vpop.f32.mrf.mxu1 }
 0x430   :  { %v6230_v56 = vpop.f32.mrf.mxu0 }
 0x431   :  { %v6294_v20 = vpop.f32.mrf.mxu1 }
 0x432   :  { %v6232_v42 = vpop.f32.mrf.mxu0 }
 0x433   :  { %v8565_v34 = vpop.f32.mrf.mxu1 }
 0x434   :  { %v6233_v36 = vpop.f32.mrf.mxu0 }
 0x435   :  { %v6297_v4 = vpop.f32.mrf.mxu1 }
 0x436   :  { %v6235_v46 = vpop.f32.mrf.mxu0 }
 0x437   :  { %v8567_v18 = vpop.f32.mrf.mxu1 }
 0x438   :  { %v6236_v7 = vpop.f32.mrf.mxu0 }
 0x439   :  { %v8569_v53 = vpop.f32.mrf.mxu1 }
 0x43a   :  { %v6238_v9 = vpop.f32.mrf.mxu0 }
 0x43b   :  { %v8571_v30 = vpop.f32.mrf.mxu1 }
 0x43c   :  { %v6239_v25 = vpop.f32.mrf.mxu0 }
 0x43d   :  { %v8573_v60 = vpop.f32.mrf.mxu1 }
 0x43e   :  { %v6241_v10 = vpop.f32.mrf.mxu0 }
 0x43f   :  { %v8575_v38 = vpop.f32.mrf.mxu1 }
 0x440   :  { %v6242_v8 = vpop.f32.mrf.mxu0 }
 0x441   :  { %v8577_v32 = vpop.f32.mrf.mxu1 }
 0x442   :  { %v6244_v3 = vpop.f32.mrf.mxu0 }
 0x443   :  { %v8579_v0 = vpop.f32.mrf.mxu1 }
 0x444   :  { %v6245_v17 = vpop.f32.mrf.mxu0 }
 0x445   :  { %v8581_v47 = vpop.f32.mrf.mxu1 }
 0x446   :  { %v6247_v14 = vpop.f32.mrf.mxu0 }
 0x447   :  { %v8583_v13 = vpop.f32.mrf.mxu1 }
 0x448   :  { %v6248_v19 = vpop.f32.mrf.mxu0 }
 0x449   :  { %v6249_v45 = vadd.f32 %v6248_v19, %v6247_v14  ;;  %v8592_v51 = vpop.f32.mrf.mxu1 }
 0x44a   :  { %v8585_v57 = vpop.f32.mrf.mxu0 }
 0x44b   :  { %v8588_v21 = vadd.f32 %v6249_v45, %v8508_v35  ;;  %v8598_v39 = vpop.f32.mrf.mxu1 }
 0x44c   :  { %v8590_v28 = vpop.f32.mrf.mxu0  ;;  %9022 = vst [vmem:[#allocation33_spill] sm:$0xff] %v8598_v39 }
 0x44d   :  { %9021 = vst [vmem:[#allocation32_spill] sm:$0xff] %v8588_v21  ;;  %v8604_v19 = vpop.f32.mrf.mxu1 }
 0x44e   :  { %v8594_v48 = vpop.f32.mrf.mxu0  ;;  %9023 = vst [vmem:[#allocation34_spill] sm:$0xff] %v8604_v19  ;;  %v6228_v19 = vadd.f32 %v6227_v29, %v6226_v43 }
 0x44f   :  { %v8610_v35 = vpop.f32.mrf.mxu1 }
 0x450   :  { %v8596_v26 = vpop.f32.mrf.mxu0  ;;  %9026 = vst [vmem:[#allocation37_spill] sm:$0xff] %v8610_v35 }
 0x451   :  { %v8616_v40 = vpop.f32.mrf.mxu1 }
 0x452   :  { %v8600_v6 = vpop.f32.mrf.mxu0  ;;  %9029 = vst [vmem:[#allocation40_spill] sm:$0xff] %v8616_v40  ;;  %v4386_v40 = vadd.f32 %v6228_v19, %v8371_v31  ;;  %v6298_v31 = vadd.f32 %v6297_v4, %v8565_v34 }
 0x453   :  { %v8622_v1 = vpop.f32.mrf.mxu1 }
 0x454   :  { %v8602_v55 = vpop.f32.mrf.mxu0  ;;  %9032 = vst [vmem:[#allocation43_spill] sm:$0xff] %v8622_v1  ;;  %v6295_v1 = vadd.f32 %v6294_v20, %v6293_v27  ;;  %v4483_v12 = vadd.f32 %v6292_v49, %v4386_v40 }
 0x455   :  { %v8628_v35 = vpop.f32.mrf.mxu1 }
 0x456   :  { %v8606_v14 = vpop.f32.mrf.mxu0 }
 0x457   :  { %9024 = vst [vmem:[#allocation35_spill] sm:$0xff] %v8606_v14  ;;  %v6231_v14 = vadd.f32 %v6230_v56, %v6229_v22  ;;  %v8634_v43 = vpop.f32.mrf.mxu1  ;;  %v4216_v22 = vadd.f32 %v8433_v52, %v8358_v11 }
 0x458   :  { %v8608_v45 = vpop.f32.mrf.mxu0 }
 0x459   :  { %9025 = vst [vmem:[#allocation36_spill] sm:$0xff] %v8608_v45  ;;  %v6234_v45 = vadd.f32 %v6233_v36, %v6232_v42  ;;  %v6240_v42 = vadd.f32 %v6239_v25, %v6238_v9  ;;  %v8647_v52 = vpop.f32.mrf.mxu1 }
 0x45a   :  { %v8612_v44 = vpop.f32.mrf.mxu0 }
 0x45b   :  { %9027 = vst [vmem:[#allocation38_spill] sm:$0xff] %v8612_v44  ;;  %v6237_v44 = vadd.f32 %v6236_v7, %v6235_v46  ;;  %v6310_v7 = vadd.f32 %v8581_v47, %v8579_v0  ;;  %v6258_v47 = vadd.f32 %v8602_v55, %v8600_v6 }
 0x45c   :  { %v8614_v16 = vpop.f32.mrf.mxu0 }
 0x45d   :  { %9028 = vst [vmem:[#allocation39_spill] sm:$0xff] %v8614_v16  ;;  %v6289_v16 = vadd.f32 %v6288_v63, %v8560_v59  ;;  %v4399_v56 = vadd.f32 %v6237_v44, %v8407_v58  ;;  %v6243_v59 = vadd.f32 %v6242_v8, %v6241_v10  ;;  %v6313_v8 = vadd.f32 %v8592_v51, %v8583_v13 }
 0x45e   :  { %v8618_v33 = vpop.f32.mrf.mxu0 }
 0x45f   :  { %9030 = vst [vmem:[#allocation41_spill] sm:$0xff] %v8618_v33  ;;  %v4391_v33 = vadd.f32 %v6231_v14, %v8383_v5  ;;  %v4480_v29 = vadd.f32 %v6289_v16, %v8563_v50  ;;  %v6301_v16 = vadd.f32 %v8569_v53, %v8567_v18  ;;  %v6246_v50 = vadd.f32 %v6245_v17, %v6244_v3 }
 0x460   :  { %v8620_v23 = vpop.f32.mrf.mxu0  ;;  %v4407_v49 = vadd.f32 %v6243_v59, %v8431_v15  ;;  %v6252_v53 = vadd.f32 %v8590_v28, %v8585_v57 }
 0x461   :  { %9031 = vst [vmem:[#allocation42_spill] sm:$0xff] %v8620_v23  ;;  %v4488_v5 = vadd.f32 %v6295_v1, %v4391_v33  ;;  %v4402_v33 = vadd.f32 %v6240_v42, %v8419_v61  ;;  %v4496_v1 = vadd.f32 %v6301_v16, %v4399_v56  ;;  %v6307_v61 = vadd.f32 %v8577_v32, %v8575_v38  ;;  %v9035_v56 = vld [vmem:[#allocation32_spill] sm:$0xff] }
 0x462   :  { %v8624_v39 = vpop.f32.mrf.mxu0  ;;  %v6255_v32 = vadd.f32 %v8596_v26, %v8594_v48  ;;  %v4512_v55 = vadd.f32 %v6313_v8, %v9035_v56  ;;  %v9049_v8 = vld [vmem:[#allocation27_spill] sm:$0xff] }
 0x463   :  { %9033 = vst [vmem:[#allocation44_spill] sm:$0xff] %v8624_v39  ;;  %v4394_v39 = vadd.f32 %v6234_v45, %v8395_v54  ;;  %v6182_v54 = vadd.f32 %v8484_v2, %v8482_v41  ;;  %v4504_v9 = vadd.f32 %v6307_v61, %v4407_v49 }
 0x464   :  { %v8626_v37 = vpop.f32.mrf.mxu0 }
 0x465   :  { %v4491_v44 = vadd.f32 %v6298_v31, %v4394_v39  ;;  %v4313_v20 = vadd.f32 %v6182_v54, %v4216_v22  ;;  %v9034_v22 = vld [vmem:[#allocation24_spill] sm:$0xff]  ;;  %v9036_v31 = vld [vmem:[#allocation37_spill] sm:$0xff] }
 0x466   :  { %v6597_v21 = vpop.f32.mrf.mxu0  ;;  %v4423_v51 = vadd.f32 %v6255_v32, %v9034_v22  ;;  %v9038_v54 = vld [vmem:[#allocation25_spill] sm:$0xff] }
 0x467   :  { %v8649_v58 = vadd.f32 %v6597_v21, %v4488_v5  ;;  %v6304_v21 = vadd.f32 %v8573_v60, %v8571_v30  ;;  %v4410_v15 = vadd.f32 %v6246_v50, %v4313_v20  ;;  %v9037_v5 = vld [vmem:[#allocation40_spill] sm:$0xff]  ;;  %v4426_v16 = vadd.f32 %v6258_v47, %v9038_v54  ;;  %v9039_v50 = vld [vmem:[#allocation35_spill] sm:$0xff] }
 0x468   :  { %v4576_v23 = vpop.f32.mrf.mxu0  ;;  %v9042_v20 = vld [vmem:[#allocation39_spill] sm:$0xff] }
 0x469   :  { %v8641_v36 = vadd.f32 %v4576_v23, %v4480_v29  ;;  %v6326_v23 = vpop.f32.mrf.mxu1  ;;  %v4670_v34 = vmul.f32 %v8649_v58, %v8649_v58  ;;  %v4499_v38 = vadd.f32 %v6304_v21, %v4402_v33  ;;  %v4507_v28 = vadd.f32 %v6310_v7, %v4410_v15  ;;  %v9045_v15 = vld [vmem:[#allocation28_spill] sm:$0xff] }
 0x46a   :  { %v6598_v63 = vpop.f32.mrf.mxu0  ;;  %v4418_v29 = vadd.f32 %v6252_v53, %v8526_v24  ;;  %v9040_v24 = vld [vmem:[#allocation36_spill] sm:$0xff] }
 0x46b   :  { %v4668_v41 = vmul.f32 %v8641_v36, %v8641_v36  ;;  %v8657_v2 = vadd.f32 %v6598_v63, %v4491_v44  ;;  %v6327_v26 = vpop.f32.mrf.mxu1  ;;  %v9041_v44 = vld [vmem:[#allocation38_spill] sm:$0xff] }
 0x46c   :  { %v4579_v62 = vpop.f32.mrf.mxu0  ;;  %v6264_v33 = vadd.f32 %v9042_v20, %v9041_v44  ;;  %v6328_v56 = vadd.f32 %v6327_v26, %v6326_v23 }
 0x46d   :  { %v8651_v27 = vadd.f32 %v4579_v62, %v4483_v12  ;;  %v4671_v25 = vmul.f32 %v8657_v2, %v8657_v2  ;;  %v6319_v12 = vadd.f32 %v9037_v5, %v9036_v31  ;;  %v6261_v62 = vadd.f32 %v9040_v24, %v9039_v50 }
 0x46e   :  { %v6601_v40 = vpop.f32.mrf.mxu0  ;;  %v4434_v47 = vadd.f32 %v6264_v33, %v9049_v8 }
 0x46f   :  { %v4655_v17 = vadd.f32 %v8651_v27, %v8641_v36  ;;  %v4669_v39 = vmul.f32 %v8651_v27, %v8651_v27  ;;  %v8685_v0 = vadd.f32 %v6601_v40, %v4504_v9  ;;  %v9043_v40 = vld [vmem:[#allocation33_spill] sm:$0xff]  ;;  %v4520_v7 = vadd.f32 %v6319_v12, %v4423_v51  ;;  %v9052_v12 = vld [vmem:[#allocation30_spill] sm:$0xff] }
 0x470   :  { %v4592_v3 = vpop.f32.mrf.mxu0  ;;  %v4248_v23 = vadd.f32 %v9052_v12, %v8358_v11  ;;  %v4531_v50 = vadd.f32 %v6328_v56, %v4434_v47 }
 0x471   :  { %v4656_v4 = vadd.f32 %v4655_v17, %v8649_v58  ;;  %v4676_v46 = vadd.f32 %v4669_v39, %v4668_v41  ;;  %v8670_v18 = vadd.f32 %v4592_v3, %v4496_v1  ;;  %v9044_v1 = vld [vmem:[#allocation34_spill] sm:$0xff]  ;;  %v6329_v17 = vpop.f32.mrf.mxu1  ;;  %v4674_v39 = vmul.f32 %v8685_v0, %v8685_v0  ;;  %v9046_v3 = vld [vmem:[#allocation31_spill] sm:$0xff] }
 0x472   :  { %v6602_v30 = vpop.f32.mrf.mxu0  ;;  %v6316_v41 = vadd.f32 %v9044_v1, %v9043_v40  ;;  %v9054_v1 = vld [vmem:[#allocation44_spill] sm:$0xff] }
 0x473   :  { %v4677_v60 = vadd.f32 %v4676_v46, %v4670_v34  ;;  %v4657_v10 = vadd.f32 %v4656_v4, %v8657_v2  ;;  %v4672_v19 = vmul.f32 %v8670_v18, %v8670_v18  ;;  %v8695_v42 = vadd.f32 %v6602_v30, %v4507_v28  ;;  %v9047_v4 = vld [vmem:[#allocation43_spill] sm:$0xff] }
 0x474   :  { %v4595_v57 = vpop.f32.mrf.mxu0  ;;  %v6206_v34 = vadd.f32 %v9046_v3, %v9045_v15  ;;  %v6322_v46 = vadd.f32 %v8628_v35, %v9047_v4  ;;  %v6325_v35 = vadd.f32 %v8647_v52, %v8634_v43 }
 0x475   :  { %v4658_v48 = vadd.f32 %v4657_v10, %v8670_v18  ;;  %v4678_v14 = vadd.f32 %v4677_v60, %v4671_v25  ;;  %v8690_v45 = vadd.f32 %v4595_v57, %v4499_v38  ;;  %v4675_v9 = vmul.f32 %v8695_v42, %v8695_v42  ;;  %v9048_v10 = vld [vmem:[#allocation26_spill] sm:$0xff] }
 0x476   :  { %v6605_v13 = vpop.f32.mrf.mxu0  ;;  %v4515_v60 = vadd.f32 %v6316_v41, %v4418_v29  ;;  %v4431_v38 = vadd.f32 %v6261_v62, %v9048_v10  ;;  %v4523_v57 = vadd.f32 %v6322_v46, %v4426_v16  ;;  %v6270_v41 = vadd.f32 %v8626_v37, %v9054_v1 }
 0x477   :  { %v4679_v6 = vadd.f32 %v4678_v14, %v4672_v19  ;;  %v4659_v59 = vadd.f32 %v4658_v48, %v8690_v45  ;;  %v4673_v63 = vmul.f32 %v8690_v45, %v8690_v45  ;;  %v8723_v28 = vadd.f32 %v6605_v13, %v4520_v7  ;;  %v6330_v19 = vpop.f32.mrf.mxu1 }
 0x478   :  { %v4608_v49 = vpop.f32.mrf.mxu0  ;;  %v4528_v54 = vadd.f32 %v6325_v35, %v4431_v38  ;;  %v4345_v46 = vadd.f32 %v6206_v34, %v4248_v23  ;;  %v6331_v7 = vadd.f32 %v6330_v19, %v6329_v17 }
 0x479   :  { %v4660_v21 = vadd.f32 %v4659_v59, %v8685_v0  ;;  %v4680_v61 = vadd.f32 %v4679_v6, %v4673_v63  ;;  %v8716_v53 = vadd.f32 %v4608_v49, %v4512_v55  ;;  %v9050_v55 = vld [vmem:[#allocation41_spill] sm:$0xff]  ;;  %v9051_v6 = vld [vmem:[#allocation42_spill] sm:$0xff]  ;;  %v4914_v26 = vmul.f32 %v8723_v28, %v8723_v28  ;;  %v6332_v24 = vpop.f32.mrf.mxu1 }
 0x47a   :  { %v6606_v32 = vpop.f32.mrf.mxu0  ;;  %v6267_v29 = vadd.f32 %v9051_v6, %v9050_v55  ;;  %v9053_v49 = vld [vmem:[#allocation29_spill] sm:$0xff]  ;;  %v4442_v38 = vadd.f32 %v6270_v41, %v4345_v46  ;;  %v9055_v6 = vld [vmem:[#allocation7_spill] sm:$0xff]  ;;  %v9065_v41 = vld [vmem:[#allocation16_spill] sm:$0xff] }
 0x47b   :  { %v4661_v30 = vadd.f32 %v4660_v21, %v8695_v42  ;;  %v4681_v25 = vadd.f32 %v4680_v61, %v4674_v39  ;;  %v4912_v59 = vmul.f32 %v8716_v53, %v8716_v53  ;;  %v8733_v63 = vadd.f32 %v6606_v32, %v4523_v57 }
 0x47c   :  { %v4611_v48 = vpop.f32.mrf.mxu0  ;;  %v4439_v40 = vadd.f32 %v6267_v29, %v9053_v49 }
 0x47d   :  { %v4662_v14 = vrot.slane %v4661_v30, 4  ;;  %v4682_v22 = vadd.f32 %v4681_v25, %v4675_v9  ;;  %v8727_v51 = vadd.f32 %v4611_v48, %v4515_v60  ;;  %v4915_v11 = vmul.f32 %v8733_v63, %v8733_v63 }
 0x47e   :  { %v6609_v13 = vpop.f32.mrf.mxu0  ;;  %v4536_v8 = vadd.f32 %v6331_v7, %v4439_v40  ;;  %v9064_v40 = vld [vmem:[#allocation15_spill] sm:$0xff]  ;;  %v9069_v7 = vld [vmem:[#allocation20_spill] sm:$0xff] }
 0x47f   :  { %v4663_v31 = vadd.f32 %v4662_v14, %v4661_v30  ;;  %v4683_v5 = vrot.slane %v4682_v22, 4  ;;  %v4899_v43 = vadd.f32 %v8727_v51, %v8716_v53  ;;  %v4913_v52 = vmul.f32 %v8727_v51, %v8727_v51  ;;  %v6333_v30 = vpop.f32.mrf.mxu1 }
 0x480   :  { %v4624_v16 = vpop.f32.mrf.mxu0  ;;  %v6334_v17 = vadd.f32 %v6333_v30, %v6332_v24  ;;  %v8759_v35 = vadd.f32 %v6609_v13, %v4536_v8  ;;  %v9057_v13 = vld [vmem:[#allocation8_spill] sm:$0xff] }
 0x481   :  { %v4664_v62 = vrot.slane %v4663_v31, 2  ;;  %v4684_v44 = vadd.f32 %v4683_v5, %v4682_v22  ;;  %v4900_v20 = vadd.f32 %v4899_v43, %v8723_v28  ;;  %v4920_v33 = vadd.f32 %v4913_v52, %v4912_v59  ;;  %v9056_v5 = vld [vmem:[#allocation22_spill] sm:$0xff]  ;;  %v9058_v52 = vld [vmem:[#allocation9_spill] sm:$0xff]  ;;  %v9061_v24 = vld [vmem:[#allocation12_spill] sm:$0xff] }
 0x482   :  { %v8749_v39 = vadd.f32 %v4624_v16, %v4528_v54  ;;  %v6610_v21 = vpop.f32.mrf.mxu0  ;;  %v4539_v56 = vadd.f32 %v6334_v17, %v4442_v38  ;;  %v4918_v29 = vmul.f32 %v8759_v35, %v8759_v35  ;;  %v9060_v16 = vld [vmem:[#allocation11_spill] sm:$0xff] }
 0x483   :  { %v4665_v61 = vadd.f32 %v4664_v62, %v4663_v31  ;;  %v4685_v15 = vrot.slane %v4684_v44, 2  ;;  %v4921_v3 = vadd.f32 %v4920_v33, %v4914_v26  ;;  %v4901_v4 = vadd.f32 %v4900_v20, %v8733_v63  ;;  %v9059_v26 = vld [vmem:[#allocation10_spill] sm:$0xff] }
 0x484   :  { %v4916_v32 = vmul.f32 %v8749_v39, %v8749_v39  ;;  %v4627_v9 = vpop.f32.mrf.mxu0  ;;  %v8765_v59 = vadd.f32 %v6610_v21, %v4539_v56  ;;  %v9063_v33 = vld [vmem:[#allocation14_spill] sm:$0xff]  ;;  %v9066_v21 = vld [vmem:[#allocation17_spill] sm:$0xff] }
 0x485   :  { %v4686_v25 = vadd.f32 %v4685_v15, %v4684_v44  ;;  %v4902_v37 = vadd.f32 %v4901_v4, %v8749_v39  ;;  %v4922_v60 = vadd.f32 %v4921_v3, %v4915_v11  ;;  %v8755_v10 = vadd.f32 %v4627_v9, %v4531_v50  ;;  %v9062_v44 = vld [vmem:[#allocation13_spill] sm:$0xff]  ;;  %v9067_v15 = vld [vmem:[#allocation18_spill] sm:$0xff]  ;;  %v9068_v4 = vld [vmem:[#allocation19_spill] sm:$0xff] }
 0x486   :  { %v4666_v47 = vrot.slane %v4665_v61, 1  ;;  %v4919_v12 = vmul.f32 %v8765_v59, %v8765_v59  ;;  %v9070_v9 = vld [vmem:[#allocation21_spill] sm:$0xff] }
 0x487   :  { %v4687_v57 = vrot.slane %v4686_v25, 1  ;;  %v4923_v48 = vadd.f32 %v4922_v60, %v4916_v32  ;;  %v4917_v34 = vmul.f32 %v8755_v10, %v8755_v10  ;;  %v4903_v19 = vadd.f32 %v4902_v37, %v8755_v10 }
 0x488   :  { %v4667_v14 = vadd.f32 %v4666_v47, %v4665_v61 }
 0x489   :  { %v4688_v22 = vadd.f32 %v4687_v57, %v4686_v25  ;;  %v4924_v55 = vadd.f32 %v4923_v48, %v4917_v34  ;;  %v4904_v31 = vadd.f32 %v4903_v19, %v8759_v35  ;;  %v9071_v25 = vld [vmem:[#allocation23_spill] sm:$0xff]  ;;  %v9072_v19 = vld [vmem:[#allocation6_spill] sm:$0xff] }
 0x48a   :  { %6644 = vmatmul.mubr.f32.vlgmr.msra.gmra.mxu1 %v4667_v14 }
 0x48b   :  { %6682 = vmatpush3.msra.mxu1 %v9055_v6  ;;  %6679 = vmatmul.mubr.f32.vlgmr.msra.gmra.mxu0 %v4688_v22  ;;  %v4925_v43 = vadd.f32 %v4924_v55, %v4918_v29  ;;  %v4905_v23 = vadd.f32 %v4904_v31, %v8765_v59  ;;  %v8840_v22 = vld [vmem:[%s8956_s7] sm:$0x1] }
 0x48c   :  { %6683 = vmatprep.subr.mxu1 %v9056_v5  ;;  %6717 = vmatpush3.msra.mxu0 %v9055_v6 }
 0x48d   :  { %6684 = vmatpush3.msra.mxu1 %v9057_v13  ;;  %6718 = vmatprep.subr.mxu0 %v9056_v5  ;;  %v4926_v54 = vadd.f32 %v4925_v43, %v4919_v12  ;;  %v4906_v50 = vrot.slane %v4905_v23, 4 }
 0x48e   :  { %6685 = vmatprep.subr.mxu1 %v9056_v5  ;;  %6719 = vmatpush3.msra.mxu0 %v9057_v13 }
 0x48f   :  { %6686 = vmatpush3.msra.mxu1 %v9058_v52  ;;  %6720 = vmatprep.subr.mxu0 %v9056_v5  ;;  %v4927_v62 = vrot.slane %v4926_v54, 4  ;;  %v4907_v20 = vadd.f32 %v4906_v50, %v4905_v23 }
 0x490   :  { %6687 = vmatprep.subr.mxu1 %v9056_v5  ;;  %6721 = vmatpush3.msra.mxu0 %v9058_v52 }
 0x491   :  { %6688 = vmatpush3.msra.mxu1 %v9059_v26  ;;  %6722 = vmatprep.subr.mxu0 %v9056_v5  ;;  %v4928_v49 = vadd.f32 %v4927_v62, %v4926_v54  ;;  %v4908_v1 = vrot.slane %v4907_v20, 2 }
 0x492   :  { %6689 = vmatprep.subr.mxu1 %v9056_v5  ;;  %6723 = vmatpush3.msra.mxu0 %v9059_v26 }
 0x493   :  { %6690 = vmatpush3.msra.mxu1 %v9060_v16  ;;  %6724 = vmatprep.subr.mxu0 %v9056_v5  ;;  %v4929_v11 = vrot.slane %v4928_v49, 2  ;;  %v4909_v61 = vadd.f32 %v4908_v1, %v4907_v20 }
 0x494   :  { %6691 = vmatprep.subr.mxu1 %v9056_v5  ;;  %6725 = vmatpush3.msra.mxu0 %v9060_v16 }
 0x495   :  { %6692 = vmatpush3.msra.mxu1 %v9061_v24  ;;  %6726 = vmatprep.subr.mxu0 %v9056_v5  ;;  %v4930_v3 = vadd.f32 %v4929_v11, %v4928_v49  ;;  %v4910_v46 = vrot.slane %v4909_v61, 1 }
 0x496   :  { %6693 = vmatprep.subr.mxu1 %v9056_v5  ;;  %6727 = vmatpush3.msra.mxu0 %v9061_v24 }
 0x497   :  { %6694 = vmatpush3.msra.mxu1 %v9062_v44  ;;  %6728 = vmatprep.subr.mxu0 %v9056_v5  ;;  %v4931_v32 = vrot.slane %v4930_v3, 1  ;;  %v4911_v30 = vadd.f32 %v4910_v46, %v4909_v61 }
 0x498   :  { %6695 = vmatprep.subr.mxu1 %v9056_v5  ;;  %6729 = vmatpush3.msra.mxu0 %v9062_v44 }
 0x499   :  { %6696 = vmatpush3.msra.mxu1 %v9063_v33  ;;  %6730 = vmatprep.subr.mxu0 %v9056_v5  ;;  %v4932_v37 = vadd.f32 %v4931_v32, %v4930_v3 }
 0x49a   :  { %6697 = vmatprep.subr.mxu1 %v9056_v5  ;;  %6731 = vmatpush3.msra.mxu0 %v9063_v33 }
 0x49b   :  { %6698 = vmatpush3.msra.mxu1 %v9064_v40  ;;  %6732 = vmatprep.subr.mxu0 %v9056_v5 }
 0x49c   :  { %6699 = vmatprep.subr.mxu1 %v9056_v5  ;;  %6733 = vmatpush3.msra.mxu0 %v9064_v40 }
 0x49d   :  { %6700 = vmatpush3.msra.mxu1 %v9065_v41  ;;  %6734 = vmatprep.subr.mxu0 %v9056_v5 }
 0x49e   :  { %6701 = vmatprep.subr.mxu1 %v9056_v5  ;;  %6735 = vmatpush3.msra.mxu0 %v9065_v41 }
 0x49f   :  { %6702 = vmatpush3.msra.mxu1 %v9066_v21  ;;  %6736 = vmatprep.subr.mxu0 %v9056_v5 }
 0x4a0   :  { %6703 = vmatprep.subr.mxu1 %v9056_v5  ;;  %6737 = vmatpush3.msra.mxu0 %v9066_v21 }
 0x4a1   :  { %6704 = vmatpush3.msra.mxu1 %v9067_v15  ;;  %6738 = vmatprep.subr.mxu0 %v9056_v5 }
 0x4a2   :  { %6705 = vmatprep.subr.mxu1 %v9056_v5  ;;  %6739 = vmatpush3.msra.mxu0 %v9067_v15 }
 0x4a3   :  { %6706 = vmatpush3.msra.mxu1 %v9068_v4  ;;  %6740 = vmatprep.subr.mxu0 %v9056_v5 }
 0x4a4   :  { %6707 = vmatprep.subr.mxu1 %v9056_v5  ;;  %6741 = vmatpush3.msra.mxu0 %v9068_v4 }
 0x4a5   :  { %6708 = vmatpush3.msra.mxu1 %v9069_v7  ;;  %6742 = vmatprep.subr.mxu0 %v9056_v5 }
 0x4a6   :  { %6709 = vmatprep.subr.mxu1 %v9056_v5  ;;  %6743 = vmatpush3.msra.mxu0 %v9069_v7 }
 0x4a7   :  { %6710 = vmatpush3.msra.mxu1 %v9070_v9  ;;  %6744 = vmatprep.subr.mxu0 %v9056_v5 }
 0x4a8   :  { %6711 = vmatprep.subr.mxu1 %v9056_v5  ;;  %6713 = vmatprep.mubr.msk.f32.mxu1 %vm6977_vm6, %v9056_v5 }
 0x4a9   :  { %6712 = vmatpush3.msra.mxu1 %v9071_v25  ;;  %6745 = vmatpush3.msra.mxu0 %v9070_v9 }
 0x4aa   :  { %6714 = vmatmul.mubr.f32.vlgmr.msra.gmra.mxu1 %v4911_v30  ;;  %6746 = vmatprep.subr.mxu0 %v9056_v5 }
 0x4ab   :  { %6747 = vmatpush3.msra.mxu0 %v9071_v25  ;;  %6748 = vmatprep.mubr.msk.f32.mxu0 %vm6977_vm6, %v9056_v5 }
 0x4ac   :  { %6749 = vmatmul.mubr.f32.vlgmr.msra.gmra.mxu0 %v4932_v37 }
 0x54a   :  { %v4755_v60 = vpop.f32.mrf.mxu1 }
 0x54b   :  { %v4829_v38 = vmul.f32 %v4755_v60, %v4755_v60  ;;  %v4825_v8 = vpop.f32.mrf.mxu0  ;;  %v4837_v14 = vrot.slane %v4755_v60, %v9072_v19 }
 0x54c   :  { %v6645_v47 = vpop.f32.mrf.mxu1 }
 0x54d   :  { %v6680_v57 = vpop.f32.mrf.mxu0  ;;  %v4830_v48 = vsub.f32 %v4825_v8, %v4829_v38  ;;  %v4838_v6 = vsub.f32 %v8641_v36, %v4837_v14  ;;  %v4839_v29 = vsub.f32 %v8651_v27, %v4837_v14  ;;  %v4840_v31 = vsub.f32 %v8649_v58, %v4837_v14  ;;  %v8855_v36 = vld [vmem:[%s8957_s8] ss:$0 sm:$0xff] }
 0x54e   :  { %v4841_v5 = vsub.f32 %v8657_v2, %v4837_v14  ;;  %v4842_v43 = vsub.f32 %v8670_v18, %v4837_v14  ;;  %v4843_v52 = vsub.f32 %v8690_v45, %v4837_v14  ;;  %v4844_v12 = vsub.f32 %v8685_v0, %v4837_v14 }
 0x54f   :  { %v4831_v34 = vmax.f32 %v4830_v48, 0.0  ;;  %v4845_v23 = vsub.f32 %v8695_v42, %v4837_v14 }
 0x551   :  { %v4832_v17 = vadd.f32 1e-05, %v4831_v34 }
 0x553   :  { %6966 = vrsqrt.f32 %v4832_v17 }
 0x560   :  { %v6967_v56 = vpop.eup %6966 }
 0x561   :  { %v4847_v55 = vmul.f32 %v6967_v56, %v8840_v22 }
 0x563   :  { %v4851_v13 = vrot.slane %v4847_v55, %v9072_v19 }
 0x565   :  { %v4852_v27 = vmul.f32 %v4851_v13, %v4838_v6  ;;  %v4853_v26 = vmul.f32 %v4851_v13, %v4839_v29  ;;  %v4854_v58 = vmul.f32 %v4851_v13, %v4840_v31  ;;  %v4855_v54 = vmul.f32 %v4851_v13, %v4841_v5 }
 0x566   :  { %v4856_v2 = vmul.f32 %v4851_v13, %v4842_v43  ;;  %v4857_v16 = vmul.f32 %v4851_v13, %v4843_v52  ;;  %v4858_v50 = vmul.f32 %v4851_v13, %v4844_v12  ;;  %v4859_v24 = vmul.f32 %v4851_v13, %v4845_v23 }
 0x567   :  { %v4867_v18 = vadd.f32 %v8855_v36, %v4852_v27  ;;  %v4868_v45 = vadd.f32 %v8855_v36, %v4853_v26  ;;  %v4869_v0 = vadd.f32 %v8855_v36, %v4854_v58  ;;  %v4870_v42 = vadd.f32 %v8855_v36, %v4855_v54 }
 0x568   :  { %v4871_v62 = vadd.f32 %v8855_v36, %v4856_v2  ;;  %v4872_v44 = vadd.f32 %v8855_v36, %v4857_v16  ;;  %v4873_v20 = vadd.f32 %v8855_v36, %v4858_v50  ;;  %v4874_v33 = vadd.f32 %v8855_v36, %v4859_v24 }
 0x569   :  { %vm4875_vm6 = vcmp.ge.f32.partialorder %v4867_v18, 0.0  ;;  %vm4876_vm8 = vcmp.ge.f32.partialorder %v4868_v45, 0.0  ;;  %vm4877_vm9 = vcmp.ge.f32.partialorder %v4869_v0, 0.0  ;;  %vm4878_vm10 = vcmp.ge.f32.partialorder %v4870_v42, 0.0 }
 0x56a   :  { %v4999_v49 = vpop.f32.mrf.mxu1  ;;  %vm4879_vm11 = vcmp.ge.f32.partialorder %v4871_v62, 0.0  ;;  %vm4880_vm12 = vcmp.ge.f32.partialorder %v4872_v44, 0.0  ;;  %vm4881_vm13 = vcmp.ge.f32.partialorder %v4873_v20, 0.0  ;;  %vm4882_vm14 = vcmp.ge.f32.partialorder %v4874_v33, 0.0 }
 0x56b   :  { %v4883_v41 = vmul.f32 0.2, %v4867_v18  ;;  %v4884_v11 = vmul.f32 0.2, %v4868_v45  ;;  %v4885_v21 = vmul.f32 0.2, %v4869_v0  ;;  %v5073_v4 = vmul.f32 %v4999_v49, %v4999_v49 }
 0x56c   :  { %v6715_v40 = vpop.f32.mrf.mxu1  ;;  %v5069_v1 = vpop.f32.mrf.mxu0  ;;  %v4886_v61 = vmul.f32 0.2, %v4870_v42  ;;  %v4887_v15 = vmul.f32 0.2, %v4871_v62  ;;  %v4888_v3 = vmul.f32 0.2, %v4872_v44  ;;  %v5081_v17 = vrot.slane %v4999_v49, %v9072_v19 }
 0x56d   :  { %v4889_v7 = vmul.f32 0.2, %v4873_v20  ;;  %v4890_v32 = vmul.f32 0.2, %v4874_v33  ;;  %v4891_v9 = vsel %vm4875_vm6, %v4867_v18, %v4883_v41  ;;  %v4892_v30 = vsel %vm4876_vm8, %v4868_v45, %v4884_v11 }
 0x56e   :  { %v6750_v46 = vpop.f32.mrf.mxu0  ;;  %v4893_v25 = vsel %vm4877_vm9, %v4869_v0, %v4885_v21  ;;  %v4894_v37 = vsel %vm4878_vm10, %v4870_v42, %v4886_v61  ;;  %v4895_v60 = vsel %vm4879_vm11, %v4871_v62, %v4887_v15  ;;  %v4896_v38 = vsel %vm4880_vm12, %v4872_v44, %v4888_v3  ;;  %5135 = vst [vmem:[%s8958_s10] sm:$0xff] %v4891_v9 }
 0x56f   :  { %5136 = vst [vmem:[%s8958_s10 + $0x8] sm:$0xff] %v4892_v30  ;;  %v4897_v8 = vsel %vm4881_vm13, %v4873_v20, %v4889_v7  ;;  %v4898_v47 = vsel %vm4882_vm14, %v4874_v33, %v4890_v32  ;;  %5137 = vst [vmem:[%s8958_s10 + $0x10] sm:$0xff] %v4893_v25  ;;  %v5074_v57 = vsub.f32 %v5069_v1, %v5073_v4 }
 0x570   :  { %5138 = vst [vmem:[%s8958_s10 + $0x18] sm:$0xff] %v4894_v37  ;;  %5139 = vst [vmem:[%s8958_s10 + $0x20] sm:$0xff] %v4895_v60  ;;  %v5082_v55 = vsub.f32 %v8716_v53, %v5081_v17  ;;  %v5083_v6 = vsub.f32 %v8727_v51, %v5081_v17  ;;  %v5084_v29 = vsub.f32 %v8723_v28, %v5081_v17 }
 0x571   :  { %5140 = vst [vmem:[%s8958_s10 + $0x28] sm:$0xff] %v4896_v38  ;;  %5141 = vst [vmem:[%s8958_s10 + $0x30] sm:$0xff] %v4897_v8  ;;  %v5075_v48 = vmax.f32 %v5074_v57, 0.0  ;;  %v5085_v31 = vsub.f32 %v8733_v63, %v5081_v17  ;;  %v5086_v13 = vsub.f32 %v8749_v39, %v5081_v17  ;;  %v5087_v43 = vsub.f32 %v8755_v10, %v5081_v17 }
 0x572   :  { %5142 = vst [vmem:[%s8958_s10 + $0x38] sm:$0xff] %v4898_v47  ;;  %v5088_v52 = vsub.f32 %v8759_v35, %v5081_v17  ;;  %v5089_v12 = vsub.f32 %v8765_v59, %v5081_v17 }
 0x573   :  { %v5076_v34 = vadd.f32 1e-05, %v5075_v48 }
 0x575   :  { %6968 = vrsqrt.f32 %v5076_v34 }
 0x582   :  { %v6969_v14 = vpop.eup %6968 }
 0x583   :  { %v5090_v56 = vmul.f32 %v6969_v14, %v8840_v22 }
 0x585   :  { %v5094_v5 = vrot.slane %v5090_v56, %v9072_v19 }
 0x587   :  { %v5095_v23 = vmul.f32 %v5094_v5, %v5082_v55  ;;  %v5096_v22 = vmul.f32 %v5094_v5, %v5083_v6  ;;  %v5097_v27 = vmul.f32 %v5094_v5, %v5084_v29  ;;  %v5098_v53 = vmul.f32 %v5094_v5, %v5085_v31 }
 0x588   :  { %v5099_v26 = vmul.f32 %v5094_v5, %v5086_v13  ;;  %v5100_v51 = vmul.f32 %v5094_v5, %v5087_v43  ;;  %v5101_v58 = vmul.f32 %v5094_v5, %v5088_v52  ;;  %v5102_v28 = vmul.f32 %v5094_v5, %v5089_v12 }
 0x589   :  { %v5103_v63 = vadd.f32 %v8855_v36, %v5095_v23  ;;  %v5104_v19 = vadd.f32 %v8855_v36, %v5096_v22  ;;  %v5105_v39 = vadd.f32 %v8855_v36, %v5097_v27  ;;  %v5106_v10 = vadd.f32 %v8855_v36, %v5098_v53 }
 0x58a   :  { %v5107_v35 = vadd.f32 %v8855_v36, %v5099_v26  ;;  %v5108_v59 = vadd.f32 %v8855_v36, %v5100_v51  ;;  %v5109_v54 = vadd.f32 %v8855_v36, %v5101_v58  ;;  %v5110_v2 = vadd.f32 %v8855_v36, %v5102_v28 }
 0x58b   :  { %vm5111_vm15 = vcmp.ge.f32.partialorder %v5103_v63, 0.0  ;;  %vm5112_vm0 = vcmp.ge.f32.partialorder %v5104_v19, 0.0  ;;  %vm5113_vm1 = vcmp.ge.f32.partialorder %v5105_v39, 0.0  ;;  %vm5114_vm2 = vcmp.ge.f32.partialorder %v5106_v10, 0.0 }
 0x58c   :  { %vm5115_vm3 = vcmp.ge.f32.partialorder %v5107_v35, 0.0  ;;  %vm5116_vm4 = vcmp.ge.f32.partialorder %v5108_v59, 0.0  ;;  %vm5117_vm5 = vcmp.ge.f32.partialorder %v5109_v54, 0.0  ;;  %vm5118_vm7 = vcmp.ge.f32.partialorder %v5110_v2, 0.0 }
 0x58d   :  { %v5119_v16 = vmul.f32 0.2, %v5103_v63  ;;  %v5120_v50 = vmul.f32 0.2, %v5104_v19  ;;  %v5121_v24 = vmul.f32 0.2, %v5105_v39 }
 0x58e   :  { %v5122_v18 = vmul.f32 0.2, %v5106_v10  ;;  %v5123_v45 = vmul.f32 0.2, %v5107_v35  ;;  %v5124_v0 = vmul.f32 0.2, %v5108_v59 }
 0x58f   :  { %v5125_v42 = vmul.f32 0.2, %v5109_v54  ;;  %v5126_v62 = vmul.f32 0.2, %v5110_v2  ;;  %v5127_v44 = vsel %vm5111_vm15, %v5103_v63, %v5119_v16  ;;  %v5128_v36 = vsel %vm5112_vm0, %v5104_v19, %v5120_v50 }
 0x590   :  { %v5129_v20 = vsel %vm5113_vm1, %v5105_v39, %v5121_v24  ;;  %v5130_v33 = vsel %vm5114_vm2, %v5106_v10, %v5122_v18  ;;  %v5131_v49 = vsel %vm5115_vm3, %v5107_v35, %v5123_v45  ;;  %v5132_v40 = vsel %vm5116_vm4, %v5108_v59, %v5124_v0  ;;  %5143 = vst [vmem:[%s8958_s10 + $0x40] sm:$0xff] %v5127_v44 }
 0x591   :  { %5144 = vst [vmem:[%s8958_s10 + $0x48] sm:$0xff] %v5128_v36  ;;  %v5133_v1 = vsel %vm5117_vm5, %v5109_v54, %v5125_v42  ;;  %v5134_v41 = vsel %vm5118_vm7, %v5110_v2, %v5126_v62  ;;  %5145 = vst [vmem:[%s8958_s10 + $0x50] sm:$0xff] %v5129_v20 }
 0x592   :  { %5146 = vst [vmem:[%s8958_s10 + $0x58] sm:$0xff] %v5130_v33  ;;  %5147 = vst [vmem:[%s8958_s10 + $0x60] sm:$0xff] %v5131_v49 }
 0x593   :  { %5148 = vst [vmem:[%s8958_s10 + $0x68] sm:$0xff] %v5132_v40  ;;  %5149 = vst [vmem:[%s8958_s10 + $0x70] sm:$0xff] %v5133_v1 }
 0x594   :  { %5150 = vst [vmem:[%s8958_s10 + $0x78] sm:$0xff] %v5134_v41 }

</bundles_post_ra>
